<compile_context>
chip_gen: v7x
topology: tpu7x:2x2x1
jax: 0.10.0
libtpu: 0.0.40
codegen_flags: <defaults>
</compile_context>

<pallas_src>
import math
import functools

import numpy as np
import jax
import jax.numpy as jnp
from jax import lax
from jax.experimental import pallas as pl
from jax.experimental.pallas import tpu as pltpu

EPS = 1e-4          # patch-norm clamp used by the reference CKN implementation
LANES = 128         # lane width -> channel padding target for dense loads/stores
DENSE_MAX_K = 1024  # patch dims up to this use the fused single-matmul path


def _round_up(x, m):
    return (x + m - 1) // m * m


# ----------------------------------------------------------------------------
# Fused per-layer kernel: conv taps + patch norm + exp-kappa + lintrans + pool
# ----------------------------------------------------------------------------
def _ckn_layer_kernel(x_ref, w_ref, lt_ref, o_ref, s_ref, ybuf_ref, wbuf_ref, *,
                      H, W, ks, sub, alpha, gauss):
    # x_ref : (H+2p, W+2p, C)  spatially pre-padded (tap mode) / im2col (dense)
    # w_ref : (ks*ks, C, cp)   per-tap filters, zero padded to lane width
    # lt_ref: (cp, cp)         kappa(ZZ^T)^{-1/2}, zero padded
    # o_ref : (hout, wout, cp)
    C = x_ref.shape[-1]
    cp = lt_ref.shape[-1]
    nloc = H * W

    # ---- conv: tap matmuls accumulated into the f32 VMEM scratch -----------
    if ks == 1:
        # dense mode: single fused-K matmul (K already packed in the wrapper)
        s = jnp.dot(x_ref[...].reshape(nloc, C), w_ref[0],
                    preferred_element_type=jnp.float32)
    else:
        s_ref[...] = jnp.zeros_like(s_ref)
        for t in range(ks * ks):
            di, dj = t // ks, t % ks
            xs = x_ref[di:di + H, dj:dj + W, :].reshape(nloc, C)
            s_ref[...] += jnp.dot(xs, w_ref[t],
                                  preferred_element_type=jnp.float32)
        s = s_ref[...]

    # ---- patch norm: ONE per-pixel lane reduction + shifted adds -----------
    xf = x_ref[...].astype(jnp.float32)
    xsq = jnp.sum(xf * xf, axis=-1, keepdims=True)          # (Hp, Wp, 1)
    sq = xsq[0:H, 0:W, :]
    for t in range(1, ks * ks):
        di, dj = t // ks, t % ks
        sq = sq + xsq[di:di + H, dj:dj + W, :]
    sq = jnp.maximum(sq.reshape(nloc, 1), EPS * EPS)

    # ---- CKN nonlinearity: n * kappa(s/n),  kappa(u) = exp(alpha*(u-1)) ----
    inv_n = lax.rsqrt(sq)                  # EUP rsqrt: no sqrt + divide
    n = sq * inv_n                         # == clamp(||patch||, min=EPS)
    y = n * jnp.exp(alpha * (s * inv_n - 1.0))

    # ---- per-location multiplication by lintrans ----------------------------
    out = jnp.dot(y.astype(lt_ref.dtype), lt_ref[...],
                  preferred_element_type=jnp.float32)        # (nloc, cp) f32

    if sub <= 1:
        o_ref[...] = out.reshape(H, W, cp).astype(o_ref.dtype)
        return

    hout = (H - 1) // sub + 1
    wout = (W - 1) // sub + 1
    ntap = 2 * sub + 1
    lh = ybuf_ref.shape[1] - W - sub       # 8-aligned data offset (left halo)
    hr = wbuf_ref.shape[0]                 # multiple of sub

    # ---- separable Gaussian pooling: zero-halo scratches + full-width FMAs -
    # W pool: ntap strided sublane reads (zero halos == skipped taps).
    ybuf_ref[:, lh - sub:lh, :] = jnp.zeros((H, sub, cp), jnp.float32)
    ybuf_ref[:, lh + W:lh + W + sub, :] = jnp.zeros((H, sub, cp), jnp.float32)
    ybuf_ref[:, lh:lh + W, :] = out.reshape(H, W, cp)

    wp = gauss[0] * ybuf_ref[:, pl.ds(lh - sub, wout, stride=sub), :]
    for v in range(1, ntap):
        wp = wp + gauss[v] * ybuf_ref[:, pl.ds(lh - sub + v, wout, stride=sub), :]

    # H pool: strided gather on the untiled row axis expressed as a free
    # leading-dim reshape + static slices, then ONE lane-dense store.
    wbuf_ref[0:sub, :, :] = jnp.zeros((sub, wout, cp), jnp.float32)
    wbuf_ref[sub + H:hr, :, :] = jnp.zeros((hr - sub - H, wout, cp), jnp.float32)
    wbuf_ref[sub:sub + H, :, :] = wp

    w4 = wbuf_ref[...].reshape(hr // sub, sub, wout, cp)
    acc = gauss[0] * w4[0:hout, 0, :, :]
    for v in range(1, ntap):
        q, r = v // sub, v % sub
        acc = acc + gauss[v] * w4[q:q + hout, r, :, :]
    o_ref[...] = acc.astype(o_ref.dtype)


def ckn_layer_pallas(x, w_taps, lt_pad, *, H, W, ks, sub, alpha, gauss):
    """x: [B, H+2p, W+2p, C] channels-last.  Returns [B, hout, wout, cp]."""
    B, Hp, Wp, C = x.shape
    nt, Cw, cp = w_taps.shape
    pad = ks // 2
    assert nt == ks * ks and Cw == C
    assert Hp == H + 2 * pad and Wp == W + 2 * pad
    if sub > 1:
        hout, wout = (H - 1) // sub + 1, (W - 1) // sub + 1
    else:
        hout, wout = H, W
    se = max(sub, 1)
    lh = _round_up(se, 8)                         # 8-aligned pooling data start
    yb_w = lh + W + se                            # W-pool scratch width
    hr = _round_up(H, se) + 2 * se                # H-pool scratch rows

    kernel = functools.partial(
        _ckn_layer_kernel, H=H, W=W, ks=ks, sub=sub,
        alpha=float(alpha), gauss=tuple(float(g) for g in gauss))

    # VMEM budget from real residency (blocks double buffered + scratches +
    # f32 temporaries); capped at 80% of physical VMEM for v7x headroom.
    itm = x.dtype.itemsize
    est = (2 * Hp * Wp * C * itm            # input block
           + 2 * nt * C * cp * itm          # tap weights
           + 2 * cp * cp * itm              # lintrans
           + 2 * hout * wout * cp * itm     # output block
           + H * W * cp * 4                 # conv accumulator scratch
           + H * yb_w * cp * 4              # W-pool scratch
           + hr * wout * cp * 4             # H-pool scratch
           + Hp * Wp * C * 4                # f32 copy for the norm map
           + 4 * H * W * cp * 4)            # f32 epilogue temporaries / spills
    try:
        cap = int(pltpu.get_tpu_info().vmem_capacity_bytes)
    except Exception:
        cap = 64 * 2 ** 20
    vmem_limit = int(min(int(0.8 * cap), max(16 * 2 ** 20, 2 * est)))

    return pl.pallas_call(
        kernel,
        out_shape=jax.ShapeDtypeStruct((B, hout, wout, cp), x.dtype),
        grid=(B,),
        in_specs=[
            pl.BlockSpec((None, Hp, Wp, C), lambda b: (b, 0, 0, 0)),
            pl.BlockSpec((nt, C, cp), lambda b: (0, 0, 0)),
            pl.BlockSpec((cp, cp), lambda b: (0, 0)),
        ],
        out_specs=pl.BlockSpec((None, hout, wout, cp), lambda b: (b, 0, 0, 0)),
        scratch_shapes=[
            pltpu.VMEM((H * W, cp), jnp.float32),     # conv accumulator
            pltpu.VMEM((H, yb_w, cp), jnp.float32),   # W-pool source (+halo)
            pltpu.VMEM((hr, wout, cp), jnp.float32),  # H-pool source (+halo)
        ],
        compiler_params=pltpu.CompilerParams(
            dimension_semantics=("parallel",),        # batch -> both TCs
            vmem_limit_bytes=vmem_limit),
    )(x, w_taps, lt_pad)


# ----------------------------------------------------------------------------
# Glue: lintrans, per-tap / fused weights, pooling taps, parameter init
# ----------------------------------------------------------------------------
def matrix_inverse_sqrt(g, eps=1e-3):
    # TODO(synk): eigendecomposition has no Pallas equivalent; this tiny
    # (Cout x Cout) factorization is parameter preprocessing in plain JAX.
    e, v = jnp.linalg.eigh(g)
    e = jnp.clip(e, 0.0, None)
    return (v * (1.0 / jnp.sqrt(e + eps))[None, :]) @ v.T


def gaussian_taps(sub):
    size = 2 * sub + 1
    sigma = sub / math.sqrt(2.0)
    idx = np.arange(size, dtype=np.float64) - sub
    g = np.exp(-idx ** 2 / (2.0 * sigma ** 2))
    return g / g.sum()


def extract_patches_nhwc(x, ks):
    """SAME zero-padded patches, tap-major / channel-minor ordering."""
    B, H, W, C = x.shape
    pad = ks // 2
    xp = jnp.pad(x, ((0, 0), (pad, pad), (pad, pad), (0, 0)))
    cols = [xp[:, di:di + H, dj:dj + W, :]
            for di in range(ks) for dj in range(ks)]
    return jnp.concatenate(cols, axis=-1)          # (B, H, W, ks*ks*C)


def ckn_layer_forward(x, w, *, ks, sub, sigma, dense_max_k=DENSE_MAX_K):
    """One CKNLayer.  x: (B, H, W, cin) channels-last (real channels only)."""
    B, H, W, cin = x.shape
    cout, pdim = w.shape
    assert pdim == cin * ks * ks
    alpha = 1.0 / (sigma ** 2)        # 'exp' kernel: kernel_args is sigma
    cp = _round_up(cout, LANES)
    dtype = x.dtype

    # lintrans = kappa(Z Z^T)^{-1/2}, zero-padded to cp x cp (padded output
    # channels stay exactly zero; they are sliced away below).
    gram = jnp.exp(alpha * (w @ w.T - 1.0))
    lt = matrix_inverse_sqrt(gram)
    lt_pad = jnp.zeros((cp, cp), jnp.float32).at[:cout, :cout].set(lt)

    # weight reordered tap-major / channel-minor to match patch extraction
    wt = jnp.transpose(w.reshape(cout, cin, ks, ks), (2, 3, 1, 0))  # (ks,ks,cin,cout)

    if pdim <= dense_max_k:
        # dense mode: wrapper-side im2col -> one fused-K matmul in the kernel
        kpad = _round_up(pdim, LANES)
        patches = extract_patches_nhwc(x, ks)
        xin = jnp.pad(patches, ((0, 0), (0, 0), (0, 0), (0, kpad - pdim)))
        w_taps = jnp.zeros((1, kpad, cp), jnp.float32).at[0, :pdim, :cout].set(
            wt.reshape(pdim, cout))
        ks_eff = 1
    else:
        # tap mode: in-kernel im2col over ks*ks taps (avoids k^2 HBM inflation)
        cpad = _round_up(cin, LANES)
        pad = ks // 2
        xin = jnp.pad(x, ((0, 0), (pad, pad), (pad, pad), (0, cpad - cin)))
        w_taps = jnp.zeros((ks * ks, cpad, cp), jnp.float32).at[
            :, :cin, :cout].set(wt.reshape(ks * ks, cin, cout))
        ks_eff = ks

    out = ckn_layer_pallas(xin.astype(dtype), w_taps.astype(dtype),
                           lt_pad.astype(dtype), H=H, W=W, ks=ks_eff, sub=sub,
                           alpha=alpha, gauss=gaussian_taps(sub))
    # TODO(synk): on v5e, packing (w, c) into the lane dim could shrink the
    # 128-wide kernel writeback further; here we keep the lane-dense store and
    # slice to the real channels in XLA.
    return out[..., :cout]


def ckn_sequential_forward(x_nchw, params, kernel_sizes, subsamplings,
                           kernel_args_list, compute_dtype=jnp.bfloat16,
                           dense_max_k=DENSE_MAX_K):
    """CKNSequential forward.  x: NCHW float32 -> NCHW float32."""
    x = jnp.transpose(x_nchw, (0, 2, 3, 1)).astype(compute_dtype)   # NHWC
    for w, ks, sub, sigma in zip(params, kernel_sizes, subsamplings,
                                 kernel_args_list):
        x = ckn_layer_forward(x, w, ks=ks, sub=sub, sigma=sigma,
                              dense_max_k=dense_max_k)
    return jnp.transpose(x, (0, 3, 1, 2)).astype(jnp.float32)


def init_ckn_params(key, in_channels, out_channels_list, kernel_sizes):
    """Deterministic init; unit-norm filters (as CKNLayer.normalize_())."""
    params = []
    cin = in_channels
    for cout, ks in zip(out_channels_list, kernel_sizes):
        key, sub = jax.random.split(key)
        w = jax.random.normal(sub, (cout, cin * ks * ks), dtype=jnp.float32)
        w = w / jnp.linalg.norm(w, axis=1, keepdims=True)
        params.append(w)
        cin = cout
    return params


# ----------------------------------------------------------------------------
# Pure-JAX (non-Pallas) reference for validation
# ----------------------------------------------------------------------------
def gaussian_pooling_matrix(dim, sub):
    g = gaussian_taps(sub)
    dim_out = (dim - 1) // sub + 1
    m = np.zeros((dim, dim_out), dtype=np.float32)
    for j in range(dim_out):
        for v in range(2 * sub + 1):
            src = j * sub + v - sub
            if 0 <= src < dim:
                m[src, j] += g[v]
    return jnp.asarray(m)


def ckn_reference(x, params, kernel_sizes, subsamplings, kernel_args_list):
    hi = jax.lax.Precision.HIGHEST
    for w, ks, sub, sigma in zip(params, kernel_sizes, subsamplings,
                                 kernel_args_list):
        alpha = 1.0 / (sigma ** 2)
        b, c, h, ww = x.shape
        cout = w.shape[0]
        pad = ks // 2
        xp = jnp.pad(x, ((0, 0), (0, 0), (pad, pad), (pad, pad)))
        cols = [xp[:, :, di:di + h, dj:dj + ww]
                for di in range(ks) for dj in range(ks)]
        pat = jnp.stack(cols, axis=2).reshape(b, c * ks * ks, h, ww)
        pat = pat.transpose(0, 2, 3, 1).reshape(b * h * ww, c * ks * ks)
        sq = jnp.sum(pat * pat, axis=-1, keepdims=True)
        n = jnp.maximum(jnp.sqrt(sq), EPS)
        s = jnp.dot(pat, w.T, precision=hi)
        y = n * jnp.exp(alpha * (s / n - 1.0))
        lt = matrix_inverse_sqrt(jnp.exp(alpha * (jnp.dot(w, w.T, precision=hi)
                                                  - 1.0)))
        y = jnp.dot(y, lt, precision=hi)
        y = y.reshape(b, h, ww, cout).transpose(0, 3, 1, 2)
        if sub > 1:
            ph = gaussian_pooling_matrix(h, sub)
            pw = gaussian_pooling_matrix(ww, sub)
            y = jnp.einsum('bchw,hi,wj->bcij', y, ph, pw, precision=hi)
        x = y
    return x


# ----------------------------------------------------------------------------
if __name__ == "__main__":
    # CKNSequential(in_channels=4, out_channels_list=[16, 32],
    #               kernel_sizes=[3, 3], subsamplings=[2, 2],
    #               kernel_funcs=None (-> 'exp'), kernel_args_list=None (-> 0.5))
    in_channels = 4
    out_channels_list = [16, 32]
    kernel_sizes = [3, 3]
    subsamplings = [2, 2]
    kernel_args_list = [0.5, 0.5]     # sigma per layer -> alpha = 1/sigma^2

    key = jax.random.PRNGKey(0)
    kx, kp = jax.random.split(key)
    x = jax.random.normal(kx, (2, in_channels, 16, 16), dtype=jnp.float32)
    params = init_ckn_params(kp, in_channels, out_channels_list, kernel_sizes)

    fwd = functools.partial(ckn_sequential_forward,
                            kernel_sizes=kernel_sizes,
                            subsamplings=subsamplings,
                            kernel_args_list=kernel_args_list)

    out_ref = jax.block_until_ready(
        ckn_reference(x, params, kernel_sizes, subsamplings, kernel_args_list))

    # correctness gate 1: f32-compute kernels, fused-K (dense) path
    out_f32 = jax.block_until_ready(
        jax.jit(functools.partial(fwd, compute_dtype=jnp.float32))(x, params))
    np.testing.assert_allclose(np.asarray(out_f32), np.asarray(out_ref),
                               rtol=5e-3, atol=5e-3)

    # correctness gate 2: f32-compute kernels, in-kernel tap path (large-C mode)
    out_tap = jax.block_until_ready(
        jax.jit(functools.partial(fwd, compute_dtype=jnp.float32,
                                  dense_max_k=0))(x, params))
    np.testing.assert_allclose(np.asarray(out_tap), np.asarray(out_ref),
                               rtol=5e-3, atol=5e-3)

    # performance path: bf16 HBM activations / MXU inputs, f32 accumulation
    out = jax.block_until_ready(jax.jit(fwd)(x, params))

    assert out.shape == (2, out_channels_list[-1], 4, 4), out.shape
    assert bool(jnp.all(jnp.isfinite(out)))
    scale = float(jnp.max(jnp.abs(out_ref)))
    err = float(jnp.max(jnp.abs(out - out_ref)))
    assert err <= 0.15 * scale + 0.05, (err, scale)
    print("KERNEL_OK")
</pallas_src>

<mosaic_0001>
module attributes {stable_mosaic.version = 11 : i64} {
  func.func @_ckn_layer_kernel(%arg0: i32, %arg1: memref<1x16x16x128xf32, #tpu.memory_space<vmem>>, %arg2: memref<1x128x128xf32, #tpu.memory_space<vmem>>, %arg3: memref<128x128xf32, #tpu.memory_space<vmem>>, %arg4: memref<1x8x8x128xf32, #tpu.memory_space<vmem>>, %arg5: memref<256x128xf32, #tpu.memory_space<vmem>>, %arg6: memref<16x26x128xf32, #tpu.memory_space<vmem>>, %arg7: memref<20x8x128xf32, #tpu.memory_space<vmem>>) attributes {dimension_semantics = [#tpu.dimension_semantics<parallel>], iteration_bounds = array<i64: 2>, scalar_prefetch = 0 : i64, scratch_operands = 3 : i64, tpu.core_type = #tpu.core_type<tc>, window_params = [{transform_indices = @transform_0, window_bounds = array<i64: 1, 16, 16, 128>}, {pipeline_mode = #tpu.pipeline_mode<synchronous>, transform_indices = @transform_1, window_bounds = array<i64: 1, 128, 128>}, {pipeline_mode = #tpu.pipeline_mode<synchronous>, transform_indices = @transform_2, window_bounds = array<i64: 128, 128>}, {transform_indices = @transform_3, window_bounds = array<i64: 1, 8, 8, 128>}]} {
    %c0 = arith.constant 0 : index
    %c0_0 = arith.constant 0 : index
    %c0_1 = arith.constant 0 : index
    %c0_2 = arith.constant 0 : index
    %0 = vector.load %arg1[%c0, %c0_0, %c0_1, %c0_2] : memref<1x16x16x128xf32, #tpu.memory_space<vmem>>, vector<1x16x16x128xf32>
    %1 = vector.shape_cast %0 : vector<1x16x16x128xf32> to vector<16x16x128xf32>
    %2 = vector.shape_cast %1 : vector<16x16x128xf32> to vector<256x128xf32>
    %c0_3 = arith.constant 0 : index
    %c0_4 = arith.constant 0 : index
    %c0_5 = arith.constant 0 : index
    %3 = vector.load %arg2[%c0_3, %c0_4, %c0_5] : memref<1x128x128xf32, #tpu.memory_space<vmem>>, vector<1x128x128xf32>
    %4 = vector.shape_cast %3 : vector<1x128x128xf32> to vector<128x128xf32>
    %cst = arith.constant dense<0.000000e+00> : vector<256x128xf32>
    %5 = tpu.matmul %2, %4, %cst {dimension_numbers = #tpu.dot_dimension_numbers<[1], [0], [0], [1], [0, 0, 1, 1], [], []>} : vector<256x128xf32>, vector<128x128xf32>, vector<256x128xf32> -> vector<256x128xf32>
    %c0_6 = arith.constant 0 : index
    %c0_7 = arith.constant 0 : index
    %c0_8 = arith.constant 0 : index
    %c0_9 = arith.constant 0 : index
    %6 = vector.load %arg1[%c0_6, %c0_7, %c0_8, %c0_9] : memref<1x16x16x128xf32, #tpu.memory_space<vmem>>, vector<1x16x16x128xf32>
    %7 = vector.shape_cast %6 : vector<1x16x16x128xf32> to vector<16x16x128xf32>
    %8 = arith.mulf %7, %7 : vector<16x16x128xf32>
    %cst_10 = arith.constant dense<0.000000e+00> : vector<16x16xf32>
    %9 = vector.multi_reduction <add>, %8, %cst_10 [2] : vector<16x16x128xf32> to vector<16x16xf32>
    %10 = vector.shape_cast %9 : vector<16x16xf32> to vector<16x16x1xf32>
    %11 = vector.shape_cast %10 : vector<16x16x1xf32> to vector<256x1xf32>
    %cst_11 = arith.constant 9.99999993E-9 : f32
    %12 = vector.broadcast %cst_11 : f32 to vector<256x1xf32>
    %13 = arith.maximumf %11, %12 : vector<256x1xf32>
    %14 = math.rsqrt %13 : vector<256x1xf32>
    %15 = arith.mulf %13, %14 : vector<256x1xf32>
    %16 = vector.broadcast %14 : vector<256x1xf32> to vector<256x128xf32>
    %17 = arith.mulf %5, %16 : vector<256x128xf32>
    %cst_12 = arith.constant 1.000000e+00 : f32
    %18 = vector.broadcast %cst_12 : f32 to vector<256x128xf32>
    %19 = arith.subf %17, %18 : vector<256x128xf32>
    %cst_13 = arith.constant 4.000000e+00 : f32
    %20 = vector.broadcast %cst_13 : f32 to vector<256x128xf32>
    %21 = arith.mulf %20, %19 : vector<256x128xf32>
    %22 = math.exp %21 : vector<256x128xf32>
    %23 = vector.broadcast %15 : vector<256x1xf32> to vector<256x128xf32>
    %24 = arith.mulf %23, %22 : vector<256x128xf32>
    %c0_14 = arith.constant 0 : index
    %c0_15 = arith.constant 0 : index
    %25 = vector.load %arg3[%c0_14, %c0_15] : memref<128x128xf32, #tpu.memory_space<vmem>>, vector<128x128xf32>
    %cst_16 = arith.constant dense<0.000000e+00> : vector<256x128xf32>
    %26 = tpu.matmul %24, %25, %cst_16 {dimension_numbers = #tpu.dot_dimension_numbers<[1], [0], [0], [1], [0, 0, 1, 1], [], []>} : vector<256x128xf32>, vector<128x128xf32>, vector<256x128xf32> -> vector<256x128xf32>
    %cst_17 = arith.constant 0.000000e+00 : f32
    %27 = vector.broadcast %cst_17 : f32 to vector<16x2x128xf32>
    %c0_18 = arith.constant 0 : index
    %c6 = arith.constant 6 : index
    %c0_19 = arith.constant 0 : index
    %28 = vector.load %arg6[%c0_18, %c6, %c0_19] : memref<16x26x128xf32, #tpu.memory_space<vmem>>, vector<16x2x128xf32>
    tpu.vector_store %arg6[%c0_18, %c6, %c0_19], %27 {strides = array<i32>} : memref<16x26x128xf32, #tpu.memory_space<vmem>>, vector<16x2x128xf32>,
    %cst_20 = arith.constant 0.000000e+00 : f32
    %29 = vector.broadcast %cst_20 : f32 to vector<16x2x128xf32>
    %c0_21 = arith.constant 0 : index
    %c24 = arith.constant 24 : index
    %c0_22 = arith.constant 0 : index
    %30 = vector.load %arg6[%c0_21, %c24, %c0_22] : memref<16x26x128xf32, #tpu.memory_space<vmem>>, vector<16x2x128xf32>
    tpu.vector_store %arg6[%c0_21, %c24, %c0_22], %29 {strides = array<i32>} : memref<16x26x128xf32, #tpu.memory_space<vmem>>, vector<16x2x128xf32>,
    %31 = vector.shape_cast %26 : vector<256x128xf32> to vector<16x16x128xf32>
    %c0_23 = arith.constant 0 : index
    %c8 = arith.constant 8 : index
    %c0_24 = arith.constant 0 : index
    %32 = vector.load %arg6[%c0_23, %c8, %c0_24] : memref<16x26x128xf32, #tpu.memory_space<vmem>>, vector<16x16x128xf32>
    tpu.vector_store %arg6[%c0_23, %c8, %c0_24], %31 {strides = array<i32>} : memref<16x26x128xf32, #tpu.memory_space<vmem>>, vector<16x16x128xf32>,
    %c0_25 = arith.constant 0 : index
    %c6_26 = arith.constant 6 : index
    %c0_27 = arith.constant 0 : index
    %33 = tpu.strided_load %arg6[%c0_25, %c6_26, %c0_27] {strides = array<i32: 1, 2, 1>} : memref<16x26x128xf32, #tpu.memory_space<vmem>>, vector<16x8x128xf32>
    %cst_28 = arith.constant 0.111703366 : f32
    %34 = vector.broadcast %cst_28 : f32 to vector<16x8x128xf32>
    %35 = arith.mulf %34, %33 : vector<16x8x128xf32>
    %c0_29 = arith.constant 0 : index
    %c7 = arith.constant 7 : index
    %c0_30 = arith.constant 0 : index
    %36 = tpu.strided_load %arg6[%c0_29, %c7, %c0_30] {strides = array<i32: 1, 2, 1>} : memref<16x26x128xf32, #tpu.memory_space<vmem>>, vector<16x8x128xf32>
    %cst_31 = arith.constant 0.236476019 : f32
    %37 = vector.broadcast %cst_31 : f32 to vector<16x8x128xf32>
    %38 = arith.mulf %37, %36 : vector<16x8x128xf32>
    %39 = arith.addf %35, %38 : vector<16x8x128xf32>
    %c0_32 = arith.constant 0 : index
    %c8_33 = arith.constant 8 : index
    %c0_34 = arith.constant 0 : index
    %40 = tpu.strided_load %arg6[%c0_32, %c8_33, %c0_34] {strides = array<i32: 1, 2, 1>} : memref<16x26x128xf32, #tpu.memory_space<vmem>>, vector<16x8x128xf32>
    %cst_35 = arith.constant 0.30364123 : f32
    %41 = vector.broadcast %cst_35 : f32 to vector<16x8x128xf32>
    %42 = arith.mulf %41, %40 : vector<16x8x128xf32>
    %43 = arith.addf %39, %42 : vector<16x8x128xf32>
    %c0_36 = arith.constant 0 : index
    %c9 = arith.constant 9 : index
    %c0_37 = arith.constant 0 : index
    %44 = tpu.strided_load %arg6[%c0_36, %c9, %c0_37] {strides = array<i32: 1, 2, 1>} : memref<16x26x128xf32, #tpu.memory_space<vmem>>, vector<16x8x128xf32>
    %cst_38 = arith.constant 0.236476019 : f32
    %45 = vector.broadcast %cst_38 : f32 to vector<16x8x128xf32>
    %46 = arith.mulf %45, %44 : vector<16x8x128xf32>
    %47 = arith.addf %43, %46 : vector<16x8x128xf32>
    %c0_39 = arith.constant 0 : index
    %c10 = arith.constant 10 : index
    %c0_40 = arith.constant 0 : index
    %48 = tpu.strided_load %arg6[%c0_39, %c10, %c0_40] {strides = array<i32: 1, 2, 1>} : memref<16x26x128xf32, #tpu.memory_space<vmem>>, vector<16x8x128xf32>
    %cst_41 = arith.constant 0.111703366 : f32
    %49 = vector.broadcast %cst_41 : f32 to vector<16x8x128xf32>
    %50 = arith.mulf %49, %48 : vector<16x8x128xf32>
    %51 = arith.addf %47, %50 : vector<16x8x128xf32>
    %cst_42 = arith.constant 0.000000e+00 : f32
    %52 = vector.broadcast %cst_42 : f32 to vector<2x8x128xf32>
    %c0_43 = arith.constant 0 : index
    %c0_44 = arith.constant 0 : index
    %c0_45 = arith.constant 0 : index
    %53 = vector.load %arg7[%c0_43, %c0_44, %c0_45] : memref<20x8x128xf32, #tpu.memory_space<vmem>>, vector<2x8x128xf32>
    tpu.vector_store %arg7[%c0_43, %c0_44, %c0_45], %52 {strides = array<i32>} : memref<20x8x128xf32, #tpu.memory_space<vmem>>, vector<2x8x128xf32>,
    %cst_46 = arith.constant 0.000000e+00 : f32
    %54 = vector.broadcast %cst_46 : f32 to vector<2x8x128xf32>
    %c18 = arith.constant 18 : index
    %c0_47 = arith.constant 0 : index
    %c0_48 = arith.constant 0 : index
    %55 = vector.load %arg7[%c18, %c0_47, %c0_48] : memref<20x8x128xf32, #tpu.memory_space<vmem>>, vector<2x8x128xf32>
    tpu.vector_store %arg7[%c18, %c0_47, %c0_48], %54 {strides = array<i32>} : memref<20x8x128xf32, #tpu.memory_space<vmem>>, vector<2x8x128xf32>,
    %c2 = arith.constant 2 : index
    %c0_49 = arith.constant 0 : index
    %c0_50 = arith.constant 0 : index
    %56 = vector.load %arg7[%c2, %c0_49, %c0_50] : memref<20x8x128xf32, #tpu.memory_space<vmem>>, vector<16x8x128xf32>
    tpu.vector_store %arg7[%c2, %c0_49, %c0_50], %51 {strides = array<i32>} : memref<20x8x128xf32, #tpu.memory_space<vmem>>, vector<16x8x128xf32>,
    %c0_51 = arith.constant 0 : index
    %c0_52 = arith.constant 0 : index
    %c0_53 = arith.constant 0 : index
    %57 = vector.load %arg7[%c0_51, %c0_52, %c0_53] : memref<20x8x128xf32, #tpu.memory_space<vmem>>, vector<20x8x128xf32>
    %58 = vector.shape_cast %57 : vector<20x8x128xf32> to vector<10x2x8x128xf32>
    %59 = vector.extract_strided_slice %58 {offsets = [0, 0, 0, 0], sizes = [8, 1, 8, 128], strides = [1, 1, 1, 1]} : vector<10x2x8x128xf32> to vector<8x1x8x128xf32>
    %60 = vector.shape_cast %59 : vector<8x1x8x128xf32> to vector<8x8x128xf32>
    %cst_54 = arith.constant 0.111703366 : f32
    %61 = vector.broadcast %cst_54 : f32 to vector<8x8x128xf32>
    %62 = arith.mulf %61, %60 : vector<8x8x128xf32>
    %63 = vector.extract_strided_slice %58 {offsets = [0, 1, 0, 0], sizes = [8, 1, 8, 128], strides = [1, 1, 1, 1]} : vector<10x2x8x128xf32> to vector<8x1x8x128xf32>
    %64 = vector.shape_cast %63 : vector<8x1x8x128xf32> to vector<8x8x128xf32>
    %cst_55 = arith.constant 0.236476019 : f32
    %65 = vector.broadcast %cst_55 : f32 to vector<8x8x128xf32>
    %66 = arith.mulf %65, %64 : vector<8x8x128xf32>
    %67 = arith.addf %62, %66 : vector<8x8x128xf32>
    %68 = vector.extract_strided_slice %58 {offsets = [1, 0, 0, 0], sizes = [8, 1, 8, 128], strides = [1, 1, 1, 1]} : vector<10x2x8x128xf32> to vector<8x1x8x128xf32>
    %69 = vector.shape_cast %68 : vector<8x1x8x128xf32> to vector<8x8x128xf32>
    %cst_56 = arith.constant 0.30364123 : f32
    %70 = vector.broadcast %cst_56 : f32 to vector<8x8x128xf32>
    %71 = arith.mulf %70, %69 : vector<8x8x128xf32>
    %72 = arith.addf %67, %71 : vector<8x8x128xf32>
    %73 = vector.extract_strided_slice %58 {offsets = [1, 1, 0, 0], sizes = [8, 1, 8, 128], strides = [1, 1, 1, 1]} : vector<10x2x8x128xf32> to vector<8x1x8x128xf32>
    %74 = vector.shape_cast %73 : vector<8x1x8x128xf32> to vector<8x8x128xf32>
    %cst_57 = arith.constant 0.236476019 : f32
    %75 = vector.broadcast %cst_57 : f32 to vector<8x8x128xf32>
    %76 = arith.mulf %75, %74 : vector<8x8x128xf32>
    %77 = arith.addf %72, %76 : vector<8x8x128xf32>
    %78 = vector.extract_strided_slice %58 {offsets = [2, 0, 0, 0], sizes = [8, 1, 8, 128], strides = [1, 1, 1, 1]} : vector<10x2x8x128xf32> to vector<8x1x8x128xf32>
    %79 = vector.shape_cast %78 : vector<8x1x8x128xf32> to vector<8x8x128xf32>
    %cst_58 = arith.constant 0.111703366 : f32
    %80 = vector.broadcast %cst_58 : f32 to vector<8x8x128xf32>
    %81 = arith.mulf %80, %79 : vector<8x8x128xf32>
    %82 = arith.addf %77, %81 : vector<8x8x128xf32>
    %c0_59 = arith.constant 0 : index
    %c0_60 = arith.constant 0 : index
    %c0_61 = arith.constant 0 : index
    %c0_62 = arith.constant 0 : index
    %83 = vector.load %arg4[%c0_59, %c0_60, %c0_61, %c0_62] : memref<1x8x8x128xf32, #tpu.memory_space<vmem>>, vector<1x8x8x128xf32>
    %84 = vector.shape_cast %83 : vector<1x8x8x128xf32> to vector<8x8x128xf32>
    %85 = vector.shape_cast %82 : vector<8x8x128xf32> to vector<1x8x8x128xf32>
    tpu.vector_store %arg4[%c0_59, %c0_60, %c0_61, %c0_62], %85 {strides = array<i32>} : memref<1x8x8x128xf32, #tpu.memory_space<vmem>>, vector<1x8x8x128xf32>,
    return
  }
  func.func @transform_0(%arg0: i32) -> (i32, i32, i32, i32) {
    %c0_i32 = arith.constant 0 : i32
    %c0_i32_0 = arith.constant 0 : i32
    %c0_i32_1 = arith.constant 0 : i32
    %c0_i32_2 = arith.constant 0 : i32
    return %arg0, %c0_i32, %c0_i32_0, %c0_i32_1 : i32, i32, i32, i32
  }
  func.func @transform_1(%arg0: i32) -> (i32, i32, i32) {
    %c0_i32 = arith.constant 0 : i32
    %c0_i32_0 = arith.constant 0 : i32
    %c0_i32_1 = arith.constant 0 : i32
    %c0_i32_2 = arith.constant 0 : i32
    return %c0_i32, %c0_i32_0, %c0_i32_1 : i32, i32, i32
  }
  func.func @transform_2(%arg0: i32) -> (i32, i32) {
    %c0_i32 = arith.constant 0 : i32
    %c0_i32_0 = arith.constant 0 : i32
    %c0_i32_1 = arith.constant 0 : i32
    return %c0_i32, %c0_i32_0 : i32, i32
  }
  func.func @transform_3(%arg0: i32) -> (i32, i32, i32, i32) {
    %c0_i32 = arith.constant 0 : i32
    %c0_i32_0 = arith.constant 0 : i32
    %c0_i32_1 = arith.constant 0 : i32
    %c0_i32_2 = arith.constant 0 : i32
    return %arg0, %c0_i32, %c0_i32_0, %c0_i32_1 : i32, i32, i32, i32
  }
}

module attributes {stable_mosaic.version = 11 : i64} {
  func.func @_ckn_layer_kernel(%arg0: i32, %arg1: memref<1x8x8x256xf32, #tpu.memory_space<vmem>>, %arg2: memref<1x256x128xf32, #tpu.memory_space<vmem>>, %arg3: memref<128x128xf32, #tpu.memory_space<vmem>>, %arg4: memref<1x4x4x128xf32, #tpu.memory_space<vmem>>, %arg5: memref<64x128xf32, #tpu.memory_space<vmem>>, %arg6: memref<8x18x128xf32, #tpu.memory_space<vmem>>, %arg7: memref<12x4x128xf32, #tpu.memory_space<vmem>>) attributes {dimension_semantics = [#tpu.dimension_semantics<parallel>], iteration_bounds = array<i64: 2>, scalar_prefetch = 0 : i64, scratch_operands = 3 : i64, tpu.core_type = #tpu.core_type<tc>, window_params = [{transform_indices = @transform_0, window_bounds = array<i64: 1, 8, 8, 256>}, {pipeline_mode = #tpu.pipeline_mode<synchronous>, transform_indices = @transform_1, window_bounds = array<i64: 1, 256, 128>}, {pipeline_mode = #tpu.pipeline_mode<synchronous>, transform_indices = @transform_2, window_bounds = array<i64: 128, 128>}, {transform_indices = @transform_3, window_bounds = array<i64: 1, 4, 4, 128>}]} {
    %c0 = arith.constant 0 : index
    %c0_0 = arith.constant 0 : index
    %c0_1 = arith.constant 0 : index
    %c0_2 = arith.constant 0 : index
    %0 = vector.load %arg1[%c0, %c0_0, %c0_1, %c0_2] : memref<1x8x8x256xf32, #tpu.memory_space<vmem>>, vector<1x8x8x256xf32>
    %1 = vector.shape_cast %0 : vector<1x8x8x256xf32> to vector<8x8x256xf32>
    %2 = vector.shape_cast %1 : vector<8x8x256xf32> to vector<64x256xf32>
    %c0_3 = arith.constant 0 : index
    %c0_4 = arith.constant 0 : index
    %c0_5 = arith.constant 0 : index
    %3 = vector.load %arg2[%c0_3, %c0_4, %c0_5] : memref<1x256x128xf32, #tpu.memory_space<vmem>>, vector<1x256x128xf32>
    %4 = vector.shape_cast %3 : vector<1x256x128xf32> to vector<256x128xf32>
    %cst = arith.constant dense<0.000000e+00> : vector<64x128xf32>
    %5 = tpu.matmul %2, %4, %cst {dimension_numbers = #tpu.dot_dimension_numbers<[1], [0], [0], [1], [0, 0, 1, 1], [], []>} : vector<64x256xf32>, vector<256x128xf32>, vector<64x128xf32> -> vector<64x128xf32>
    %c0_6 = arith.constant 0 : index
    %c0_7 = arith.constant 0 : index
    %c0_8 = arith.constant 0 : index
    %c0_9 = arith.constant 0 : index
    %6 = vector.load %arg1[%c0_6, %c0_7, %c0_8, %c0_9] : memref<1x8x8x256xf32, #tpu.memory_space<vmem>>, vector<1x8x8x256xf32>
    %7 = vector.shape_cast %6 : vector<1x8x8x256xf32> to vector<8x8x256xf32>
    %8 = arith.mulf %7, %7 : vector<8x8x256xf32>
    %cst_10 = arith.constant dense<0.000000e+00> : vector<8x8xf32>
    %9 = vector.multi_reduction <add>, %8, %cst_10 [2] : vector<8x8x256xf32> to vector<8x8xf32>
    %10 = vector.shape_cast %9 : vector<8x8xf32> to vector<8x8x1xf32>
    %11 = vector.shape_cast %10 : vector<8x8x1xf32> to vector<64x1xf32>
    %cst_11 = arith.constant 9.99999993E-9 : f32
    %12 = vector.broadcast %cst_11 : f32 to vector<64x1xf32>
    %13 = arith.maximumf %11, %12 : vector<64x1xf32>
    %14 = math.rsqrt %13 : vector<64x1xf32>
    %15 = arith.mulf %13, %14 : vector<64x1xf32>
    %16 = vector.broadcast %14 : vector<64x1xf32> to vector<64x128xf32>
    %17 = arith.mulf %5, %16 : vector<64x128xf32>
    %cst_12 = arith.constant 1.000000e+00 : f32
    %18 = vector.broadcast %cst_12 : f32 to vector<64x128xf32>
    %19 = arith.subf %17, %18 : vector<64x128xf32>
    %cst_13 = arith.constant 4.000000e+00 : f32
    %20 = vector.broadcast %cst_13 : f32 to vector<64x128xf32>
    %21 = arith.mulf %20, %19 : vector<64x128xf32>
    %22 = math.exp %21 : vector<64x128xf32>
    %23 = vector.broadcast %15 : vector<64x1xf32> to vector<64x128xf32>
    %24 = arith.mulf %23, %22 : vector<64x128xf32>
    %c0_14 = arith.constant 0 : index
    %c0_15 = arith.constant 0 : index
    %25 = vector.load %arg3[%c0_14, %c0_15] : memref<128x128xf32, #tpu.memory_space<vmem>>, vector<128x128xf32>
    %cst_16 = arith.constant dense<0.000000e+00> : vector<64x128xf32>
    %26 = tpu.matmul %24, %25, %cst_16 {dimension_numbers = #tpu.dot_dimension_numbers<[1], [0], [0], [1], [0, 0, 1, 1], [], []>} : vector<64x128xf32>, vector<128x128xf32>, vector<64x128xf32> -> vector<64x128xf32>
    %cst_17 = arith.constant 0.000000e+00 : f32
    %27 = vector.broadcast %cst_17 : f32 to vector<8x2x128xf32>
    %c0_18 = arith.constant 0 : index
    %c6 = arith.constant 6 : index
    %c0_19 = arith.constant 0 : index
    %28 = vector.load %arg6[%c0_18, %c6, %c0_19] : memref<8x18x128xf32, #tpu.memory_space<vmem>>, vector<8x2x128xf32>
    tpu.vector_store %arg6[%c0_18, %c6, %c0_19], %27 {strides = array<i32>} : memref<8x18x128xf32, #tpu.memory_space<vmem>>, vector<8x2x128xf32>,
    %cst_20 = arith.constant 0.000000e+00 : f32
    %29 = vector.broadcast %cst_20 : f32 to vector<8x2x128xf32>
    %c0_21 = arith.constant 0 : index
    %c16 = arith.constant 16 : index
    %c0_22 = arith.constant 0 : index
    %30 = vector.load %arg6[%c0_21, %c16, %c0_22] : memref<8x18x128xf32, #tpu.memory_space<vmem>>, vector<8x2x128xf32>
    tpu.vector_store %arg6[%c0_21, %c16, %c0_22], %29 {strides = array<i32>} : memref<8x18x128xf32, #tpu.memory_space<vmem>>, vector<8x2x128xf32>,
    %31 = vector.shape_cast %26 : vector<64x128xf32> to vector<8x8x128xf32>
    %c0_23 = arith.constant 0 : index
    %c8 = arith.constant 8 : index
    %c0_24 = arith.constant 0 : index
    %32 = vector.load %arg6[%c0_23, %c8, %c0_24] : memref<8x18x128xf32, #tpu.memory_space<vmem>>, vector<8x8x128xf32>
    tpu.vector_store %arg6[%c0_23, %c8, %c0_24], %31 {strides = array<i32>} : memref<8x18x128xf32, #tpu.memory_space<vmem>>, vector<8x8x128xf32>,
    %c0_25 = arith.constant 0 : index
    %c6_26 = arith.constant 6 : index
    %c0_27 = arith.constant 0 : index
    %33 = tpu.strided_load %arg6[%c0_25, %c6_26, %c0_27] {strides = array<i32: 1, 2, 1>} : memref<8x18x128xf32, #tpu.memory_space<vmem>>, vector<8x4x128xf32>
    %cst_28 = arith.constant 0.111703366 : f32
    %34 = vector.broadcast %cst_28 : f32 to vector<8x4x128xf32>
    %35 = arith.mulf %34, %33 : vector<8x4x128xf32>
    %c0_29 = arith.constant 0 : index
    %c7 = arith.constant 7 : index
    %c0_30 = arith.constant 0 : index
    %36 = tpu.strided_load %arg6[%c0_29, %c7, %c0_30] {strides = array<i32: 1, 2, 1>} : memref<8x18x128xf32, #tpu.memory_space<vmem>>, vector<8x4x128xf32>
    %cst_31 = arith.constant 0.236476019 : f32
    %37 = vector.broadcast %cst_31 : f32 to vector<8x4x128xf32>
    %38 = arith.mulf %37, %36 : vector<8x4x128xf32>
    %39 = arith.addf %35, %38 : vector<8x4x128xf32>
    %c0_32 = arith.constant 0 : index
    %c8_33 = arith.constant 8 : index
    %c0_34 = arith.constant 0 : index
    %40 = tpu.strided_load %arg6[%c0_32, %c8_33, %c0_34] {strides = array<i32: 1, 2, 1>} : memref<8x18x128xf32, #tpu.memory_space<vmem>>, vector<8x4x128xf32>
    %cst_35 = arith.constant 0.30364123 : f32
    %41 = vector.broadcast %cst_35 : f32 to vector<8x4x128xf32>
    %42 = arith.mulf %41, %40 : vector<8x4x128xf32>
    %43 = arith.addf %39, %42 : vector<8x4x128xf32>
    %c0_36 = arith.constant 0 : index
    %c9 = arith.constant 9 : index
    %c0_37 = arith.constant 0 : index
    %44 = tpu.strided_load %arg6[%c0_36, %c9, %c0_37] {strides = array<i32: 1, 2, 1>} : memref<8x18x128xf32, #tpu.memory_space<vmem>>, vector<8x4x128xf32>
    %cst_38 = arith.constant 0.236476019 : f32
    %45 = vector.broadcast %cst_38 : f32 to vector<8x4x128xf32>
    %46 = arith.mulf %45, %44 : vector<8x4x128xf32>
    %47 = arith.addf %43, %46 : vector<8x4x128xf32>
    %c0_39 = arith.constant 0 : index
    %c10 = arith.constant 10 : index
    %c0_40 = arith.constant 0 : index
    %48 = tpu.strided_load %arg6[%c0_39, %c10, %c0_40] {strides = array<i32: 1, 2, 1>} : memref<8x18x128xf32, #tpu.memory_space<vmem>>, vector<8x4x128xf32>
    %cst_41 = arith.constant 0.111703366 : f32
    %49 = vector.broadcast %cst_41 : f32 to vector<8x4x128xf32>
    %50 = arith.mulf %49, %48 : vector<8x4x128xf32>
    %51 = arith.addf %47, %50 : vector<8x4x128xf32>
    %cst_42 = arith.constant 0.000000e+00 : f32
    %52 = vector.broadcast %cst_42 : f32 to vector<2x4x128xf32>
    %c0_43 = arith.constant 0 : index
    %c0_44 = arith.constant 0 : index
    %c0_45 = arith.constant 0 : index
    %53 = vector.load %arg7[%c0_43, %c0_44, %c0_45] : memref<12x4x128xf32, #tpu.memory_space<vmem>>, vector<2x4x128xf32>
    tpu.vector_store %arg7[%c0_43, %c0_44, %c0_45], %52 {strides = array<i32>} : memref<12x4x128xf32, #tpu.memory_space<vmem>>, vector<2x4x128xf32>,
    %cst_46 = arith.constant 0.000000e+00 : f32
    %54 = vector.broadcast %cst_46 : f32 to vector<2x4x128xf32>
    %c10_47 = arith.constant 10 : index
    %c0_48 = arith.constant 0 : index
    %c0_49 = arith.constant 0 : index
    %55 = vector.load %arg7[%c10_47, %c0_48, %c0_49] : memref<12x4x128xf32, #tpu.memory_space<vmem>>, vector<2x4x128xf32>
    tpu.vector_store %arg7[%c10_47, %c0_48, %c0_49], %54 {strides = array<i32>} : memref<12x4x128xf32, #tpu.memory_space<vmem>>, vector<2x4x128xf32>,
    %c2 = arith.constant 2 : index
    %c0_50 = arith.constant 0 : index
    %c0_51 = arith.constant 0 : index
    %56 = vector.load %arg7[%c2, %c0_50, %c0_51] : memref<12x4x128xf32, #tpu.memory_space<vmem>>, vector<8x4x128xf32>
    tpu.vector_store %arg7[%c2, %c0_50, %c0_51], %51 {strides = array<i32>} : memref<12x4x128xf32, #tpu.memory_space<vmem>>, vector<8x4x128xf32>,
    %c0_52 = arith.constant 0 : index
    %c0_53 = arith.constant 0 : index
    %c0_54 = arith.constant 0 : index
    %57 = vector.load %arg7[%c0_52, %c0_53, %c0_54] : memref<12x4x128xf32, #tpu.memory_space<vmem>>, vector<12x4x128xf32>
    %58 = vector.shape_cast %57 : vector<12x4x128xf32> to vector<6x2x4x128xf32>
    %59 = vector.extract_strided_slice %58 {offsets = [0, 0, 0, 0], sizes = [4, 1, 4, 128], strides = [1, 1, 1, 1]} : vector<6x2x4x128xf32> to vector<4x1x4x128xf32>
    %60 = vector.shape_cast %59 : vector<4x1x4x128xf32> to vector<4x4x128xf32>
    %cst_55 = arith.constant 0.111703366 : f32
    %61 = vector.broadcast %cst_55 : f32 to vector<4x4x128xf32>
    %62 = arith.mulf %61, %60 : vector<4x4x128xf32>
    %63 = vector.extract_strided_slice %58 {offsets = [0, 1, 0, 0], sizes = [4, 1, 4, 128], strides = [1, 1, 1, 1]} : vector<6x2x4x128xf32> to vector<4x1x4x128xf32>
    %64 = vector.shape_cast %63 : vector<4x1x4x128xf32> to vector<4x4x128xf32>
    %cst_56 = arith.constant 0.236476019 : f32
    %65 = vector.broadcast %cst_56 : f32 to vector<4x4x128xf32>
    %66 = arith.mulf %65, %64 : vector<4x4x128xf32>
    %67 = arith.addf %62, %66 : vector<4x4x128xf32>
    %68 = vector.extract_strided_slice %58 {offsets = [1, 0, 0, 0], sizes = [4, 1, 4, 128], strides = [1, 1, 1, 1]} : vector<6x2x4x128xf32> to vector<4x1x4x128xf32>
    %69 = vector.shape_cast %68 : vector<4x1x4x128xf32> to vector<4x4x128xf32>
    %cst_57 = arith.constant 0.30364123 : f32
    %70 = vector.broadcast %cst_57 : f32 to vector<4x4x128xf32>
    %71 = arith.mulf %70, %69 : vector<4x4x128xf32>
    %72 = arith.addf %67, %71 : vector<4x4x128xf32>
    %73 = vector.extract_strided_slice %58 {offsets = [1, 1, 0, 0], sizes = [4, 1, 4, 128], strides = [1, 1, 1, 1]} : vector<6x2x4x128xf32> to vector<4x1x4x128xf32>
    %74 = vector.shape_cast %73 : vector<4x1x4x128xf32> to vector<4x4x128xf32>
    %cst_58 = arith.constant 0.236476019 : f32
    %75 = vector.broadcast %cst_58 : f32 to vector<4x4x128xf32>
    %76 = arith.mulf %75, %74 : vector<4x4x128xf32>
    %77 = arith.addf %72, %76 : vector<4x4x128xf32>
    %78 = vector.extract_strided_slice %58 {offsets = [2, 0, 0, 0], sizes = [4, 1, 4, 128], strides = [1, 1, 1, 1]} : vector<6x2x4x128xf32> to vector<4x1x4x128xf32>
    %79 = vector.shape_cast %78 : vector<4x1x4x128xf32> to vector<4x4x128xf32>
    %cst_59 = arith.constant 0.111703366 : f32
    %80 = vector.broadcast %cst_59 : f32 to vector<4x4x128xf32>
    %81 = arith.mulf %80, %79 : vector<4x4x128xf32>
    %82 = arith.addf %77, %81 : vector<4x4x128xf32>
    %c0_60 = arith.constant 0 : index
    %c0_61 = arith.constant 0 : index
    %c0_62 = arith.constant 0 : index
    %c0_63 = arith.constant 0 : index
    %83 = vector.load %arg4[%c0_60, %c0_61, %c0_62, %c0_63] : memref<1x4x4x128xf32, #tpu.memory_space<vmem>>, vector<1x4x4x128xf32>
    %84 = vector.shape_cast %83 : vector<1x4x4x128xf32> to vector<4x4x128xf32>
    %85 = vector.shape_cast %82 : vector<4x4x128xf32> to vector<1x4x4x128xf32>
    tpu.vector_store %arg4[%c0_60, %c0_61, %c0_62, %c0_63], %85 {strides = array<i32>} : memref<1x4x4x128xf32, #tpu.memory_space<vmem>>, vector<1x4x4x128xf32>,
    return
  }
  func.func @transform_0(%arg0: i32) -> (i32, i32, i32, i32) {
    %c0_i32 = arith.constant 0 : i32
    %c0_i32_0 = arith.constant 0 : i32
    %c0_i32_1 = arith.constant 0 : i32
    %c0_i32_2 = arith.constant 0 : i32
    return %arg0, %c0_i32, %c0_i32_0, %c0_i32_1 : i32, i32, i32, i32
  }
  func.func @transform_1(%arg0: i32) -> (i32, i32, i32) {
    %c0_i32 = arith.constant 0 : i32
    %c0_i32_0 = arith.constant 0 : i32
    %c0_i32_1 = arith.constant 0 : i32
    %c0_i32_2 = arith.constant 0 : i32
    return %c0_i32, %c0_i32_0, %c0_i32_1 : i32, i32, i32
  }
  func.func @transform_2(%arg0: i32) -> (i32, i32) {
    %c0_i32 = arith.constant 0 : i32
    %c0_i32_0 = arith.constant 0 : i32
    %c0_i32_1 = arith.constant 0 : i32
    return %c0_i32, %c0_i32_0 : i32, i32
  }
  func.func @transform_3(%arg0: i32) -> (i32, i32, i32, i32) {
    %c0_i32 = arith.constant 0 : i32
    %c0_i32_0 = arith.constant 0 : i32
    %c0_i32_1 = arith.constant 0 : i32
    %c0_i32_2 = arith.constant 0 : i32
    return %arg0, %c0_i32, %c0_i32_0, %c0_i32_1 : i32, i32, i32, i32
  }
}

</mosaic_0001>

<bundles_post_ra>
// kernel: custom-call.4
= control target key start
LH: loop header
LB: loop body
LE: loop exit
PB: predicated region body
PF: predicated region fallthrough
CT: control target
= control target key end

     0   :  { %s2375_s30 = smov [#allocation0]   ;;  %s2724_s0 = inlined_call_operand.vmem [shape: f32[8,8], index: 0, kind: input, shape index: {}]   ;;  %s2725_s1 = inlined_call_operand.vmem [shape: f32[8,8], index: 1, kind: input, shape index: {}]   ;;  %s2726_s2 = inlined_call_operand.vmem [shape: f32[8,8], index: 2, kind: input, shape index: {}]   ;;  %s2727_s3 = inlined_call_operand.vmem [shape: f32[8,8], index: 3, kind: input, shape index: {}]   ;;  %s2728_s4 = inlined_call_operand.vmem [shape: f32[8], index: 4, kind: output, shape index: {0}]   ;;  %s2729_s5 = inlined_call_operand.vmem [shape: f32[8], index: 5, kind: output, shape index: {1}]   ;;  %s2730_s6 = inlined_call_operand.vmem [shape: f32[8,8], index: 6, kind: output, shape index: {2}]   ;;  %s2731_s7 = inlined_call_operand.vmem [shape: f32[8,8], index: 7, kind: output, shape index: {3}]   ;;  %s2732_s8 = inlined_call_operand.vmem [shape: f32[8,8], index: 8, kind: output, shape index: {4}]   ;;  %s2733_s9 = inlined_call_operand.vmem [shape: f32[8,8], index: 9, kind: output, shape index: {5}]  }
   0x1   :  { %s2379_s12 = smov %s2724_s0  }
   0x2 LB: > { %v58_v0 = vld [vmem:[%s2381_s12] sm:$0xff]  ;;  %s60_s12 = scalar_lea.vmem %s2381_s12, 8   ;;  %s2381_s12 = sphi %s2379_s12, %s60_s12   ;;  %s2377_s30 = sphi %s2375_s30, %s61_s30  }
   0x3   : > { %59 = vst [vmem:[%s2377_s30] sm:$0xff] %v58_v0  ;;  %s61_s30 = scalar_lea.vmem %s2377_s30, 8   ;;  %p55_p0 = scmp.gt.s32.totalorder %s60_s12, %s2724_s0 }
   0x4   :  { %s2383_s15 = smov (%p55_p0), [#allocation1]   ;;  %s2387_s18 = smov (%p55_p0), %s2725_s1  }
   0x5   :  { %57 = sbr.rel (!%p55_p0) target bundleno = 2 (0x2), region = 358 }
   0xc LB: > { %v120_v1 = vld [vmem:[%s2389_s18] sm:$0xff]  ;;  %s122_s18 = scalar_lea.vmem %s2389_s18, 8   ;;  %s2389_s18 = sphi %s2387_s18, %s122_s18   ;;  %s2385_s15 = sphi %s2383_s15, %s123_s15  }
   0xd   : > { %121 = vst [vmem:[%s2385_s15] sm:$0xff] %v120_v1  ;;  %s123_s15 = scalar_lea.vmem %s2385_s15, 8   ;;  %p117_p1 = scmp.gt.s32.totalorder %s122_s18, %s2725_s1 }
   0xe   :  { %s2391_s0 = smov (%p117_p1), [#allocation2]   ;;  %s2395_s23 = smov (%p117_p1), %s2726_s2  }
   0xf   :  { %119 = sbr.rel (!%p117_p1) target bundleno = 12 (0xc), region = 380 }
  0x16 LB: > { %v182_v2 = vld [vmem:[%s2397_s23] sm:$0xff]  ;;  %s184_s23 = scalar_lea.vmem %s2397_s23, 8   ;;  %s2397_s23 = sphi %s2395_s23, %s184_s23   ;;  %s2393_s0 = sphi %s2391_s0, %s185_s0  }
  0x17   : > { %183 = vst [vmem:[%s2393_s0] sm:$0xff] %v182_v2  ;;  %s185_s0 = scalar_lea.vmem %s2393_s0, 8   ;;  %p179_p2 = scmp.gt.s32.totalorder %s184_s23, %s2726_s2 }
  0x18   :  { %s2399_s1 = smov (%p179_p2), [#allocation3]   ;;  %s2403_s28 = smov (%p179_p2), %s2727_s3  }
  0x19   :  { %181 = sbr.rel (!%p179_p2) target bundleno = 22 (0x16), region = 402 }
  0x20 LB: > { %v244_v3 = vld [vmem:[%s2405_s28] sm:$0xff]  ;;  %s246_s28 = scalar_lea.vmem %s2405_s28, 8   ;;  %s2405_s28 = sphi %s2403_s28, %s246_s28   ;;  %s2401_s1 = sphi %s2399_s1, %s247_s1  }
  0x21   : > { %245 = vst [vmem:[%s2401_s1] sm:$0xff] %v244_v3  ;;  %s247_s1 = scalar_lea.vmem %s2401_s1, 8   ;;  %p241_p3 = scmp.gt.s32.totalorder %s246_s28, %s2727_s3 }
  0x22   :  { %s259_s2 = smov (%p241_p3), [#allocation12]  ;;  %v260_v4 = vld [vmem:[#allocation0] sm:$0xff] (%p241_p3)  ;;  %s262_s10 = smov (%p241_p3), [#allocation13]  ;;  %v263_v5 = vld [vmem:[#allocation1] sm:$0xff] (%p241_p3)  ;;  %v266_v6 = vld [vmem:[#allocation2] sm:$0xff] (%p241_p3)  ;;  %v276_v7 = vlaneseq (%p241_p3)  ;;  %v2447_v9 = vmov (%p241_p3), 0.0  }
  0x23   :  { %243 = sbr.rel (!%p241_p3) target bundleno = 32 (0x20), region = 424  ;;  %261 = vst [vmem:[%s259_s2] sm:$0xff] (%p241_p3), %v260_v4  ;;  %264 = vst [vmem:[%s262_s10] sm:$0xff] (%p241_p3), %v263_v5  ;;  %s265_s11 = smov (%p241_p3), [#allocation14] }
  0x24   :  { %s268_s12 = smov (%p241_p3), [#allocation15]  ;;  %271 = vst [vmem:[#allocation8] sm:$0xff] (%p241_p3), %v2447_v9  ;;  %272 = vst [vmem:[#allocation9] sm:$0xff] (%p241_p3), %v2447_v9  ;;  %v2524_v10 = vand.u32 (%p241_p3), 127, %v276_v7  ;;  %v2526_v11 = vshrl.u32 (%p241_p3), %v276_v7, 7  ;;  %s275_s3 = smov (%p241_p3), [#allocation8] }
  0x25   :  { %273 = vst [vmem:[#allocation10] sm:$0xff] (%p241_p3), %v2447_v9  ;;  %274 = vst [vmem:[#allocation11] sm:$0xff] (%p241_p3), %v2447_v9  ;;  %s288_s13 = smov (%p241_p3), [#allocation11]  ;;  %s1401_s14 = smov (%p241_p3), [#allocation12] }
  0x26   :  { %267 = vst [vmem:[%s265_s11] sm:$0xff] (%p241_p3), %v266_v6  ;;  %v278_v10 = vmov (%p241_p3), %v2524_v10  ;;  %v281_v11 = vmov (%p241_p3), %v2526_v11  ;;  %vm1405_vm2 = vcmp.lt.s32.totalorder (%p241_p3), %v2524_v10, 8  ;;  %s1418_s15 = smov (%p241_p3), [#allocation13]  ;;  %s1435_s16 = smov (%p241_p3), [#allocation14] }
  0x27   :  { %v291_v10 = vmov (%p241_p3), %v2524_v10  ;;  %v294_v11 = vmov (%p241_p3), %v2526_v11  ;;  %vm285_vm0 = vcmp.eq.s32.totalorder (%p241_p3), %v281_v11, %v278_v10  ;;  %s1452_s17 = smov (%p241_p3), [#allocation15] }
  0x28   :  { %v269_v8 = vld [vmem:[#allocation3] sm:$0xff] (%p241_p3)  ;;  %vm298_vm1 = vcmp.eq.s32.totalorder (%p241_p3), %v294_v11, %v291_v10  ;;  %v1397_v10 = vmov (%p241_p3), %v2524_v10  ;;  %v1400_v11 = vmov (%p241_p3), %v2526_v11 }
  0x29   :  { %270 = vst [vmem:[%s268_s12] sm:$0xff] (%p241_p3), %v269_v8  ;;  %vm1410_vm3 = vcmp.eq.s32.totalorder (%p241_p3), %v1400_v11, %v1397_v10  ;;  %v1448_v10 = vmov (%p241_p3), %v2524_v10  ;;  %v1417_v11 = vmov (%p241_p3), %v2526_v11 }
  0x2a   :  { %v1407_v16 = vld [vmem:[%s1401_s14] sm:$0xff]  ;;  %v1414_v10 = vmov %v2524_v10  ;;  %v1451_v11 = vmov %v2526_v11 }
  0x2b   :  { %v282_v12 = vld [vmem:[%s275_s3] sm:$0xff]  ;;  %v1408_v18 = vsel %vm1405_vm2, %v1407_v16, 0.0  ;;  %v1431_v10 = vmov %v2524_v10  ;;  %v1434_v11 = vmov %v2526_v11  ;;  %vm1461_vm4 = vcmp.eq.s32.totalorder %v1451_v11, %v1448_v10 }
  0x2c   :  { %v295_v13 = vld [vmem:[%s288_s13] sm:$0xff]  ;;  %v286_v14 = vsel %vm285_vm0, 1.0, %v282_v12  ;;  %v1409_v22 = vmul.f32 %v1408_v18, %v1408_v18 }
  0x2d   :  { %v299_v15 = vsel %vm298_vm1, 1.0, %v295_v13  ;;  %287 = vst [vmem:[%s275_s3] sm:$0xff] %v286_v14  ;;  %v1424_v17 = vld [vmem:[%s1418_s15] sm:$0xff] }
  0x2e   :  { %300 = vst [vmem:[%s288_s13] sm:$0xff] %v299_v15  ;;  %v1425_v19 = vsel %vm1405_vm2, %v1424_v17, 0.0  ;;  %v1441_v20 = vld [vmem:[%s1435_s16] sm:$0xff]  ;;  %v1411_v29 = vsel %vm1410_vm3, 0.0, %v1409_v22 }
  0x2f   :  { %v1426_v23 = vmul.f32 %v1425_v19, %v1425_v19  ;;  %v1442_v24 = vsel %vm1405_vm2, %v1441_v20, 0.0 }
  0x30   :  { %v1458_v21 = vld [vmem:[%s1452_s17] sm:$0xff]  ;;  %v1443_v26 = vmul.f32 %v1442_v24, %v1442_v24 }
  0x31   :  { %v1459_v25 = vsel %vm1405_vm2, %v1458_v21, 0.0  ;;  %v1428_v27 = vadd.f32 %v1426_v23, %v1409_v22  ;;  %v1427_v30 = vadd.f32 %v1426_v23, %v1411_v29 }
  0x32   :  { %v1460_v28 = vmul.f32 %v1459_v25, %v1459_v25 }
  0x33   :  { %v1445_v31 = vadd.f32 %v1443_v26, %v1428_v27  ;;  %v1444_v32 = vadd.f32 %v1443_v26, %v1427_v30 }
  0x34   :  { %v1462_v33 = vsel %vm1461_vm4, 0.0, %v1460_v28 }
  0x35   :  { %v1464_v34 = vadd.f32 %v1460_v28, %v1445_v31  ;;  %v1463_v35 = vadd.f32 %v1462_v33, %v1444_v32 }
  0x37   :  { %1465 = vadd.xlane.f32.xlu0 %v1464_v34 }
  0x3b   :  { %1473 = vadd.xlane.f32.xlu0 %v1463_v35 }
  0xc4   :  { %v1466_v36 = vpop.xlane.xlu0 %1465 }
  0xc5   :  { %v1467_v37 = vrot.slane %v1466_v36, 4 }
  0xc7   :  { %v1468_v38 = vadd.f32 %v1467_v37, %v1466_v36 }
  0xc8   :  { %v1474_v39 = vpop.xlane.xlu0 %1473 }
  0xc9   :  { %v1469_v40 = vrot.slane %v1468_v38, 2  ;;  %v1475_v41 = vrot.slane %v1474_v39, 4 }
  0xcb   :  { %v1476_v42 = vadd.f32 %v1475_v41, %v1474_v39  ;;  %v1470_v43 = vadd.f32 %v1469_v40, %v1468_v38 }
  0xcd   :  { %v1477_v44 = vrot.slane %v1476_v42, 2  ;;  %v1471_v46 = vrot.slane %v1470_v43, 1 }
  0xcf   :  { %v1478_v45 = vadd.f32 %v1477_v44, %v1476_v42  ;;  %v1472_v49 = vadd.f32 %v1471_v46, %v1470_v43 }
  0xd1   :  { %v1479_v47 = vrot.slane %v1478_v45, 1 }
  0xd3   :  { %v1480_v48 = vadd.f32 %v1479_v47, %v1478_v45 }
  0xd5   :  { %1656 = vpush %v1480_v48 }
  0xd6   :  { %1658 = vpush %v1472_v49 }
 0x106   :  { %s1657_s18 = spop %1656 }
 0x107   :  { %s1659_s19 = spop %1658 }
 0x108   :  { %s1483_s20 = smul.f32 1e-10, %s1659_s19 }
 0x10a   :  { %p1484_p4 = scmp.le.f32.partialorder %s1657_s18, %s1483_s20 }
 0x10b   :  { %s2550_s0 = smov (!%p1484_p4), 0  }
 0x10c   :  { %1487 = sbr.rel (%p1484_p4) target bundleno = 950 (0x3b6), region = 440 }
 0x113 LB: > { %s2555_s21 = smov 0   ;;  %s2409_s0 = sphi %s2550_s0, %s2734_s0  }
 0x114 LB: >> { %s405_s22 = smov [#allocation12]  ;;  %v409_v10 = vmov %v2524_v10  ;;  %v412_v11 = vmov %v2526_v11  ;;  %s425_s23 = smov [#allocation13]  ;;  %vm728_vm14 = vcmp.eq.s32.totalorder %v2526_v11, 0  ;;  %vm740_vm15 = vcmp.eq.s32.totalorder %v2526_v11, 7  ;;  %s2413_s21 = sphi %s2555_s21, %s404_s21  }
 0x115   : >> { %v429_v10 = vmov %v2524_v10  ;;  %v432_v11 = vmov %v2526_v11  ;;  %v413_v50 = vld [vmem:[%s405_s22] sm:$0xff]  ;;  %vm416_vm5 = vcmp.eq.s32.totalorder %v412_v11, %v409_v10  ;;  %s445_s24 = smov [#allocation15]  ;;  %s406_s25 = smov [#allocation16] }
 0x116   : >> { %vm436_vm6 = vcmp.eq.s32.totalorder %v432_v11, %v429_v10  ;;  %v449_v10 = vmov %v2524_v10  ;;  %v452_v11 = vmov %v2526_v11  ;;  %v417_v51 = vsel %vm416_vm5, %v413_v50, 0.0  ;;  %v433_v52 = vld [vmem:[%s425_s23] sm:$0xff]  ;;  %s426_s1 = smov [#allocation17]  ;;  %s446_s26 = smov [#allocation18] }
 0x117   : >> { %vm456_vm7 = vcmp.eq.s32.totalorder %v452_v11, %v449_v10  ;;  %v418_v53 = vrot.slane %v417_v51, 4  ;;  %v437_v54 = vsel %vm436_vm6, %v433_v52, 0.0  ;;  %v453_v55 = vld [vmem:[%s445_s24] sm:$0xff]  ;;  %s469_s27 = smov [#allocation17]  ;;  %s467_s28 = smov [#allocation16]  ;;  %v518_v10 = vmov %v2524_v10 }
 0x118   : >> { %v438_v56 = vrot.slane %v437_v54, 4  ;;  %v457_v57 = vsel %vm456_vm7, %v453_v55, 0.0  ;;  %s471_s29 = smov [#allocation18]  ;;  %s506_s30 = smov [#allocation19]  ;;  %v521_v11 = vmov %v2526_v11  ;;  %v533_v10 = vmov %v2524_v10 }
 0x119   : >> { %v419_v58 = vadd.f32 %v418_v53, %v417_v51  ;;  %v458_v59 = vrot.slane %v457_v57, 4  ;;  %s508_s2 = smov [#allocation20]  ;;  %s465_s10 = smov [#allocation21]  ;;  %v536_v11 = vmov %v2526_v11  ;;  %vm523_vm12 = vcmp.eq.s32.totalorder %v521_v11, %v518_v10 }
 0x11a   : >> { %v439_v60 = vadd.f32 %v438_v56, %v437_v54  ;;  %s466_s11 = smov [#allocation22]  ;;  %s510_s10 = smov %s465_s10  ;;  %vm538_vm13 = vcmp.eq.s32.totalorder %v536_v11, %v533_v10  ;;  %v631_v10 = vmov %v2524_v10  ;;  %v634_v11 = vmov %v2526_v11 }
 0x11b   : >> { %v420_v61 = vrot.slane %v419_v58, 2  ;;  %v459_v62 = vadd.f32 %v458_v59, %v457_v57  ;;  %s512_s11 = smov %s466_s11  ;;  %s514_s12 = smov [#allocation21]  ;;  %v604_v10 = vmov %v2524_v10  ;;  %v607_v11 = vmov %v2526_v11 }
 0x11c   : >> { %v440_v63 = vrot.slane %v439_v60, 2  ;;  %s529_s3 = smov [#allocation22]  ;;  %s527_s13 = smov [#allocation23]  ;;  %v645_v10 = vmov %v2524_v10  ;;  %v648_v11 = vmov %v2526_v11  ;;  %vm638_vm0 = vcmp.eq.s32.totalorder %v634_v11, %v631_v10 }
 0x11d   : >> { %v421_v0 = vadd.f32 %v420_v61, %v419_v58  ;;  %v460_v1 = vrot.slane %v459_v62, 2  ;;  %s544_s14 = smov [#allocation23]  ;;  %s2570_s15 = smov [#allocation12]  ;;  %v618_v10 = vmov %v2524_v10  ;;  %v621_v11 = vmov %v2526_v11 }
 0x11e   : >> { %v441_v2 = vadd.f32 %v440_v63, %v439_v60  ;;  %s542_s16 = smov [#allocation24]  ;;  %s2572_s17 = smov [#allocation13]  ;;  %v552_v49 = vld [vmem:[%s2570_s15] sm:$0xff]  ;;  %vm612_vm1 = vcmp.eq.s32.totalorder %v607_v11, %v604_v10  ;;  %vm653_vm3 = vcmp.eq.s32.totalorder %v648_v11, %v645_v10  ;;  %vm625_vm4 = vcmp.eq.s32.totalorder %v621_v11, %v618_v10 }
 0x11f   : >> { %v422_v3 = vrot.slane %v421_v0, 1  ;;  %v461_v4 = vadd.f32 %v460_v1, %v459_v62  ;;  %s2574_s18 = smov [#allocation15]  ;;  %s768_s19 = smov [#allocation23]  ;;  %v553_v50 = vld [vmem:[%s2572_s17] sm:$0xff]  ;;  %vm667_vm5 = vcmp.eq.s32.totalorder %v2524_v10, 0  ;;  %vm671_vm6 = vcmp.eq.s32.totalorder %v2524_v10, 1 }
 0x120   : >> { %v442_v5 = vrot.slane %v441_v2, 1  ;;  %s2576_s20 = smov [#allocation8]  ;;  %s2578_s22 = smov [#allocation9]  ;;  %v555_v51 = vld [vmem:[%s2574_s18] sm:$0xff]  ;;  %vm684_vm7 = vcmp.eq.s32.totalorder %v2524_v10, 7 }
 0x121   : >> { %v423_v6 = vadd.f32 %v422_v3, %v421_v0  ;;  %v462_v7 = vrot.slane %v461_v4, 1  ;;  %s2580_s23 = smov [#allocation10]  ;;  %s2583_s24 = smov [#allocation11]  ;;  %v776_v52 = vld [vmem:[%s2576_s20] sm:$0xff] }
 0x122   : >> { %v443_v8 = vadd.f32 %v442_v5, %v441_v2  ;;  %v777_v53 = vld [vmem:[%s2578_s22] sm:$0xff]  ;;  %s404_s21 = sadd.s32 1, %s2413_s21  }
 0x123   : >> { %424 = vst [vmem:[%s406_s25] sm:$0x1] %v423_v6  ;;  %v463_v9 = vadd.f32 %v462_v7, %v461_v4  ;;  %s2585_s25 = smov [#allocation14]  ;;  %v778_v56 = vld [vmem:[%s2580_s23] sm:$0xff]  ;;  %p401_p5 = scmp.ge.s32.totalorder %s404_s21, 15  }
 0x124   : >> { %444 = vst [vmem:[%s426_s1] sm:$0x1] %v443_v8  ;;  %v779_v57 = vld [vmem:[%s2583_s24] sm:$0xff]  ;;  %s546_s1 = smov [#allocation24]  ;;  %v305_v10 = vmov (%p401_p5), %v2524_v10  ;;  %v308_v11 = vmov (%p401_p5), %v2526_v11 }
 0x125   : >> { %464 = vst [vmem:[%s446_s26] sm:$0x1] %v463_v9  ;;  %s770_s26 = smov [#allocation24]  ;;  %v554_v58 = vld [vmem:[%s2585_s25] sm:$0xff]  ;;  %v358_v10 = vmov (%p401_p5), %v2524_v10 }
 0x12a   : >> { %v468_v14 = vld [vmem:[%s467_s28] sm:$0xff]  ;;  %s797_s28 = smov [#allocation10] }
 0x12b   : >> { %v470_v12 = vld [vmem:[%s469_s27] sm:$0xff]  ;;  %v491_v27 = vand.u32 2147483647, %v468_v14  ;;  %s796_s27 = smov [#allocation8] }
 0x12c   : >> { %v474_v13 = vmul.f32 2.0, %v470_v12  ;;  %v472_v15 = vld [vmem:[%s471_s29] sm:$0xff]  ;;  %v492_v32 = vand.u32 2147483647, %v470_v12  ;;  %s572_s29 = smov [#allocation21] }
 0x12d   : >> { %v473_v16 = vsub.f32 %v472_v15, %v468_v14  ;;  %v493_v28 = vand.u32 2147483647, %v472_v15 }
 0x12e   : >> { %2135 = vrcp.f32 %v474_v13 }
 0x12f   : >> { %v494_v31 = vmin.f32 %v491_v27, %v493_v28 }
 0x131   : >> { %v495_v33 = vmul.f32 1.1920929e-08, %v494_v31 }
 0x133   : >> { %vm496_vm11 = vcmp.le.f32.partialorder %v492_v32, %v495_v33 }
 0x138   : >> { %v2136_v17 = vpop.eup %2135 }
 0x139   : >> { %v476_v18 = vmul.f32 %v2136_v17, %v473_v16 }
 0x13b   : >> { %v478_v19 = vmul.f32 %v476_v18, %v476_v18  ;;  %vm477_vm10 = vcmp.ge.f32.partialorder %v476_v18, 0.0 }
 0x13d   : >> { %v479_v20 = vadd.f32 1.0, %v478_v19 }
 0x13f   : >> { %2137 = vrsqrt.f32 %v479_v20  ;;  %vm482_vm8 = vcmp.eq.f32.partialorder %v479_v20, inf  ;;  %v485_v22 = vand.u32 2147483648, %v479_v20  ;;  %vm484_vm9 = vcmp.eq.f32.partialorder %v479_v20, 0.0 }
 0x149   : >> { %v2138_v21 = vpop.eup %2137 }
 0x14a   : >> { %v481_v23 = vmul.f32 %v2138_v21, %v479_v20 }
 0x14c   : >> { %v483_v24 = vsel %vm482_vm8, %v479_v20, %v481_v23  ;;  %vm320_vm8 = vcmp.eq.s32.totalorder (%p401_p5), %v308_v11, %v305_v10  ;;  %v361_v11 = vmov (%p401_p5), %v2526_v11  ;;  %v324_v10 = vmov (%p401_p5), %v2524_v10 }
 0x14d   : >> { %v486_v25 = vsel %vm484_vm9, %v485_v22, %v483_v24  ;;  %v327_v11 = vmov (%p401_p5), %v2526_v11  ;;  %v341_v10 = vmov (%p401_p5), %v2524_v10  ;;  %vm373_vm9 = vcmp.eq.s32.totalorder (%p401_p5), %v361_v11, %v358_v10 }
 0x14e   : >> { %v487_v26 = vxor.u32 2147483648, %v486_v25  ;;  %v344_v11 = vmov (%p401_p5), %v2526_v11 }
 0x150   : >> { %v488_v29 = vsel %vm477_vm10, %v486_v25, %v487_v26 }
 0x151   : >> { %v489_v30 = vadd.f32 %v488_v29, %v476_v18 }
 0x153   : >> { %2139 = vrcp.f32 %v489_v30 }
 0x15d   : >> { %v2140_v34 = vpop.eup %2139 }
 0x15e   : >> { %v497_v35 = vsel %vm496_vm11, 0.0, %v2140_v34 }
 0x15f   : >> { %v498_v36 = vmul.f32 %v497_v35, %v497_v35  ;;  %v502_v37 = vmul.f32 %v497_v35, %v470_v12 }
 0x161   : >> { %v499_v38 = vadd.f32 1.0, %v498_v36  ;;  %v503_v39 = vsub.f32 %v468_v14, %v502_v37  ;;  %v505_v40 = vadd.f32 %v502_v37, %v472_v15 }
 0x163   : >> { %2141 = vrsqrt.f32 %v499_v38  ;;  %507 = vst [vmem:[%s506_s30] sm:$0xff] %v503_v39  ;;  %509 = vst [vmem:[%s508_s2] sm:$0xff] %v505_v40  ;;  %s574_s30 = smov [#allocation22]  ;;  %s2602_s2 = smov [#allocation9] }
 0x16d   : >> { %v2142_v41 = vpop.eup %2141 }
 0x16e   : >> { %511 = vst [vmem:[%s510_s10] sm:$0xff] %v2142_v41  ;;  %v501_v42 = vmul.f32 %v2142_v41, %v497_v35  ;;  %s2604_s10 = smov [#allocation11] }
 0x170   : >> { %513 = vst [vmem:[%s512_s11] sm:$0xff] %v501_v42  ;;  %s2608_s11 = smov [#allocation14] }
 0x175   : >> { %v515_v43 = vld [vmem:[%s514_s12] ss:$0 sm:$0xff]  ;;  %s2610_s12 = smov [#allocation15] }
 0x176   : >> { %v524_v44 = vsel %vm523_vm12, %v515_v43, 0.0  ;;  %v573_v23 = vld [vmem:[%s572_s29] ss:$0 sm:$0xff]  ;;  %s745_s29 = smov [#allocation15] }
 0x177   : >> { %525 = vadd.xlane.f32.xlu0 %v524_v44  ;;  %v530_v45 = vld [vmem:[%s529_s3] ss:$0 sm:$0xff]  ;;  %s2612_s3 = smov [#allocation12] }
 0x178   : >> { %v539_v46 = vsel %vm538_vm13, %v530_v45, 0.0  ;;  %v575_v24 = vld [vmem:[%s574_s30] ss:$0 sm:$0xff]  ;;  %s844_s30 = sadd.s32 (%p401_p5), 1, %s2409_s0  }
 0x179   : > { %p397_p6 = scmp.ge.s32.totalorder (%p401_p5), %s844_s30, 15  ;;  %s2734_s0 = smov (%p401_p5), %s844_s30 }
 0x17b   : >> { %540 = vadd.xlane.f32.xlu0 %v539_v46 }
 0x204   : >> { %v526_v47 = vpop.xlane.xlu0 %525 }
 0x205   : >> { %528 = vst [vmem:[%s527_s13] sm:$0xff] %v526_v47  ;;  %s2614_s13 = smov [#allocation13] }
 0x208   : >> { %v541_v48 = vpop.xlane.xlu0 %540 }
 0x209   : >> { %543 = vst [vmem:[%s542_s16] sm:$0xff] %v541_v48  ;;  %s628_s16 = smov [#allocation14] }
 0x20c   : >> { %v545_v54 = vld [vmem:[%s544_s14] sm:$0xff]  ;;  %s601_s14 = smov [#allocation19] }
 0x20d   : >> { %v769_v55 = vld [vmem:[%s768_s19] sm:$0xff]  ;;  %v556_v59 = vmul.f32 %v552_v49, %v545_v54  ;;  %v559_v60 = vmul.f32 %v553_v50, %v545_v54  ;;  %v566_v61 = vmul.f32 %v555_v51, %v545_v54  ;;  %v563_v4 = vmul.f32 %v554_v58, %v545_v54  ;;  %s615_s19 = smov [#allocation13] }
 0x20e   : >> { %v780_v62 = vmul.f32 %v776_v52, %v769_v55  ;;  %v783_v63 = vmul.f32 %v777_v53, %v769_v55  ;;  %v787_v0 = vmul.f32 %v778_v56, %v769_v55  ;;  %v790_v1 = vmul.f32 %v779_v57, %v769_v55  ;;  %v608_v55 = vld [vmem:[%s601_s14] ss:$0 sm:$0xff] }
 0x210   : >> { %v547_v2 = vld [vmem:[%s546_s1] sm:$0xff]  ;;  %s2651_s1 = smov [#allocation15] }
 0x211   : >> { %v771_v3 = vld [vmem:[%s770_s26] sm:$0xff]  ;;  %v560_v5 = vmul.f32 %v555_v51, %v547_v2  ;;  %v562_v6 = vmul.f32 %v552_v49, %v547_v2  ;;  %v565_v7 = vmul.f32 %v553_v50, %v547_v2  ;;  %v557_v14 = vmul.f32 %v554_v58, %v547_v2  ;;  %s720_s26 = smov [#allocation12] }
 0x212   : >> { %v781_v8 = vmul.f32 %v778_v56, %v771_v3  ;;  %v784_v9 = vmul.f32 %v779_v57, %v771_v3  ;;  %v786_v12 = vmul.f32 %v776_v52, %v771_v3  ;;  %v789_v13 = vmul.f32 %v777_v53, %v771_v3 }
 0x213   : >> { %v561_v15 = vsub.f32 %v559_v60, %v560_v5  ;;  %v567_v16 = vadd.f32 %v566_v61, %v565_v7  ;;  %v564_v18 = vadd.f32 %v563_v4, %v562_v6  ;;  %v558_v22 = vsub.f32 %v556_v59, %v557_v14 }
 0x214   : >> { %v782_v17 = vsub.f32 %v780_v62, %v781_v8  ;;  %v785_v19 = vsub.f32 %v783_v63, %v784_v9  ;;  %v788_v20 = vadd.f32 %v787_v0, %v786_v12  ;;  %v791_v21 = vadd.f32 %v790_v1, %v789_v13 }
 0x215   : >> { %569 = vst [vmem:[%s2572_s17] sm:$0xff] %v561_v15  ;;  %571 = vst [vmem:[%s2574_s18] sm:$0xff] %v567_v16  ;;  %s600_s17 = smov [#allocation12]  ;;  %s641_s18 = smov [#allocation15] }
 0x216   : >> { %792 = vst [vmem:[%s2576_s20] sm:$0xff] %v782_v17  ;;  %570 = vst [vmem:[%s2585_s25] sm:$0xff] %v564_v18  ;;  %s2648_s20 = smov [#allocation14]  ;;  %s2449_s25 = smov 127  }
 0x217   : >> { %793 = vst [vmem:[%s2578_s22] sm:$0xff] %v785_v19  ;;  %794 = vst [vmem:[%s2580_s23] sm:$0xff] %v788_v20  ;;  %s656_s22 = smov [#allocation12]  ;;  %s2448_s23 = smov 1  }
 0x218   : >> { %795 = vst [vmem:[%s2583_s24] sm:$0xff] %v791_v21  ;;  %568 = vst [vmem:[%s2570_s15] sm:$0xff] %v558_v22  ;;  %s642_s15 = smov [#allocation20]  ;;  %s657_s24 = smov [#allocation13] }
 0x219   : >> { %v649_v56 = vld [vmem:[%s642_s15] ss:$0 sm:$0xff] }
 0x21c   : >> { %v583_v39 = vld [vmem:[%s2610_s12] sm:$0xff] }
 0x21d   : >> { %v798_v25 = vld [vmem:[%s796_s27] ss:$0 sm:$0xff]  ;;  %v1627_v27 = vld [vmem:[%s796_s27 + $0x7] ss:$0 sm:$0xff]  ;;  %v591_v42 = vmul.f32 %v583_v39, %v575_v24  ;;  %v594_v46 = vmul.f32 %v583_v39, %v573_v23 }
 0x21e   : >> { %v1626_v26 = vld [vmem:[%s796_s27 - $0x1] sm:$0xfe]  ;;  %v1631_v34 = vld [vmem:[%s2602_s2 + $0x7] ss:$0 sm:$0xff] }
 0x21f   : >> { %v805_v28 = vsel %vm728_vm14, %v798_v25, %v1626_v26  ;;  %v809_v29 = vld [vmem:[%s797_s28] ss:$0 sm:$0xff]  ;;  %v1629_v30 = vld [vmem:[%s797_s28 + $0x1] sm:$0x7f] }
 0x220   : >> { %v822_v31 = vld [vmem:[%s2602_s2] ss:$0 sm:$0xff]  ;;  %808 = vst [vmem:[%s796_s27] sm:$0xff] %v805_v28  ;;  %v817_v32 = vsel %vm740_vm15, %v1627_v27, %v1629_v30  ;;  %v1633_v37 = vld [vmem:[%s2604_s10 + $0x1] sm:$0x7f] }
 0x221   : >> { %v1630_v33 = vld [vmem:[%s2602_s2 - $0x1] sm:$0xfe]  ;;  %1628 = vst [vmem:[%s796_s27 + $0x1] sm:$0x1] %v809_v29  ;;  %819 = vst [vmem:[%s797_s28] sm:$0xff] %v817_v32  ;;  %v841_v40 = vsel %vm740_vm15, %v1631_v34, %v1633_v37  ;;  %s744_s27 = smov [#allocation13]  ;;  %s721_s28 = smov [#allocation14] }
 0x222   : >> { %v833_v35 = vld [vmem:[%s2604_s10] ss:$0 sm:$0xff]  ;;  %v829_v36 = vsel %vm728_vm14, %v822_v31, %v1630_v33 }
 0x223   : >> { %v582_v38 = vld [vmem:[%s2608_s11] sm:$0xff]  ;;  %832 = vst [vmem:[%s2602_s2] sm:$0xff] %v829_v36  ;;  %843 = vst [vmem:[%s2604_s10] sm:$0xff] %v841_v40  ;;  %s328_s10 = smov (%p401_p5), [#allocation13] }
 0x224   : >> { %v590_v41 = vmul.f32 %v582_v38, %v573_v23  ;;  %v593_v43 = vmul.f32 %v582_v38, %v575_v24  ;;  %v580_v44 = vld [vmem:[%s2612_s3] sm:$0xff]  ;;  %1632 = vst [vmem:[%s2602_s2 + $0x1] sm:$0x1] %v833_v35  ;;  %s309_s2 = smov (%p401_p5), [#allocation12] }
 0x225   : >> { %v581_v45 = vld [vmem:[%s2614_s13] sm:$0xff]  ;;  %v584_v47 = vmul.f32 %v580_v44, %v573_v23  ;;  %v587_v49 = vmul.f32 %v580_v44, %v575_v24 }
 0x226   : >> { %v585_v48 = vmul.f32 %v581_v45, %v575_v24  ;;  %v592_v50 = vsub.f32 %v590_v41, %v591_v42  ;;  %v588_v51 = vmul.f32 %v581_v45, %v573_v23  ;;  %v595_v52 = vadd.f32 %v594_v46, %v593_v43 }
 0x228   : >> { %v586_v53 = vsub.f32 %v584_v47, %v585_v48  ;;  %598 = vst [vmem:[%s2608_s11] sm:$0xff] %v592_v50  ;;  %v589_v54 = vadd.f32 %v588_v51, %v587_v49  ;;  %599 = vst [vmem:[%s2610_s12] sm:$0xff] %v595_v52  ;;  %s345_s11 = smov (%p401_p5), [#allocation14]  ;;  %s362_s12 = smov (%p401_p5), [#allocation15] }
 0x22a   : >> { %596 = vst [vmem:[%s2612_s3] sm:$0xff] %v586_v53  ;;  %597 = vst [vmem:[%s2614_s13] sm:$0xff] %v589_v54 }
 0x22f   : >> { %v635_v57 = vld [vmem:[%s628_s16] sm:$0xff] }
 0x230   : >> { %v639_v58 = vsel %vm638_vm0, 0.0, %v635_v57  ;;  %v650_v60 = vld [vmem:[%s641_s18] sm:$0xff] }
 0x231   : >> { %v609_v59 = vld [vmem:[%s600_s17] sm:$0xff]  ;;  %640 = vst [vmem:[%s628_s16] sm:$0xff] %v639_v58  ;;  %v654_v63 = vsel %vm653_vm3, %v649_v56, %v650_v60 }
 0x232   : >> { %v613_v61 = vsel %vm612_vm1, %v608_v55, %v609_v59  ;;  %v622_v62 = vld [vmem:[%s615_s19] sm:$0xff]  ;;  %655 = vst [vmem:[%s641_s18] sm:$0xff] %v654_v63 }
 0x233   : >> { %614 = vst [vmem:[%s600_s17] sm:$0xff] %v613_v61  ;;  %v626_v0 = vsel %vm625_vm4, 0.0, %v622_v62 }
 0x234   : >> { %627 = vst [vmem:[%s615_s19] sm:$0xff] %v626_v0 }
 0x238   : >> { %v694_v1 = vld [vmem:[%s2648_s20] sm:$0xff] }
 0x239   : >> { %695 = vrot.lane.b32.xlu0 %v694_v1, %s2448_s23  ;;  %v690_v4 = vld [vmem:[%s2651_s1] sm:$0xff] }
 0x23a   : >> { %v662_v2 = vld [vmem:[%s656_s22] sm:$0xff] }
 0x23b   : >> { %663 = vrot.lane.b32.xlu1 %v662_v2, %s2448_s23  ;;  %v658_v3 = vld [vmem:[%s657_s24] sm:$0xff] }
 0x23f   : >> { %659 = vrot.lane.b32.xlu1 %v658_v3, %s2448_s23 }
 0x243   : >> { %680 = vrot.lane.b32.xlu1 %v658_v3, %s2449_s25 }
 0x247   : >> { %691 = vrot.lane.b32.xlu1 %v690_v4, %s2448_s23 }
 0x24b   : >> { %712 = vrot.lane.b32.xlu1 %v690_v4, %s2449_s25 }
 0x2ab   : >> { %v696_v13 = vpop.permute.xlu0 %695 }
 0x2ac   : >> { %v700_v15 = vsel %vm667_vm5, %v694_v1, %v696_v13 }
 0x2ad   : >> { %v664_v5 = vpop.permute.xlu1 %663 }
 0x2ae   : >> { %v668_v6 = vsel %vm667_vm5, %v662_v2, %v664_v5 }
 0x2b1   : >> { %v660_v7 = vpop.permute.xlu1 %659 }
 0x2b2   : >> { %v672_v8 = vsel %vm671_vm6, %v660_v7, %v668_v6 }
 0x2b3   : >> { %v678_v9 = vsel %vm1405_vm2, %v672_v8, 0.0 }
 0x2b4   : >> { %686 = vst [vmem:[%s656_s22] sm:$0xff] %v678_v9 }
 0x2b5   : >> { %v681_v12 = vpop.permute.xlu1 %680 }
 0x2b6   : >> { %v685_v14 = vsel %vm684_vm7, %v662_v2, %v681_v12 }
 0x2b7   : >> { %687 = vst [vmem:[%s657_s24] sm:$0xff] %v685_v14 }
 0x2b9   : >> { %v692_v16 = vpop.permute.xlu1 %691 }
 0x2ba   : >> { %v704_v17 = vsel %vm671_vm6, %v692_v16, %v700_v15 }
 0x2bb   : >> { %v722_v18 = vld [vmem:[%s720_s26] ss:$0 sm:$0xff]  ;;  %v1619_v20 = vld [vmem:[%s720_s26 + $0x7] ss:$0 sm:$0xff]  ;;  %v710_v22 = vsel %vm1405_vm2, %v704_v17, 0.0 }
 0x2bc   : >> { %v1618_v19 = vld [vmem:[%s720_s26 - $0x1] sm:$0xfe]  ;;  %718 = vst [vmem:[%s2648_s20] sm:$0xff] %v710_v22 }
 0x2bd   : >> { %v729_v21 = vsel %vm728_vm14, %v722_v18, %v1618_v19  ;;  %v713_v23 = vpop.permute.xlu1 %712 }
 0x2be   : >> { %732 = vst [vmem:[%s720_s26] sm:$0xff] %v729_v21  ;;  %v746_v24 = vld [vmem:[%s744_s27] ss:$0 sm:$0xff]  ;;  %v1623_v26 = vld [vmem:[%s744_s27 + $0x7] ss:$0 sm:$0xff]  ;;  %v717_v27 = vsel %vm684_vm7, %v694_v1, %v713_v23 }
 0x2bf   : >> { %v1622_v25 = vld [vmem:[%s744_s27 - $0x1] sm:$0xfe]  ;;  %719 = vst [vmem:[%s2651_s1] sm:$0xff] %v717_v27 }
 0x2c0   : >> { %v753_v28 = vsel %vm728_vm14, %v746_v24, %v1622_v25 }
 0x2c1   : >> { %756 = vst [vmem:[%s744_s27] sm:$0xff] %v753_v28 }
 0x2c3   : >> { %v733_v29 = vld [vmem:[%s721_s28] ss:$0 sm:$0xff]  ;;  %v1621_v30 = vld [vmem:[%s721_s28 + $0x1] sm:$0x7f] }
 0x2c4   : >> { %1620 = vst [vmem:[%s720_s26 + $0x1] sm:$0x1] %v733_v29  ;;  %v741_v31 = vsel %vm740_vm15, %v1619_v20, %v1621_v30  ;;  %403 = sbr.rel (!%p401_p5) target bundleno = 276 (0x114), region = 435 }
 0x2c5   : >> { %743 = vst [vmem:[%s721_s28] sm:$0xff] %v741_v31 }
 0x2c6   : >> { %v757_v32 = vld [vmem:[%s745_s29] ss:$0 sm:$0xff]  ;;  %v1625_v33 = vld [vmem:[%s745_s29 + $0x1] sm:$0x7f] }
 0x2c7   : >> { %1624 = vst [vmem:[%s744_s27 + $0x1] sm:$0x1] %v757_v32  ;;  %v765_v34 = vsel %vm740_vm15, %v1623_v26, %v1625_v33 }
 0x2c8   : >> { %767 = vst [vmem:[%s745_s29] sm:$0xff] %v765_v34 }
 0x2cb   : > { %v315_v35 = vld [vmem:[%s309_s2] sm:$0xff] }
 0x2cc   : > { %v316_v37 = vsel %vm1405_vm2, %v315_v35, 0.0  ;;  %v351_v39 = vld [vmem:[%s345_s11] sm:$0xff] }
 0x2cd   : > { %v317_v41 = vmul.f32 %v316_v37, %v316_v37  ;;  %v352_v43 = vsel %vm1405_vm2, %v351_v39, 0.0 }
 0x2ce   : > { %v334_v36 = vld [vmem:[%s328_s10] sm:$0xff]  ;;  %v353_v45 = vmul.f32 %v352_v43, %v352_v43 }
 0x2cf   : > { %v335_v38 = vsel %vm1405_vm2, %v334_v36, 0.0  ;;  %v368_v40 = vld [vmem:[%s362_s12] sm:$0xff]  ;;  %v321_v48 = vsel %vm320_vm8, 0.0, %v317_v41 }
 0x2d0   : > { %v336_v42 = vmul.f32 %v335_v38, %v335_v38  ;;  %v369_v44 = vsel %vm1405_vm2, %v368_v40, 0.0 }
 0x2d1   : > { %v370_v47 = vmul.f32 %v369_v44, %v369_v44 }
 0x2d2   : > { %v338_v46 = vadd.f32 %v336_v42, %v317_v41  ;;  %v337_v49 = vadd.f32 %v336_v42, %v321_v48 }
 0x2d3   : > { %v374_v52 = vsel %vm373_vm9, 0.0, %v370_v47 }
 0x2d4   : > { %v355_v50 = vadd.f32 %v353_v45, %v338_v46  ;;  %v354_v51 = vadd.f32 %v353_v45, %v337_v49 }
 0x2d6   : > { %v376_v53 = vadd.f32 %v370_v47, %v355_v50  ;;  %v375_v54 = vadd.f32 %v374_v52, %v354_v51 }
 0x2d8   : > { %377 = vadd.xlane.f32.xlu0 %v376_v53 }
 0x2dc   : > { %385 = vadd.xlane.f32.xlu0 %v375_v54 }
 0x365   : > { %v378_v55 = vpop.xlane.xlu0 %377 }
 0x366   : > { %v379_v56 = vrot.slane %v378_v55, 4 }
 0x368   : > { %v380_v57 = vadd.f32 %v379_v56, %v378_v55 }
 0x369   : > { %v386_v58 = vpop.xlane.xlu0 %385 }
 0x36a   : > { %v381_v59 = vrot.slane %v380_v57, 2  ;;  %v387_v60 = vrot.slane %v386_v58, 4 }
 0x36c   : > { %v388_v61 = vadd.f32 %v387_v60, %v386_v58  ;;  %v382_v62 = vadd.f32 %v381_v59, %v380_v57 }
 0x36e   : > { %v389_v63 = vrot.slane %v388_v61, 2  ;;  %v383_v1 = vrot.slane %v382_v62, 1 }
 0x370   : > { %v390_v0 = vadd.f32 %v389_v63, %v388_v61  ;;  %v384_v4 = vadd.f32 %v383_v1, %v382_v62 }
 0x372   : > { %v391_v2 = vrot.slane %v390_v0, 1 }
 0x374   : > { %v392_v3 = vadd.f32 %v391_v2, %v390_v0 }
 0x376   : > { %1660 = vpush %v392_v3 }
 0x377   : > { %1662 = vpush %v384_v4 }
 0x3a7   : > { %s1661_s21 = spop %1660 }
 0x3a8   : > { %s1663_s3 = spop %1662 }
 0x3a9   : > { %s395_s13 = smul.f32 1e-10, %s1663_s3 }
 0x3ab   : > { %p396_p7 = scmp.le.f32.partialorder %s1661_s21, %s395_s13 }
 0x3ad   : > { %p398_p8 = por %p397_p6, %p396_p7 }
 0x3af   :  { %846 = sbr.rel (!%p398_p8) target bundleno = 275 (0x113), region = 446 }
 0x3b6 PF:  { %s847_s14 = smov [#allocation12]  ;;  %v851_v10 = vmov %v2524_v10  ;;  %v854_v11 = vmov %v2526_v11  ;;  %s867_s15 = smov [#allocation15] }
 0x3b7   :  { %v871_v10 = vmov %v2524_v10  ;;  %v874_v11 = vmov %v2526_v11  ;;  %v855_v5 = vld [vmem:[%s847_s14] sm:$0xff]  ;;  %vm858_vm10 = vcmp.eq.s32.totalorder %v854_v11, %v851_v10  ;;  %s848_s0 = smov [#allocation4]  ;;  %s868_s16 = smov [#allocation6] }
 0x3b8   :  { %vm878_vm11 = vcmp.eq.s32.totalorder %v874_v11, %v871_v10  ;;  %v859_v6 = vsel %vm858_vm10, %v855_v5, 0.0  ;;  %v875_v7 = vld [vmem:[%s867_s15] sm:$0xff]  ;;  %s2415_s24 = smov %s2730_s6   ;;  %s2419_s25 = smov [#allocation8]  }
 0x3b9   :  { %v860_v8 = vrot.slane %v859_v6, 4  ;;  %v879_v9 = vsel %vm878_vm11, %v875_v7, 0.0 }
 0x3ba   :  { %v880_v12 = vrot.slane %v879_v9, 4 }
 0x3bb   :  { %v861_v13 = vadd.f32 %v860_v8, %v859_v6 }
 0x3bc   :  { %v881_v14 = vadd.f32 %v880_v12, %v879_v9 }
 0x3bd   :  { %v862_v15 = vrot.slane %v861_v13, 2 }
 0x3be   :  { %v882_v16 = vrot.slane %v881_v14, 2 }
 0x3bf   :  { %v863_v17 = vadd.f32 %v862_v15, %v861_v13 }
 0x3c0   :  { %v883_v18 = vadd.f32 %v882_v16, %v881_v14 }
 0x3c1   :  { %v864_v19 = vrot.slane %v863_v17, 1 }
 0x3c2   :  { %v884_v20 = vrot.slane %v883_v18, 1 }
 0x3c3   :  { %v865_v21 = vadd.f32 %v864_v19, %v863_v17 }
 0x3c4   :  { %v885_v22 = vadd.f32 %v884_v20, %v883_v18 }
 0x3c5   :  { %866 = vst [vmem:[%s848_s0] sm:$0x1] %v865_v21 }
 0x3c6   :  { %886 = vst [vmem:[%s868_s16] sm:$0x1] %v885_v22 }
 0x3cc   :  { %v890_v10 = vld [vmem:[#allocation4] sm:$0x1] }
 0x3cd   :  { %892 = vst [vmem:[#allocation5] sm:$0x1] %v890_v10  ;;  %v896_v11 = vld [vmem:[#allocation6] sm:$0x1] }
 0x3ce   :  { %898 = vst [vmem:[#allocation7] sm:$0x1] %v896_v11 }
 0x3d4   :  { %v961_v23 = vld [vmem:[#allocation5] sm:$0x1] }
 0x3d5   :  { %962 = vst [vmem:[%s2728_s4] sm:$0x1] %v961_v23  ;;  %v1025_v24 = vld [vmem:[#allocation7] sm:$0x1] }
 0x3d6   :  { %1026 = vst [vmem:[%s2729_s5] sm:$0x1] %v1025_v24 }
 0x3d7 LB: > { %v1074_v25 = vld [vmem:[%s2421_s25] sm:$0xff]  ;;  %s1076_s25 = scalar_lea.vmem %s2421_s25, 8   ;;  %s2421_s25 = sphi %s2419_s25, %s1076_s25   ;;  %s2417_s24 = sphi %s2415_s24, %s1077_s24  }
 0x3d8   : > { %1075 = vst [vmem:[%s2417_s24] sm:$0xff] %v1074_v25  ;;  %s1077_s24 = scalar_lea.vmem %s2417_s24, 8   ;;  %p1071_p9 = scmp.gt.s32.totalorder %s1076_s25, [#allocation8] }
 0x3d9   :  { %s2423_s5 = smov (%p1071_p9), %s2731_s7   ;;  %s2427_s26 = smov (%p1071_p9), [#allocation9]  }
 0x3da   :  { %1073 = sbr.rel (!%p1071_p9) target bundleno = 983 (0x3d7), region = 512 }
 0x3e1 LB: > { %v1136_v26 = vld [vmem:[%s2429_s26] sm:$0xff]  ;;  %s1138_s26 = scalar_lea.vmem %s2429_s26, 8   ;;  %s2429_s26 = sphi %s2427_s26, %s1138_s26   ;;  %s2425_s5 = sphi %s2423_s5, %s1139_s5  }
 0x3e2   : > { %1137 = vst [vmem:[%s2425_s5] sm:$0xff] %v1136_v26  ;;  %s1139_s5 = scalar_lea.vmem %s2425_s5, 8   ;;  %p1133_p10 = scmp.gt.s32.totalorder %s1138_s26, [#allocation9] }
 0x3e3   :  { %s2431_s28 = smov (%p1133_p10), %s2732_s8   ;;  %s2435_s29 = smov (%p1133_p10), [#allocation10]  }
 0x3e4   :  { %1135 = sbr.rel (!%p1133_p10) target bundleno = 993 (0x3e1), region = 534 }
 0x3eb LB: > { %v1198_v27 = vld [vmem:[%s2437_s29] sm:$0xff]  ;;  %s1200_s29 = scalar_lea.vmem %s2437_s29, 8   ;;  %s2437_s29 = sphi %s2435_s29, %s1200_s29   ;;  %s2433_s28 = sphi %s2431_s28, %s1201_s28  }
 0x3ec   : > { %1199 = vst [vmem:[%s2433_s28] sm:$0xff] %v1198_v27  ;;  %s1201_s28 = scalar_lea.vmem %s2433_s28, 8   ;;  %p1195_p11 = scmp.gt.s32.totalorder %s1200_s29, [#allocation10] }
 0x3ed   :  { %s2439_s2 = smov (%p1195_p11), %s2733_s9   ;;  %s2443_s10 = smov (%p1195_p11), [#allocation11]  }
 0x3ee   :  { %1197 = sbr.rel (!%p1195_p11) target bundleno = 1003 (0x3eb), region = 556 }
 0x3f5 LB: > { %v1260_v28 = vld [vmem:[%s2445_s10] sm:$0xff]  ;;  %s1262_s10 = scalar_lea.vmem %s2445_s10, 8   ;;  %s2445_s10 = sphi %s2443_s10, %s1262_s10   ;;  %s2441_s2 = sphi %s2439_s2, %s1263_s2  }
 0x3f6   : > { %1261 = vst [vmem:[%s2441_s2] sm:$0xff] %v1260_v28  ;;  %s1263_s2 = scalar_lea.vmem %s2441_s2, 8   ;;  %p1257_p12 = scmp.gt.s32.totalorder %s1262_s10, [#allocation11] }
 0x3f8   :  { %1259 = sbr.rel (!%p1257_p12) target bundleno = 1013 (0x3f5), region = 578 }

// kernel: custom-call.5
= control target key start
LH: loop header
LB: loop body
LE: loop exit
PB: predicated region body
PF: predicated region fallthrough
CT: control target
= control target key end

     0   :  { %s3478_s0 = inlined_call_operand.vmem [shape: f32[16,16], index: 0, kind: input, shape index: {}]   ;;  %s3479_s1 = inlined_call_operand.vmem [shape: f32[16,16], index: 1, kind: input, shape index: {}]   ;;  %s3480_s2 = inlined_call_operand.vmem [shape: f32[16,16], index: 2, kind: input, shape index: {}]   ;;  %s3481_s3 = inlined_call_operand.vmem [shape: f32[16,16], index: 3, kind: input, shape index: {}]   ;;  %s3482_s4 = inlined_call_operand.vmem [shape: f32[16], index: 4, kind: output, shape index: {0}]   ;;  %s3483_s5 = inlined_call_operand.vmem [shape: f32[16], index: 5, kind: output, shape index: {1}]   ;;  %s3484_s6 = inlined_call_operand.vmem [shape: f32[16,16], index: 6, kind: output, shape index: {2}]   ;;  %s3485_s7 = inlined_call_operand.vmem [shape: f32[16,16], index: 7, kind: output, shape index: {3}]   ;;  %s3486_s8 = inlined_call_operand.vmem [shape: f32[16,16], index: 8, kind: output, shape index: {4}]   ;;  %s3487_s9 = inlined_call_operand.vmem [shape: f32[16,16], index: 9, kind: output, shape index: {5}]  }
   0x1   :  { %s24_s11 = scalar_lea.vmem %s3478_s0, 8 }
   0x2   :  { %p1741_p0 = scmp.gt.s32.totalorder %s3478_s0, %s24_s11 }
   0x3   :  { %s2918_s14 = smov (!%p1741_p0), [#allocation0]   ;;  %s2922_s17 = smov (!%p1741_p0), %s3478_s0  }
   0x4   :  { %1742 = sbr.rel (%p1741_p0) target bundleno = 21 (0x15), region = 421 }
   0xb LB: > { %v58_v0 = vld [vmem:[%s2924_s17] sm:$0xff]  ;;  %s60_s17 = scalar_lea.vmem %s2924_s17, 8   ;;  %s2924_s17 = sphi %s2922_s17, %s60_s17   ;;  %s2920_s14 = sphi %s2918_s14, %s61_s14  }
   0xc   : > { %59 = vst [vmem:[%s2920_s14] sm:$0xff] %v58_v0  ;;  %s61_s14 = scalar_lea.vmem %s2920_s14, 8   ;;  %p55_p1 = scmp.gt.s32.totalorder %s60_s17, %s24_s11 }
   0xe   :  { %57 = sbr.rel (!%p55_p1) target bundleno = 11 (0xb), region = 427 }
  0x15 PF:  { %s86_s20 = scalar_lea.vmem %s3479_s1, 8 }
  0x16   :  { %p1761_p2 = scmp.gt.s32.totalorder %s3479_s1, %s86_s20 }
  0x17   :  { %s2926_s0 = smov (!%p1761_p2), [#allocation1]   ;;  %s2930_s25 = smov (!%p1761_p2), %s3479_s1  }
  0x18   :  { %1762 = sbr.rel (%p1761_p2) target bundleno = 41 (0x29), region = 443 }
  0x1f LB: > { %v120_v1 = vld [vmem:[%s2932_s25] sm:$0xff]  ;;  %s122_s25 = scalar_lea.vmem %s2932_s25, 8   ;;  %s2932_s25 = sphi %s2930_s25, %s122_s25   ;;  %s2928_s0 = sphi %s2926_s0, %s123_s0  }
  0x20   : > { %121 = vst [vmem:[%s2928_s0] sm:$0xff] %v120_v1  ;;  %s123_s0 = scalar_lea.vmem %s2928_s0, 8   ;;  %p117_p3 = scmp.gt.s32.totalorder %s122_s25, %s86_s20 }
  0x22   :  { %119 = sbr.rel (!%p117_p3) target bundleno = 31 (0x1f), region = 449 }
  0x29 PF:  { %s148_s28 = scalar_lea.vmem %s3480_s2, 8 }
  0x2a   :  { %p1781_p4 = scmp.gt.s32.totalorder %s3480_s2, %s148_s28 }
  0x2b   :  { %s2934_s1 = smov (!%p1781_p4), [#allocation2]   ;;  %s2938_s12 = smov (!%p1781_p4), %s3480_s2  }
  0x2c   :  { %1782 = sbr.rel (%p1781_p4) target bundleno = 61 (0x3d), region = 465 }
  0x33 LB: > { %v182_v2 = vld [vmem:[%s2940_s12] sm:$0xff]  ;;  %s184_s12 = scalar_lea.vmem %s2940_s12, 8   ;;  %s2940_s12 = sphi %s2938_s12, %s184_s12   ;;  %s2936_s1 = sphi %s2934_s1, %s185_s1  }
  0x34   : > { %183 = vst [vmem:[%s2936_s1] sm:$0xff] %v182_v2  ;;  %s185_s1 = scalar_lea.vmem %s2936_s1, 8   ;;  %p179_p5 = scmp.gt.s32.totalorder %s184_s12, %s148_s28 }
  0x36   :  { %181 = sbr.rel (!%p179_p5) target bundleno = 51 (0x33), region = 471 }
  0x3d PF:  { %s210_s15 = scalar_lea.vmem %s3481_s3, 8 }
  0x3e   :  { %p1801_p6 = scmp.gt.s32.totalorder %s3481_s3, %s210_s15 }
  0x3f   :  { %s2942_s2 = smov (!%p1801_p6), [#allocation3]   ;;  %s2946_s20 = smov (!%p1801_p6), %s3481_s3  }
  0x40   :  { %1802 = sbr.rel (%p1801_p6) target bundleno = 81 (0x51), region = 487 }
  0x47 LB: > { %v244_v3 = vld [vmem:[%s2948_s20] sm:$0xff]  ;;  %s246_s20 = scalar_lea.vmem %s2948_s20, 8   ;;  %s2948_s20 = sphi %s2946_s20, %s246_s20   ;;  %s2944_s2 = sphi %s2942_s2, %s247_s2  }
  0x48   : > { %245 = vst [vmem:[%s2944_s2] sm:$0xff] %v244_v3  ;;  %s247_s2 = scalar_lea.vmem %s2944_s2, 8   ;;  %p241_p7 = scmp.gt.s32.totalorder %s246_s20, %s210_s15 }
  0x4a   :  { %243 = sbr.rel (!%p241_p7) target bundleno = 71 (0x47), region = 493 }
  0x51 PF:  { %s259_s21 = smov [#allocation12]  ;;  %v260_v4 = vld [vmem:[#allocation0] sm:$0xff]  ;;  %v264_v5 = vld [vmem:[#allocation0 + $0x8] sm:$0xff]  ;;  %s266_s22 = smov [#allocation13]  ;;  %v267_v6 = vld [vmem:[#allocation1] sm:$0xff]  ;;  %v300_v7 = vlaneseq  ;;  %v2990_v11 = vmov 0.0  }
  0x52   :  { %261 = vst [vmem:[%s259_s21] sm:$0xff] %v260_v4  ;;  %2066 = vst [vmem:[%s259_s21 + $0x8] sm:$0xff] %v264_v5  ;;  %v271_v8 = vld [vmem:[#allocation1 + $0x8] sm:$0xff]  ;;  %s273_s3 = smov [#allocation14]  ;;  %v274_v9 = vld [vmem:[#allocation2] sm:$0xff]  ;;  %s280_s0 = smov [#allocation15] }
  0x53   :  { %268 = vst [vmem:[%s266_s22] sm:$0xff] %v267_v6  ;;  %v278_v10 = vld [vmem:[#allocation2 + $0x8] sm:$0xff]  ;;  %287 = vst [vmem:[#allocation8] sm:$0xff] %v2990_v11  ;;  %v281_v12 = vld [vmem:[#allocation3] sm:$0xff]  ;;  %v3079_v14 = vand.u32 127, %v300_v7  ;;  %v3081_v15 = vshrl.u32 %v300_v7, 7  ;;  %s299_s23 = smov [#allocation8] }
  0x54   :  { %289 = vst [vmem:[#allocation8 + $0x8] sm:$0xff] %v2990_v11  ;;  %290 = vst [vmem:[#allocation9] sm:$0xff] %v2990_v11  ;;  %v285_v13 = vld [vmem:[#allocation3 + $0x8] sm:$0xff]  ;;  %s319_s24 = smov [#allocation11]  ;;  %s1819_s25 = smov [#allocation12] }
  0x55   :  { %292 = vst [vmem:[#allocation9 + $0x8] sm:$0xff] %v2990_v11  ;;  %293 = vst [vmem:[#allocation10] sm:$0xff] %v2990_v11  ;;  %v302_v14 = vmov %v3079_v14  ;;  %v305_v15 = vmov %v3081_v15  ;;  %vm1823_vm4 = vcmp.lt.s32.totalorder %v3079_v14, 16  ;;  %s1845_s26 = smov [#allocation13]  ;;  %s1868_s27 = smov [#allocation14] }
  0x56   :  { %295 = vst [vmem:[#allocation10 + $0x8] sm:$0xff] %v2990_v11  ;;  %296 = vst [vmem:[#allocation11] sm:$0xff] %v2990_v11  ;;  %v322_v14 = vmov %v3079_v14  ;;  %v325_v15 = vmov %v3081_v15  ;;  %v315_v16 = vadd.s32 8, %v305_v15  ;;  %vm309_vm0 = vcmp.eq.s32.totalorder %v305_v15, %v302_v14  ;;  %s1891_s28 = smov [#allocation15] }
  0x57   :  { %298 = vst [vmem:[#allocation11 + $0x8] sm:$0xff] %v2990_v11  ;;  %2067 = vst [vmem:[%s266_s22 + $0x8] sm:$0xff] %v271_v8  ;;  %v335_v17 = vadd.s32 8, %v325_v15  ;;  %vm329_vm1 = vcmp.eq.s32.totalorder %v325_v15, %v322_v14  ;;  %v1818_v15 = vmov %v3081_v15 }
  0x58   :  { %275 = vst [vmem:[%s273_s3] sm:$0xff] %v274_v9  ;;  %2068 = vst [vmem:[%s273_s3 + $0x8] sm:$0xff] %v278_v10  ;;  %vm316_vm2 = vcmp.eq.s32.totalorder %v315_v16, %v302_v14  ;;  %v1834_v34 = vadd.s32 8, %v1818_v15 }
  0x59   :  { %282 = vst [vmem:[%s280_s0] sm:$0xff] %v281_v12  ;;  %2069 = vst [vmem:[%s280_s0 + $0x8] sm:$0xff] %v285_v13  ;;  %vm336_vm3 = vcmp.eq.s32.totalorder %v335_v17, %v322_v14  ;;  %v1815_v14 = vmov %v3079_v14  ;;  %v1825_v26 = vld [vmem:[%s1819_s25] sm:$0xff]  ;;  %v2074_v27 = vld [vmem:[%s1819_s25 + $0x8] sm:$0xff] }
  0x5a   :  { %vm1828_vm5 = vcmp.eq.s32.totalorder %v1818_v15, %v1815_v14  ;;  %v1841_v14 = vmov %v3079_v14  ;;  %v1826_v29 = vsel %vm1823_vm4, %v1825_v26, 0.0  ;;  %v1832_v30 = vsel %vm1823_vm4, %v2074_v27, 0.0 }
  0x5b   :  { %v306_v18 = vld [vmem:[%s299_s23] sm:$0xff]  ;;  %v2070_v19 = vld [vmem:[%s299_s23 + $0x8] sm:$0xff]  ;;  %v1827_v35 = vmul.f32 %v1826_v29, %v1826_v29  ;;  %v1833_v36 = vmul.f32 %v1832_v30, %v1832_v30  ;;  %vm1835_vm6 = vcmp.eq.s32.totalorder %v1834_v34, %v1815_v14  ;;  %v1890_v15 = vmov %v3081_v15 }
  0x5c   :  { %v310_v21 = vsel %vm309_vm0, 1.0, %v306_v18  ;;  %v317_v22 = vsel %vm316_vm2, 1.0, %v2070_v19  ;;  %v1844_v15 = vmov %v3081_v15  ;;  %v1864_v14 = vmov %v3079_v14 }
  0x5d   :  { %311 = vst [vmem:[%s299_s23] sm:$0xff] %v310_v21  ;;  %2071 = vst [vmem:[%s299_s23 + $0x8] sm:$0xff] %v317_v22  ;;  %v1838_v41 = vadd.f32 %v1833_v36, %v1827_v35  ;;  %v1829_v45 = vsel %vm1828_vm5, 0.0, %v1827_v35  ;;  %v1836_v49 = vsel %vm1835_vm6, 0.0, %v1833_v36  ;;  %v1887_v14 = vmov %v3079_v14 }
  0x5e   :  { %v326_v20 = vld [vmem:[%s319_s24] sm:$0xff]  ;;  %v2072_v24 = vld [vmem:[%s319_s24 + $0x8] sm:$0xff]  ;;  %v1837_v51 = vadd.f32 %v1836_v49, %v1829_v45  ;;  %v1867_v15 = vmov %v3081_v15  ;;  %v1908_v56 = vadd.s32 8, %v1890_v15  ;;  %vm1900_vm7 = vcmp.eq.s32.totalorder %v1890_v15, %v1887_v14 }
  0x5f   :  { %v330_v23 = vsel %vm329_vm1, 1.0, %v326_v20  ;;  %v337_v25 = vsel %vm336_vm3, 1.0, %v2072_v24  ;;  %v1851_v28 = vld [vmem:[%s1845_s26] sm:$0xff]  ;;  %v2075_v32 = vld [vmem:[%s1845_s26 + $0x8] sm:$0xff] }
  0x60   :  { %331 = vst [vmem:[%s319_s24] sm:$0xff] %v330_v23  ;;  %2073 = vst [vmem:[%s319_s24 + $0x8] sm:$0xff] %v337_v25  ;;  %v1852_v31 = vsel %vm1823_vm4, %v1851_v28, 0.0  ;;  %v1874_v33 = vld [vmem:[%s1868_s27] sm:$0xff]  ;;  %v1858_v38 = vsel %vm1823_vm4, %v2075_v32, 0.0  ;;  %v2076_v39 = vld [vmem:[%s1868_s27 + $0x8] sm:$0xff]  ;;  %vm1909_vm8 = vcmp.eq.s32.totalorder %v1908_v56, %v1887_v14 }
  0x61   :  { %v1853_v37 = vmul.f32 %v1852_v31, %v1852_v31  ;;  %v1875_v40 = vsel %vm1823_vm4, %v1874_v33, 0.0  ;;  %v1859_v42 = vmul.f32 %v1858_v38, %v1858_v38  ;;  %v1897_v43 = vld [vmem:[%s1891_s28] sm:$0xff]  ;;  %v1881_v44 = vsel %vm1823_vm4, %v2076_v39, 0.0  ;;  %v2077_v48 = vld [vmem:[%s1891_s28 + $0x8] sm:$0xff] }
  0x62   :  { %v1876_v47 = vmul.f32 %v1875_v40, %v1875_v40  ;;  %v1898_v50 = vsel %vm1823_vm4, %v1897_v43, 0.0  ;;  %v1882_v53 = vmul.f32 %v1881_v44, %v1881_v44  ;;  %v1906_v54 = vsel %vm1823_vm4, %v2077_v48, 0.0 }
  0x63   :  { %v1855_v46 = vadd.f32 %v1853_v37, %v1838_v41  ;;  %v1854_v55 = vadd.f32 %v1853_v37, %v1837_v51  ;;  %v1899_v58 = vmul.f32 %v1898_v50, %v1898_v50  ;;  %v1907_v61 = vmul.f32 %v1906_v54, %v1906_v54 }
  0x65   :  { %v1861_v52 = vadd.f32 %v1859_v42, %v1855_v46  ;;  %v1860_v59 = vadd.f32 %v1859_v42, %v1854_v55  ;;  %v1901_v0 = vsel %vm1900_vm7, 0.0, %v1899_v58  ;;  %v1910_v3 = vsel %vm1909_vm8, 0.0, %v1907_v61 }
  0x67   :  { %v1878_v57 = vadd.f32 %v1876_v47, %v1861_v52  ;;  %v1877_v62 = vadd.f32 %v1876_v47, %v1860_v59 }
  0x69   :  { %v1884_v60 = vadd.f32 %v1882_v53, %v1878_v57  ;;  %v1883_v1 = vadd.f32 %v1882_v53, %v1877_v62 }
  0x6b   :  { %v1903_v63 = vadd.f32 %v1899_v58, %v1884_v60  ;;  %v1902_v4 = vadd.f32 %v1901_v0, %v1883_v1 }
  0x6d   :  { %v1912_v2 = vadd.f32 %v1907_v61, %v1903_v63  ;;  %v1911_v5 = vadd.f32 %v1910_v3, %v1902_v4 }
  0x6f   :  { %1913 = vadd.xlane.f32.xlu0 %v1912_v2 }
  0x73   :  { %1921 = vadd.xlane.f32.xlu0 %v1911_v5 }
  0xfc   :  { %v1914_v6 = vpop.xlane.xlu0 %1913 }
  0xfd   :  { %v1915_v7 = vrot.slane %v1914_v6, 4 }
  0xff   :  { %v1916_v8 = vadd.f32 %v1915_v7, %v1914_v6 }
 0x100   :  { %v1922_v9 = vpop.xlane.xlu0 %1921 }
 0x101   :  { %v1917_v10 = vrot.slane %v1916_v8, 2  ;;  %v1923_v11 = vrot.slane %v1922_v9, 4 }
 0x103   :  { %v1924_v12 = vadd.f32 %v1923_v11, %v1922_v9  ;;  %v1918_v13 = vadd.f32 %v1917_v10, %v1916_v8 }
 0x105   :  { %v1925_v16 = vrot.slane %v1924_v12, 2  ;;  %v1919_v18 = vrot.slane %v1918_v13, 1 }
 0x107   :  { %v1926_v17 = vadd.f32 %v1925_v16, %v1924_v12  ;;  %v1920_v21 = vadd.f32 %v1919_v18, %v1918_v13 }
 0x109   :  { %v1927_v19 = vrot.slane %v1926_v17, 1 }
 0x10b   :  { %v1928_v20 = vadd.f32 %v1927_v19, %v1926_v17 }
 0x10d   :  { %2199 = vpush %v1928_v20 }
 0x10e   :  { %2201 = vpush %v1920_v21 }
 0x13e   :  { %s2200_s29 = spop %2199 }
 0x13f   :  { %s2202_s30 = spop %2201 }
 0x140   :  { %s1931_s1 = smul.f32 1e-10, %s2202_s30 }
 0x142   :  { %p1932_p8 = scmp.le.f32.partialorder %s2200_s29, %s1931_s1 }
 0x143   :  { %s3113_s10 = smov (!%p1932_p8), 0  }
 0x144   :  { %1935 = sbr.rel (%p1932_p8) target bundleno = 1051 (0x41b), region = 509 }
 0x14b LB: > { %s3118_s11 = smov 0   ;;  %s2952_s10 = sphi %s3113_s10, %s3488_s10  }
 0x14c LB: >> { %s475_s12 = smov [#allocation12]  ;;  %v479_v14 = vmov %v3079_v14  ;;  %v482_v15 = vmov %v3081_v15  ;;  %s501_s13 = smov [#allocation13]  ;;  %vm1008_vm8 = vcmp.eq.s32.totalorder %v3081_v15, 0  ;;  %s2956_s11 = sphi %s3118_s11, %s474_s11  }
 0x14d   : >> { %v505_v14 = vmov %v3079_v14  ;;  %v508_v15 = vmov %v3081_v15  ;;  %v483_v22 = vld [vmem:[%s475_s12] sm:$0xff]  ;;  %vm486_vm9 = vcmp.eq.s32.totalorder %v482_v15, %v479_v14  ;;  %v2078_v23 = vld [vmem:[%s475_s12 + $0x8] sm:$0xff]  ;;  %v491_v24 = vadd.s32 8, %v482_v15  ;;  %s527_s14 = smov [#allocation15]  ;;  %s476_s15 = smov [#allocation16] }
 0x14e   : >> { %vm512_vm10 = vcmp.eq.s32.totalorder %v508_v15, %v505_v14  ;;  %v517_v25 = vadd.s32 8, %v508_v15  ;;  %v487_v26 = vsel %vm486_vm9, %v483_v22, 0.0  ;;  %v509_v27 = vld [vmem:[%s501_s13] sm:$0xff]  ;;  %v2079_v28 = vld [vmem:[%s501_s13 + $0x8] sm:$0xff]  ;;  %v531_v14 = vmov %v3079_v14  ;;  %s502_s16 = smov [#allocation17]  ;;  %s528_s17 = smov [#allocation18] }
 0x14f   : >> { %v534_v15 = vmov %v3081_v15  ;;  %vm492_vm11 = vcmp.eq.s32.totalorder %v491_v24, %v479_v14  ;;  %v513_v29 = vsel %vm512_vm10, %v509_v27, 0.0  ;;  %v535_v30 = vld [vmem:[%s527_s14] sm:$0xff]  ;;  %v2080_v34 = vld [vmem:[%s527_s14 + $0x8] sm:$0xff]  ;;  %s557_s2 = smov [#allocation17]  ;;  %s555_s18 = smov [#allocation16]  ;;  %vm1032_vm9 = vcmp.eq.s32.totalorder %v3081_v15, 7 }
 0x150   : >> { %vm518_vm12 = vcmp.eq.s32.totalorder %v517_v25, %v505_v14  ;;  %vm538_vm13 = vcmp.eq.s32.totalorder %v534_v15, %v531_v14  ;;  %v493_v31 = vsel %vm492_vm11, %v2078_v23, %v487_v26  ;;  %v543_v35 = vadd.s32 8, %v534_v15  ;;  %s559_s19 = smov [#allocation18]  ;;  %s594_s20 = smov [#allocation19] }
 0x151   : >> { %v519_v32 = vsel %vm518_vm12, %v2079_v28, %v513_v29  ;;  %v539_v33 = vsel %vm538_vm13, %v535_v30, 0.0  ;;  %v494_v36 = vrot.slane %v493_v31, 4  ;;  %s596_s21 = smov [#allocation20]  ;;  %s553_s22 = smov [#allocation21]  ;;  %v624_v15 = vmov %v3081_v15 }
 0x152   : >> { %v520_v37 = vrot.slane %v519_v32, 4  ;;  %vm544_vm14 = vcmp.eq.s32.totalorder %v543_v35, %v531_v14  ;;  %s554_s3 = smov [#allocation22]  ;;  %s598_s22 = smov %s553_s22  ;;  %v655_v15 = vmov %v3081_v15  ;;  %v625_v24 = vadd.s32 8, %v624_v15 }
 0x153   : >> { %v495_v38 = vadd.f32 %v494_v36, %v493_v31  ;;  %v545_v40 = vsel %vm544_vm14, %v2080_v34, %v539_v33  ;;  %s600_s3 = smov %s554_s3  ;;  %v606_v14 = vmov %v3079_v14  ;;  %v609_v15 = vmov %v3081_v15  ;;  %s602_s0 = smov [#allocation21] }
 0x154   : >> { %v521_v39 = vadd.f32 %v520_v37, %v519_v32  ;;  %v546_v41 = vrot.slane %v545_v40, 4  ;;  %v621_v14 = vmov %v3079_v14  ;;  %v656_v25 = vadd.s32 8, %v655_v15  ;;  %s617_s23 = smov [#allocation21]  ;;  %s633_s24 = smov [#allocation22] }
 0x155   : >> { %v496_v42 = vrot.slane %v495_v38, 2  ;;  %v637_v14 = vmov %v3079_v14  ;;  %v640_v15 = vmov %v3081_v15  ;;  %vm611_vm3 = vcmp.eq.s32.totalorder %v609_v15, %v606_v14  ;;  %s648_s25 = smov [#allocation22]  ;;  %s615_s26 = smov [#allocation23] }
 0x156   : >> { %v522_v43 = vrot.slane %v521_v39, 2  ;;  %v547_v44 = vadd.f32 %v546_v41, %v545_v40  ;;  %v652_v14 = vmov %v3079_v14  ;;  %vm626_vm5 = vcmp.eq.s32.totalorder %v625_v24, %v621_v14  ;;  %s630_s27 = smov [#allocation23]  ;;  %s664_s28 = smov [#allocation23] }
 0x157   : >> { %v497_v45 = vadd.f32 %v496_v42, %v495_v38  ;;  %vm642_vm6 = vcmp.eq.s32.totalorder %v640_v15, %v637_v14  ;;  %vm657_vm7 = vcmp.eq.s32.totalorder %v656_v25, %v652_v14  ;;  %s646_s29 = smov [#allocation24]  ;;  %s3137_s30 = smov [#allocation12]  ;;  %v811_v15 = vmov %v3081_v15 }
 0x158   : >> { %v523_v46 = vadd.f32 %v522_v43, %v521_v39  ;;  %v548_v47 = vrot.slane %v547_v44, 2  ;;  %s661_s1 = smov [#allocation24]  ;;  %s3139_s12 = smov [#allocation13]  ;;  %v672_v38 = vld [vmem:[%s3137_s30] sm:$0xff]  ;;  %v789_v15 = vmov %v3081_v15  ;;  %v808_v14 = vmov %v3079_v14 }
 0x159   : >> { %v498_v48 = vrot.slane %v497_v45, 1  ;;  %s3141_s13 = smov [#allocation14]  ;;  %s3143_s14 = smov [#allocation15]  ;;  %v673_v39 = vld [vmem:[%s3139_s12] sm:$0xff]  ;;  %v831_v15 = vmov %v3081_v15  ;;  %v786_v14 = vmov %v3079_v14  ;;  %vm815_vm10 = vcmp.eq.s32.totalorder %v811_v15, %v808_v14 }
 0x15a   : >> { %v524_v49 = vrot.slane %v523_v46, 1  ;;  %v549_v50 = vadd.f32 %v548_v47, %v547_v44  ;;  %v674_v40 = vld [vmem:[%s3141_s13] sm:$0xff]  ;;  %v852_v15 = vmov %v3081_v15  ;;  %v828_v14 = vmov %v3079_v14  ;;  %s474_s11 = sadd.s32 1, %s2956_s11  }
 0x15b   : >> { %v499_v51 = vadd.f32 %v498_v48, %v497_v45  ;;  %v675_v41 = vld [vmem:[%s3143_s14] sm:$0xff]  ;;  %v849_v14 = vmov %v3079_v14  ;;  %vm794_vm12 = vcmp.eq.s32.totalorder %v789_v15, %v786_v14  ;;  %vm835_vm14 = vcmp.eq.s32.totalorder %v831_v15, %v828_v14  ;;  %p471_p9 = scmp.ge.s32.totalorder %s474_s11, 31  }
 0x15c   : >> { %v525_v52 = vadd.f32 %v524_v49, %v523_v46  ;;  %v550_v53 = vrot.slane %v549_v50, 1  ;;  %s422_s11 = smov (%p471_p9), [#allocation15] }
 0x15d   : >> { %500 = vst [vmem:[%s476_s15] sm:$0x1] %v499_v51  ;;  %s1088_s15 = smov [#allocation23] }
 0x15e   : >> { %526 = vst [vmem:[%s502_s16] sm:$0x1] %v525_v52  ;;  %v551_v54 = vadd.f32 %v550_v53, %v549_v50  ;;  %s3145_s16 = smov [#allocation8] }
 0x15f   : >> { %v1096_v42 = vld [vmem:[%s3145_s16] sm:$0xff] }
 0x160   : >> { %552 = vst [vmem:[%s528_s17] sm:$0x1] %v551_v54  ;;  %s3147_s17 = smov [#allocation9] }
 0x161   : >> { %v1097_v43 = vld [vmem:[%s3147_s17] sm:$0xff] }
 0x164   : >> { %v556_v57 = vld [vmem:[%s555_s18] sm:$0xff]  ;;  %s3152_s18 = smov [#allocation11] }
 0x165   : >> { %v558_v55 = vld [vmem:[%s557_s2] sm:$0xff]  ;;  %v579_v6 = vand.u32 2147483647, %v556_v57  ;;  %s3150_s2 = smov [#allocation10] }
 0x166   : >> { %v562_v56 = vmul.f32 2.0, %v558_v55  ;;  %v580_v11 = vand.u32 2147483647, %v558_v55  ;;  %v1098_v45 = vld [vmem:[%s3150_s2] sm:$0xff] }
 0x167   : >> { %v560_v58 = vld [vmem:[%s559_s19] sm:$0xff]  ;;  %s666_s19 = smov [#allocation24] }
 0x168   : >> { %2678 = vrcp.f32 %v562_v56  ;;  %v561_v59 = vsub.f32 %v560_v58, %v556_v57  ;;  %v581_v7 = vand.u32 2147483647, %v560_v58  ;;  %v1099_v46 = vld [vmem:[%s3152_s18] sm:$0xff] }
 0x16a   : >> { %v582_v10 = vmin.f32 %v579_v6, %v581_v7 }
 0x16c   : >> { %v583_v12 = vmul.f32 1.1920929e-08, %v582_v10 }
 0x16e   : >> { %vm584_vm2 = vcmp.le.f32.partialorder %v580_v11, %v583_v12 }
 0x172   : >> { %v2679_v60 = vpop.eup %2678 }
 0x173   : >> { %v564_v61 = vmul.f32 %v2679_v60, %v561_v59 }
 0x175   : >> { %v566_v62 = vmul.f32 %v564_v61, %v564_v61  ;;  %vm565_vm1 = vcmp.ge.f32.partialorder %v564_v61, 0.0 }
 0x177   : >> { %v567_v63 = vadd.f32 1.0, %v566_v62 }
 0x179   : >> { %2680 = vrsqrt.f32 %v567_v63  ;;  %vm570_vm15 = vcmp.eq.f32.partialorder %v567_v63, inf  ;;  %v573_v1 = vand.u32 2147483648, %v567_v63  ;;  %vm572_vm0 = vcmp.eq.f32.partialorder %v567_v63, 0.0 }
 0x183   : >> { %v2681_v0 = vpop.eup %2680 }
 0x184   : >> { %v569_v2 = vmul.f32 %v2681_v0, %v567_v63 }
 0x186   : >> { %v571_v3 = vsel %vm570_vm15, %v567_v63, %v569_v2 }
 0x187   : >> { %v574_v4 = vsel %vm572_vm0, %v573_v1, %v571_v3  ;;  %vm857_vm0 = vcmp.eq.s32.totalorder %v852_v15, %v849_v14 }
 0x188   : >> { %v575_v5 = vxor.u32 2147483648, %v574_v4 }
 0x18a   : >> { %v576_v8 = vsel %vm565_vm1, %v574_v4, %v575_v5 }
 0x18b   : >> { %v577_v9 = vadd.f32 %v576_v8, %v564_v61 }
 0x18d   : >> { %2682 = vrcp.f32 %v577_v9 }
 0x197   : >> { %v2683_v13 = vpop.eup %2682 }
 0x198   : >> { %v585_v16 = vsel %vm584_vm2, 0.0, %v2683_v13  ;;  %vm879_vm2 = vcmp.eq.s32.totalorder %v3079_v14, 0 }
 0x199   : >> { %v586_v17 = vmul.f32 %v585_v16, %v585_v16  ;;  %v590_v18 = vmul.f32 %v585_v16, %v558_v55 }
 0x19b   : >> { %v587_v19 = vadd.f32 1.0, %v586_v17  ;;  %v591_v20 = vsub.f32 %v556_v57, %v590_v18  ;;  %v593_v21 = vadd.f32 %v590_v18, %v560_v58 }
 0x19d   : >> { %2684 = vrsqrt.f32 %v587_v19  ;;  %595 = vst [vmem:[%s594_s20] sm:$0xff] %v591_v20  ;;  %597 = vst [vmem:[%s596_s21] sm:$0xff] %v593_v21  ;;  %s1090_s20 = smov [#allocation24]  ;;  %s692_s21 = smov [#allocation23] }
 0x1a7   : >> { %v2685_v22 = vpop.eup %2684 }
 0x1a8   : >> { %599 = vst [vmem:[%s598_s22] sm:$0xff] %v2685_v22  ;;  %v589_v23 = vmul.f32 %v2685_v22, %v585_v16  ;;  %s1116_s22 = smov [#allocation23] }
 0x1aa   : >> { %601 = vst [vmem:[%s600_s3] sm:$0xff] %v589_v23  ;;  %s695_s3 = smov [#allocation24] }
 0x1af   : >> { %v603_v26 = vld [vmem:[%s602_s0] ss:$0 sm:$0xff]  ;;  %s3169_s0 = smov [#allocation12] }
 0x1b0   : >> { %v618_v27 = vld [vmem:[%s617_s23] ss:$0 sm:$0xff]  ;;  %v612_v28 = vsel %vm611_vm3, %v603_v26, 0.0  ;;  %s3171_s23 = smov [#allocation14]  ;;  %vm883_vm3 = vcmp.eq.s32.totalorder %v3079_v14, 1 }
 0x1b1   : >> { %v627_v29 = vsel %vm626_vm5, %v618_v27, 0.0  ;;  %613 = vadd.xlane.f32.xlu0 %v612_v28  ;;  %v634_v30 = vld [vmem:[%s633_s24] ss:$0 sm:$0xff]  ;;  %s1119_s24 = smov [#allocation24]  ;;  %vm896_vm5 = vcmp.eq.s32.totalorder %v3079_v14, 15 }
 0x1b2   : >> { %628 = vadd.xlane.f32.xlu1 %v627_v29  ;;  %v649_v31 = vld [vmem:[%s648_s25] ss:$0 sm:$0xff]  ;;  %v643_v32 = vsel %vm642_vm6, %v634_v30, 0.0  ;;  %s3173_s25 = smov [#allocation15] }
 0x1b3   : >> { %v658_v33 = vsel %vm657_vm7, %v649_v31, 0.0 }
 0x1b5   : >> { %644 = vadd.xlane.f32.xlu0 %v643_v32 }
 0x1b6   : >> { %659 = vadd.xlane.f32.xlu1 %v658_v33 }
 0x23e   : >> { %v614_v34 = vpop.xlane.xlu0 %613 }
 0x23f   : >> { %v629_v35 = vpop.xlane.xlu1 %628  ;;  %616 = vst [vmem:[%s615_s26] sm:$0xff] %v614_v34  ;;  %s3175_s26 = smov [#allocation8] }
 0x240   : >> { %2081 = vst [vmem:[%s630_s27 + $0x8] sm:$0xff] %v629_v35  ;;  %s3177_s27 = smov [#allocation9] }
 0x242   : >> { %v645_v36 = vpop.xlane.xlu0 %644 }
 0x243   : >> { %v660_v37 = vpop.xlane.xlu1 %659  ;;  %647 = vst [vmem:[%s646_s29] sm:$0xff] %v645_v36  ;;  %s3181_s29 = smov [#allocation11] }
 0x244   : >> { %2082 = vst [vmem:[%s661_s1 + $0x8] sm:$0xff] %v660_v37  ;;  %s3197_s1 = smov [#allocation8] }
 0x247   : >> { %v665_v44 = vld [vmem:[%s664_s28] sm:$0xff]  ;;  %v2083_v10 = vld [vmem:[%s692_s21 + $0x8] sm:$0xff]  ;;  %s3179_s28 = smov [#allocation10]  ;;  %s756_s21 = smov [#allocation13] }
 0x248   : >> { %v1089_v47 = vld [vmem:[%s1088_s15] sm:$0xff]  ;;  %v676_v48 = vmul.f32 %v672_v38, %v665_v44  ;;  %v679_v49 = vmul.f32 %v673_v39, %v665_v44  ;;  %v683_v50 = vmul.f32 %v674_v40, %v665_v44  ;;  %v686_v51 = vmul.f32 %v675_v41, %v665_v44  ;;  %v2141_v11 = vld [vmem:[%s1116_s22 + $0x8] sm:$0xff]  ;;  %s728_s15 = smov [#allocation22]  ;;  %s758_s22 = smov [#allocation14] }
 0x249   : >> { %v1100_v52 = vmul.f32 %v1096_v42, %v1089_v47  ;;  %v1103_v53 = vmul.f32 %v1097_v43, %v1089_v47  ;;  %v1107_v54 = vmul.f32 %v1098_v45, %v1089_v47  ;;  %v1110_v55 = vmul.f32 %v1099_v46, %v1089_v47 }
 0x24b   : >> { %v667_v56 = vld [vmem:[%s666_s19] sm:$0xff]  ;;  %v2084_v12 = vld [vmem:[%s695_s3 + $0x8] sm:$0xff]  ;;  %s3217_s19 = smov [#allocation15]  ;;  %s760_s3 = smov [#allocation15] }
 0x24c   : >> { %v1091_v57 = vld [vmem:[%s1090_s20] sm:$0xff]  ;;  %v677_v58 = vmul.f32 %v674_v40, %v667_v56  ;;  %v680_v59 = vmul.f32 %v675_v41, %v667_v56  ;;  %v682_v60 = vmul.f32 %v672_v38, %v667_v56  ;;  %v685_v61 = vmul.f32 %v673_v39, %v667_v56  ;;  %v2142_v13 = vld [vmem:[%s1119_s24 + $0x8] sm:$0xff]  ;;  %s754_s20 = smov [#allocation12]  ;;  %s805_s24 = smov [#allocation13] }
 0x24d   : >> { %v1101_v62 = vmul.f32 %v1098_v45, %v1091_v57  ;;  %v1104_v63 = vmul.f32 %v1099_v46, %v1091_v57  ;;  %v1106_v0 = vmul.f32 %v1096_v42, %v1091_v57  ;;  %v1109_v1 = vmul.f32 %v1097_v43, %v1091_v57 }
 0x24e   : >> { %v678_v2 = vsub.f32 %v676_v48, %v677_v58  ;;  %v681_v3 = vsub.f32 %v679_v49, %v680_v59  ;;  %v684_v4 = vadd.f32 %v683_v50, %v682_v60  ;;  %v687_v5 = vadd.f32 %v686_v51, %v685_v61 }
 0x24f   : >> { %v1102_v6 = vsub.f32 %v1100_v52, %v1101_v62  ;;  %v1105_v7 = vsub.f32 %v1103_v53, %v1104_v63  ;;  %v1108_v8 = vadd.f32 %v1107_v54, %v1106_v0  ;;  %v1111_v9 = vadd.f32 %v1110_v55, %v1109_v1  ;;  %v3224_v52 = vld [vmem:[%s728_s15] ss:$0 sm:$0xff]  ;;  %s3325_s15 = smov [#allocation13] }
 0x250   : >> { %688 = vst [vmem:[%s3137_s30] sm:$0xff] %v678_v2  ;;  %690 = vst [vmem:[%s3141_s13] sm:$0xff] %v684_v4  ;;  %s3183_s30 = smov [#allocation13]  ;;  %s3202_s13 = smov [#allocation9] }
 0x251   : >> { %691 = vst [vmem:[%s3143_s14] sm:$0xff] %v687_v5  ;;  %689 = vst [vmem:[%s3139_s12] sm:$0xff] %v681_v3  ;;  %s3199_s12 = smov [#allocation10]  ;;  %s726_s14 = smov [#allocation21] }
 0x252   : >> { %1112 = vst [vmem:[%s3145_s16] sm:$0xff] %v1102_v6  ;;  %1113 = vst [vmem:[%s3147_s17] sm:$0xff] %v1105_v7  ;;  %s3207_s16 = smov [#allocation12]  ;;  %s3210_s17 = smov [#allocation11]  ;;  %v3222_v51 = vld [vmem:[%s726_s14] ss:$0 sm:$0xff] }
 0x253   : >> { %1114 = vst [vmem:[%s3150_s2] sm:$0xff] %v1108_v8  ;;  %1115 = vst [vmem:[%s3152_s18] sm:$0xff] %v1111_v9  ;;  %s3212_s2 = smov [#allocation13]  ;;  %s3215_s18 = smov [#allocation14] }
 0x254   : >> { %s3321_s14 = smov [#allocation15] }
 0x257   : >> { %v2085_v16 = vld [vmem:[%s3169_s0 + $0x8] sm:$0xff] }
 0x258   : >> { %v2087_v17 = vld [vmem:[%s3171_s23 + $0x8] sm:$0xff]  ;;  %v710_v19 = vmul.f32 %v2085_v16, %v2083_v10  ;;  %v716_v22 = vmul.f32 %v2085_v16, %v2084_v12 }
 0x259   : >> { %v2088_v18 = vld [vmem:[%s3173_s25 + $0x8] sm:$0xff]  ;;  %v711_v20 = vmul.f32 %v2087_v17, %v2084_v12  ;;  %v717_v26 = vmul.f32 %v2087_v17, %v2083_v10 }
 0x25a   : >> { %v714_v21 = vmul.f32 %v2088_v18, %v2084_v12  ;;  %v2143_v23 = vld [vmem:[%s3175_s26 + $0x8] sm:$0xff]  ;;  %v720_v27 = vmul.f32 %v2088_v18, %v2083_v10 }
 0x25b   : >> { %v2144_v24 = vld [vmem:[%s3177_s27 + $0x8] sm:$0xff]  ;;  %v1134_v29 = vmul.f32 %v2143_v23, %v2141_v11  ;;  %v712_v32 = vsub.f32 %v710_v19, %v711_v20  ;;  %v1140_v35 = vmul.f32 %v2143_v23, %v2142_v13  ;;  %v718_v36 = vadd.f32 %v717_v26, %v716_v22 }
 0x25c   : >> { %v2145_v25 = vld [vmem:[%s3179_s28 + $0x8] sm:$0xff]  ;;  %v1137_v33 = vmul.f32 %v2144_v24, %v2141_v11  ;;  %v1143_v39 = vmul.f32 %v2144_v24, %v2142_v13 }
 0x25d   : >> { %v2146_v28 = vld [vmem:[%s3181_s29 + $0x8] sm:$0xff]  ;;  %v1135_v30 = vmul.f32 %v2145_v25, %v2142_v13  ;;  %v1141_v38 = vmul.f32 %v2145_v25, %v2141_v11  ;;  %2089 = vst [vmem:[%s3169_s0 + $0x8] sm:$0xff] %v712_v32  ;;  %2091 = vst [vmem:[%s3171_s23 + $0x8] sm:$0xff] %v718_v36  ;;  %s783_s0 = smov [#allocation19]  ;;  %s846_s23 = smov [#allocation20] }
 0x25e   : >> { %v2086_v31 = vld [vmem:[%s3183_s30 + $0x8] sm:$0xff]  ;;  %v1138_v34 = vmul.f32 %v2146_v28, %v2142_v13  ;;  %v1144_v41 = vmul.f32 %v2146_v28, %v2141_v11 }
 0x25f   : >> { %v1136_v37 = vsub.f32 %v1134_v29, %v1135_v30  ;;  %v713_v42 = vmul.f32 %v2086_v31, %v2083_v10  ;;  %v719_v43 = vmul.f32 %v2086_v31, %v2084_v12  ;;  %v1142_v44 = vadd.f32 %v1141_v38, %v1140_v35 }
 0x260   : >> { %v1139_v40 = vsub.f32 %v1137_v33, %v1138_v34  ;;  %v1145_v45 = vadd.f32 %v1144_v41, %v1143_v39 }
 0x261   : >> { %2147 = vst [vmem:[%s3175_s26 + $0x8] sm:$0xff] %v1136_v37  ;;  %v715_v46 = vsub.f32 %v713_v42, %v714_v21  ;;  %v721_v47 = vadd.f32 %v720_v27, %v719_v43  ;;  %2149 = vst [vmem:[%s3179_s28 + $0x8] sm:$0xff] %v1142_v44  ;;  %s825_s26 = smov [#allocation14]  ;;  %s3310_s28 = smov [#allocation13] }
 0x262   : >> { %2148 = vst [vmem:[%s3177_s27 + $0x8] sm:$0xff] %v1139_v40  ;;  %2150 = vst [vmem:[%s3181_s29 + $0x8] sm:$0xff] %v1145_v45  ;;  %s845_s27 = smov [#allocation15]  ;;  %s3312_s29 = smov [#allocation12] }
 0x263   : >> { %2090 = vst [vmem:[%s3183_s30 + $0x8] sm:$0xff] %v715_v46  ;;  %2092 = vst [vmem:[%s3173_s25 + $0x8] sm:$0xff] %v721_v47  ;;  %v821_v46 = vadd.s32 8, %v811_v15  ;;  %v801_v47 = vadd.s32 8, %v789_v15  ;;  %s3298_s25 = smov [#allocation12]  ;;  %s2991_s30 = smov 1  }
 0x264   : >> { %v734_v53 = vld [vmem:[%s3207_s16] sm:$0xff] }
 0x265   : >> { %v738_v11 = vmul.f32 %v734_v53, %v3222_v51  ;;  %v741_v12 = vmul.f32 %v734_v53, %v3224_v52  ;;  %v736_v18 = vld [vmem:[%s3215_s18] sm:$0xff]  ;;  %vm822_vm11 = vcmp.eq.s32.totalorder %v821_v46, %v808_v14  ;;  %vm802_vm13 = vcmp.eq.s32.totalorder %v801_v47, %v786_v14 }
 0x266   : >> { %v744_v22 = vmul.f32 %v736_v18, %v3222_v51  ;;  %v747_v24 = vmul.f32 %v736_v18, %v3224_v52 }
 0x268   : >> { %v1152_v48 = vld [vmem:[%s3197_s1] ss:$0 sm:$0xff]  ;;  %v2152_v50 = vld [vmem:[%s3197_s1 + $0x7] ss:$0 sm:$0xff]  ;;  %v2153_v55 = vld [vmem:[%s3197_s1 + $0x7] sm:$0xfe] }
 0x269   : >> { %v2151_v49 = vld [vmem:[%s3197_s1 - $0x1] sm:$0xfe]  ;;  %v2154_v56 = vld [vmem:[%s3197_s1 + $0xf] ss:$0 sm:$0xff]  ;;  %v1170_v58 = vsel %vm1008_vm8, %v2152_v50, %v2153_v55  ;;  %v2158_v61 = vld [vmem:[%s3199_s12 + $0x8] ss:$0 sm:$0xff] }
 0x26a   : >> { %v1159_v54 = vsel %vm1008_vm8, %v1152_v48, %v2151_v49  ;;  %v1196_v57 = vld [vmem:[%s3202_s13] ss:$0 sm:$0xff]  ;;  %v2157_v60 = vld [vmem:[%s3199_s12 + $0x9] sm:$0x7f]  ;;  %2155 = vst [vmem:[%s3197_s1 + $0x8] sm:$0xff] %v1170_v58  ;;  %v841_v48 = vadd.s32 8, %v831_v15 }
 0x26b   : >> { %1162 = vst [vmem:[%s3197_s1] sm:$0xff] %v1159_v54  ;;  %v1174_v59 = vld [vmem:[%s3199_s12] ss:$0 sm:$0xff]  ;;  %v1183_v62 = vsel %vm1032_vm9, %v2154_v56, %v2157_v60  ;;  %v2160_v63 = vld [vmem:[%s3199_s12 + $0x1] sm:$0x7f]  ;;  %v2163_v4 = vld [vmem:[%s3202_s13 + $0x7] sm:$0xfe] }
 0x26c   : >> { %2156 = vst [vmem:[%s3197_s1 + $0x1] sm:$0x1] %v1174_v59  ;;  %v2161_v0 = vld [vmem:[%s3202_s13 - $0x1] sm:$0xfe]  ;;  %v2162_v1 = vld [vmem:[%s3202_s13 + $0x7] ss:$0 sm:$0xff]  ;;  %v1191_v2 = vsel %vm1032_vm9, %v2158_v61, %v2160_v63  ;;  %vm842_vm15 = vcmp.eq.s32.totalorder %v841_v48, %v828_v14 }
 0x26d   : >> { %2159 = vst [vmem:[%s3199_s12 + $0x8] sm:$0xff] %v1183_v62  ;;  %v1203_v3 = vsel %vm1008_vm8, %v1196_v57, %v2161_v0  ;;  %v2164_v5 = vld [vmem:[%s3202_s13 + $0xf] ss:$0 sm:$0xff]  ;;  %v1218_v6 = vld [vmem:[%s3210_s17] ss:$0 sm:$0xff]  ;;  %1193 = vst [vmem:[%s3199_s12] sm:$0xff] %v1191_v2  ;;  %v1214_v7 = vsel %vm1008_vm8, %v2162_v1, %v2163_v4  ;;  %v864_v49 = vadd.s32 8, %v852_v15  ;;  %v346_v15 = vmov (%p471_p9), %v3081_v15 }
 0x26e   : >> { %1206 = vst [vmem:[%s3202_s13] sm:$0xff] %v1203_v3  ;;  %v2167_v8 = vld [vmem:[%s3210_s17 + $0x9] sm:$0x7f]  ;;  %v2168_v9 = vld [vmem:[%s3210_s17 + $0x8] ss:$0 sm:$0xff]  ;;  %v2170_v10 = vld [vmem:[%s3210_s17 + $0x1] sm:$0x7f] }
 0x26f   : >> { %2165 = vst [vmem:[%s3202_s13 + $0x8] sm:$0xff] %v1214_v7  ;;  %2166 = vst [vmem:[%s3202_s13 + $0x1] sm:$0x1] %v1218_v6  ;;  %v1227_v13 = vsel %vm1032_vm9, %v2164_v5, %v2167_v8  ;;  %v1235_v16 = vsel %vm1032_vm9, %v2168_v9, %v2170_v10  ;;  %v735_v17 = vld [vmem:[%s3212_s2] sm:$0xff]  ;;  %vm865_vm1 = vcmp.eq.s32.totalorder %v864_v49, %v849_v14  ;;  %s3316_s1 = smov [#allocation12]  ;;  %s3319_s12 = smov [#allocation14]  ;;  %v343_v14 = vmov (%p471_p9), %v3079_v14 }
 0x270   : >> { %v737_v19 = vld [vmem:[%s3217_s19] sm:$0xff]  ;;  %2169 = vst [vmem:[%s3210_s17 + $0x8] sm:$0xff] %v1227_v13  ;;  %1237 = vst [vmem:[%s3210_s17] sm:$0xff] %v1235_v16  ;;  %v739_v20 = vmul.f32 %v735_v17, %v3224_v52  ;;  %v742_v21 = vmul.f32 %v735_v17, %v3222_v51  ;;  %s2992_s13 = smov 127   ;;  %s3330_s17 = smov [#allocation15]  ;;  %vm358_vm6 = vcmp.eq.s32.totalorder (%p471_p9), %v346_v15, %v343_v14  ;;  %v372_v14 = vmov (%p471_p9), %v3079_v14 }
 0x271   : >> { %v745_v23 = vmul.f32 %v737_v19, %v3224_v52  ;;  %v748_v25 = vmul.f32 %v737_v19, %v3222_v51  ;;  %v790_v50 = vld [vmem:[%s783_s0] ss:$0 sm:$0xff]  ;;  %s399_s0 = smov (%p471_p9), [#allocation14] }
 0x272   : >> { %v740_v26 = vsub.f32 %v738_v11, %v739_v20  ;;  %v743_v27 = vadd.f32 %v742_v21, %v741_v12 }
 0x273   : >> { %v746_v28 = vsub.f32 %v744_v22, %v745_v23  ;;  %v749_v29 = vadd.f32 %v748_v25, %v747_v24 }
 0x274   : >> { %750 = vst [vmem:[%s3207_s16] sm:$0xff] %v740_v26  ;;  %751 = vst [vmem:[%s3212_s2] sm:$0xff] %v743_v27  ;;  %s3328_s16 = smov [#allocation14]  ;;  %s3368_s2 = smov [#allocation12] }
 0x275   : >> { %752 = vst [vmem:[%s3215_s18] sm:$0xff] %v746_v28  ;;  %753 = vst [vmem:[%s3217_s19] sm:$0xff] %v749_v29  ;;  %s3372_s18 = smov [#allocation13]  ;;  %s3377_s19 = smov [#allocation14] }
 0x27b   : >> { %v2093_v30 = vld [vmem:[%s754_s20 + $0x8] sm:$0xff] }
 0x27c   : >> { %v2094_v31 = vld [vmem:[%s756_s21 + $0x8] sm:$0xff]  ;;  %v769_v34 = vmul.f32 %v2093_v30, %v3224_v52  ;;  %v766_v36 = vmul.f32 %v2093_v30, %v3222_v51 }
 0x27d   : >> { %v2095_v32 = vld [vmem:[%s758_s22 + $0x8] sm:$0xff]  ;;  %v767_v33 = vmul.f32 %v2094_v31, %v3224_v52  ;;  %v770_v35 = vmul.f32 %v2094_v31, %v3222_v51 }
 0x27e   : >> { %v2096_v37 = vld [vmem:[%s760_s3 + $0x8] sm:$0xff]  ;;  %v772_v38 = vmul.f32 %v2095_v32, %v3222_v51  ;;  %v775_v40 = vmul.f32 %v2095_v32, %v3224_v52 }
 0x27f   : >> { %v773_v39 = vmul.f32 %v2096_v37, %v3224_v52  ;;  %v776_v41 = vmul.f32 %v2096_v37, %v3222_v51  ;;  %v771_v42 = vadd.f32 %v770_v35, %v769_v34  ;;  %v768_v43 = vsub.f32 %v766_v36, %v767_v33  ;;  %v853_v51 = vld [vmem:[%s846_s23] ss:$0 sm:$0xff] }
 0x281   : >> { %v774_v44 = vsub.f32 %v772_v38, %v773_v39  ;;  %v777_v45 = vadd.f32 %v776_v41, %v775_v40  ;;  %2098 = vst [vmem:[%s756_s21 + $0x8] sm:$0xff] %v771_v42  ;;  %2097 = vst [vmem:[%s754_s20 + $0x8] sm:$0xff] %v768_v43  ;;  %s1045_s20 = smov [#allocation15]  ;;  %s1238_s21 = sadd.s32 (%p471_p9), 1, %s2952_s10  }
 0x282   : > { %p467_p10 = scmp.ge.s32.totalorder (%p471_p9), %s1238_s21, 15  ;;  %s3488_s10 = smov (%p471_p9), %s1238_s21 }
 0x283   : >> { %2099 = vst [vmem:[%s758_s22 + $0x8] sm:$0xff] %v774_v44  ;;  %2100 = vst [vmem:[%s760_s3 + $0x8] sm:$0xff] %v777_v45  ;;  %s347_s22 = smov (%p471_p9), [#allocation12]  ;;  %s376_s3 = smov (%p471_p9), [#allocation13] }
 0x288   : >> { %v812_v52 = vld [vmem:[%s805_s24] sm:$0xff]  ;;  %v2103_v53 = vld [vmem:[%s805_s24 + $0x8] sm:$0xff] }
 0x289   : >> { %v791_v54 = vld [vmem:[%s3298_s25] sm:$0xff]  ;;  %v816_v55 = vsel %vm815_vm10, 0.0, %v812_v52  ;;  %v823_v56 = vsel %vm822_vm11, 0.0, %v2103_v53  ;;  %v2101_v58 = vld [vmem:[%s3298_s25 + $0x8] sm:$0xff] }
 0x28a   : >> { %v795_v57 = vsel %vm794_vm12, %v790_v50, %v791_v54  ;;  %v832_v59 = vld [vmem:[%s825_s26] sm:$0xff]  ;;  %v2105_v60 = vld [vmem:[%s825_s26 + $0x8] sm:$0xff]  ;;  %817 = vst [vmem:[%s805_s24] sm:$0xff] %v816_v55  ;;  %2104 = vst [vmem:[%s805_s24 + $0x8] sm:$0xff] %v823_v56  ;;  %v803_v61 = vsel %vm802_vm13, %v790_v50, %v2101_v58 }
 0x28b   : >> { %796 = vst [vmem:[%s3298_s25] sm:$0xff] %v795_v57  ;;  %v836_v62 = vsel %vm835_vm14, 0.0, %v832_v59  ;;  %v843_v63 = vsel %vm842_vm15, 0.0, %v2105_v60  ;;  %v854_v0 = vld [vmem:[%s845_s27] sm:$0xff]  ;;  %v2107_v1 = vld [vmem:[%s845_s27 + $0x8] sm:$0xff]  ;;  %2102 = vst [vmem:[%s3298_s25 + $0x8] sm:$0xff] %v803_v61 }
 0x28c   : >> { %837 = vst [vmem:[%s825_s26] sm:$0xff] %v836_v62  ;;  %2106 = vst [vmem:[%s825_s26 + $0x8] sm:$0xff] %v843_v63  ;;  %v858_v2 = vsel %vm857_vm0, %v853_v51, %v854_v0  ;;  %v866_v3 = vsel %vm865_vm1, %v853_v51, %v2107_v1 }
 0x28d   : >> { %859 = vst [vmem:[%s845_s27] sm:$0xff] %v858_v2  ;;  %2108 = vst [vmem:[%s845_s27 + $0x8] sm:$0xff] %v866_v3 }
 0x291   : >> { %v870_v4 = vld [vmem:[%s3310_s28] sm:$0xff]  ;;  %v2109_v9 = vld [vmem:[%s3325_s15 + $0x8] sm:$0xff] }
 0x292   : >> { %871 = vrot.lane.b32.xlu1 %v870_v4, %s2991_s30  ;;  %v874_v5 = vld [vmem:[%s3312_s29] sm:$0xff]  ;;  %v2111_v6 = vld [vmem:[%s3316_s1 + $0x8] sm:$0xff] }
 0x293   : >> { %875 = vrot.lane.b32.xlu0 %v874_v5, %s2991_s30  ;;  %v940_v7 = vld [vmem:[%s3319_s12] sm:$0xff]  ;;  %v2117_v10 = vld [vmem:[%s3328_s16 + $0x8] sm:$0xff] }
 0x294   : >> { %v936_v8 = vld [vmem:[%s3321_s14] sm:$0xff]  ;;  %v2115_v11 = vld [vmem:[%s3330_s17 + $0x8] sm:$0xff] }
 0x296   : >> { %907 = vrot.lane.b32.xlu1 %v2111_v6, %s2991_s30 }
 0x297   : >> { %892 = vrot.lane.b32.xlu0 %v870_v4, %s2992_s13 }
 0x29a   : >> { %941 = vrot.lane.b32.xlu1 %v940_v7, %s2991_s30 }
 0x29b   : >> { %937 = vrot.lane.b32.xlu0 %v936_v8, %s2991_s30 }
 0x29e   : >> { %903 = vrot.lane.b32.xlu1 %v2109_v9, %s2991_s30 }
 0x29f   : >> { %924 = vrot.lane.b32.xlu0 %v2109_v9, %s2992_s13 }
 0x2a2   : >> { %973 = vrot.lane.b32.xlu1 %v2117_v10, %s2991_s30 }
 0x2a3   : >> { %969 = vrot.lane.b32.xlu0 %v2115_v11, %s2991_s30 }
 0x2a6   : >> { %958 = vrot.lane.b32.xlu1 %v936_v8, %s2992_s13 }
 0x2aa   : >> { %990 = vrot.lane.b32.xlu1 %v2115_v11, %s2992_s13 }
 0x304   : >> { %v872_v12 = vpop.permute.xlu1 %871 }
 0x305   : >> { %v876_v13 = vpop.permute.xlu0 %875 }
 0x306   : >> { %v880_v16 = vsel %vm879_vm2, %v874_v5, %v876_v13 }
 0x307   : >> { %v884_v17 = vsel %vm883_vm3, %v872_v12, %v880_v16 }
 0x308   : >> { %v890_v18 = vsel %vm1823_vm4, %v884_v17, 0.0  ;;  %v908_v19 = vpop.permute.xlu1 %907 }
 0x309   : >> { %v893_v20 = vpop.permute.xlu0 %892  ;;  %930 = vst [vmem:[%s3312_s29] sm:$0xff] %v890_v18  ;;  %v912_v27 = vsel %vm879_vm2, %v2111_v6, %v908_v19 }
 0x30a   : >> { %v897_v21 = vsel %vm896_vm5, %v874_v5, %v893_v20 }
 0x30b   : >> { %931 = vst [vmem:[%s3310_s28] sm:$0xff] %v897_v21 }
 0x30c   : >> { %v942_v22 = vpop.permute.xlu1 %941 }
 0x30d   : >> { %v946_v23 = vsel %vm879_vm2, %v940_v7, %v942_v22  ;;  %v938_v24 = vpop.permute.xlu0 %937 }
 0x30e   : >> { %v950_v25 = vsel %vm883_vm3, %v938_v24, %v946_v23 }
 0x30f   : >> { %v956_v26 = vsel %vm1823_vm4, %v950_v25, 0.0 }
 0x310   : >> { %v904_v28 = vpop.permute.xlu1 %903  ;;  %996 = vst [vmem:[%s3319_s12] sm:$0xff] %v956_v26 }
 0x311   : >> { %v916_v29 = vsel %vm883_vm3, %v904_v28, %v912_v27  ;;  %v925_v30 = vpop.permute.xlu0 %924 }
 0x312   : >> { %v922_v31 = vsel %vm1823_vm4, %v916_v29, 0.0  ;;  %v929_v32 = vsel %vm896_vm5, %v2111_v6, %v925_v30 }
 0x313   : >> { %2113 = vst [vmem:[%s3316_s1 + $0x8] sm:$0xff] %v922_v31  ;;  %2114 = vst [vmem:[%s3325_s15 + $0x8] sm:$0xff] %v929_v32 }
 0x314   : >> { %v974_v33 = vpop.permute.xlu1 %973 }
 0x315   : >> { %v978_v34 = vsel %vm879_vm2, %v2117_v10, %v974_v33  ;;  %v970_v35 = vpop.permute.xlu0 %969 }
 0x316   : >> { %v982_v36 = vsel %vm883_vm3, %v970_v35, %v978_v34 }
 0x317   : >> { %v988_v37 = vsel %vm1823_vm4, %v982_v36, 0.0 }
 0x318   : >> { %v959_v38 = vpop.permute.xlu1 %958  ;;  %2119 = vst [vmem:[%s3328_s16 + $0x8] sm:$0xff] %v988_v37 }
 0x319   : >> { %v963_v39 = vsel %vm896_vm5, %v940_v7, %v959_v38  ;;  %v365_v7 = vadd.s32 (%p471_p9), 8, %v346_v15  ;;  %v375_v15 = vmov (%p471_p9), %v3081_v15 }
 0x31a   : >> { %v1002_v40 = vld [vmem:[%s3368_s2] ss:$0 sm:$0xff]  ;;  %v2122_v42 = vld [vmem:[%s3368_s2 + $0x7] ss:$0 sm:$0xff]  ;;  %997 = vst [vmem:[%s3321_s14] sm:$0xff] %v963_v39  ;;  %v2123_v44 = vld [vmem:[%s3368_s2 + $0x7] sm:$0xfe]  ;;  %v421_v15 = vmov (%p471_p9), %v3081_v15 }
 0x31b   : >> { %v2121_v41 = vld [vmem:[%s3368_s2 - $0x1] sm:$0xfe]  ;;  %v1020_v47 = vsel %vm1008_vm8, %v2122_v42, %v2123_v44  ;;  %v2132_v49 = vld [vmem:[%s3372_s18 + $0x7] ss:$0 sm:$0xff]  ;;  %v2133_v50 = vld [vmem:[%s3372_s18 + $0x7] sm:$0xfe]  ;;  %vm366_vm7 = vcmp.eq.s32.totalorder (%p471_p9), %v365_v7, %v343_v14  ;;  %v395_v14 = vmov (%p471_p9), %v3079_v14  ;;  %v398_v15 = vmov (%p471_p9), %v3081_v15 }
 0x31c   : >> { %v1009_v43 = vsel %vm1008_vm8, %v1002_v40, %v2121_v41  ;;  %v1046_v45 = vld [vmem:[%s3372_s18] ss:$0 sm:$0xff]  ;;  %v2134_v51 = vld [vmem:[%s3372_s18 + $0xf] ss:$0 sm:$0xff]  ;;  %v991_v52 = vpop.permute.xlu1 %990  ;;  %v1064_v53 = vsel %vm1008_vm8, %v2132_v49, %v2133_v50  ;;  %v418_v14 = vmov (%p471_p9), %v3079_v14  ;;  %v442_v36 = vadd.s32 (%p471_p9), 8, %v421_v15 }
 0x31d   : >> { %v2131_v46 = vld [vmem:[%s3372_s18 - $0x1] sm:$0xfe]  ;;  %1012 = vst [vmem:[%s3368_s2] sm:$0xff] %v1009_v43  ;;  %v995_v54 = vsel %vm896_vm5, %v2117_v10, %v991_v52  ;;  %v2124_v55 = vld [vmem:[%s3368_s2 + $0xf] ss:$0 sm:$0xff]  ;;  %2135 = vst [vmem:[%s3372_s18 + $0x8] sm:$0xff] %v1064_v53 }
 0x31e   : >> { %v1053_v48 = vsel %vm1008_vm8, %v1046_v45, %v2131_v46  ;;  %2120 = vst [vmem:[%s3330_s17 + $0x8] sm:$0xff] %v995_v54  ;;  %2125 = vst [vmem:[%s3368_s2 + $0x8] sm:$0xff] %v1020_v47  ;;  %vm433_vm8 = vcmp.eq.s32.totalorder (%p471_p9), %v421_v15, %v418_v14 }
 0x31f   : >> { %1056 = vst [vmem:[%s3372_s18] sm:$0xff] %v1053_v48  ;;  %v1024_v56 = vld [vmem:[%s3377_s19] ss:$0 sm:$0xff]  ;;  %v2127_v57 = vld [vmem:[%s3377_s19 + $0x9] sm:$0x7f]  ;;  %v2128_v58 = vld [vmem:[%s3377_s19 + $0x8] ss:$0 sm:$0xff] }
 0x320   : >> { %2126 = vst [vmem:[%s3368_s2 + $0x1] sm:$0x1] %v1024_v56  ;;  %v1033_v59 = vsel %vm1032_vm9, %v2124_v55, %v2127_v57  ;;  %v2130_v60 = vld [vmem:[%s3377_s19 + $0x1] sm:$0x7f] }
 0x321   : >> { %2129 = vst [vmem:[%s3377_s19 + $0x8] sm:$0xff] %v1033_v59  ;;  %v1041_v61 = vsel %vm1032_vm9, %v2128_v58, %v2130_v60 }
 0x322   : >> { %1043 = vst [vmem:[%s3377_s19] sm:$0xff] %v1041_v61 }
 0x324   : > { %473 = sbr.rel (!%p471_p9) target bundleno = 332 (0x14c), region = 504 }
 0x325   : >> { %v1068_v62 = vld [vmem:[%s1045_s20] ss:$0 sm:$0xff]  ;;  %v2137_v63 = vld [vmem:[%s1045_s20 + $0x9] sm:$0x7f]  ;;  %v2138_v0 = vld [vmem:[%s1045_s20 + $0x8] ss:$0 sm:$0xff] }
 0x326   : >> { %2136 = vst [vmem:[%s3372_s18 + $0x1] sm:$0x1] %v1068_v62  ;;  %v1077_v1 = vsel %vm1032_vm9, %v2134_v51, %v2137_v63  ;;  %v2140_v2 = vld [vmem:[%s1045_s20 + $0x1] sm:$0x7f] }
 0x327   : >> { %2139 = vst [vmem:[%s1045_s20 + $0x8] sm:$0xff] %v1077_v1  ;;  %v1085_v3 = vsel %vm1032_vm9, %v2138_v0, %v2140_v2  ;;  %v353_v4 = vld [vmem:[%s347_s22] sm:$0xff] (%p471_p9)  ;;  %v2171_v5 = vld [vmem:[%s347_s22 + $0x8] sm:$0xff] (%p471_p9)  ;;  %vm443_vm9 = vcmp.eq.s32.totalorder (%p471_p9), %v442_v36, %v418_v14 }
 0x328   : >> { %1087 = vst [vmem:[%s1045_s20] sm:$0xff] %v1085_v3  ;;  %v354_v8 = vsel (%p471_p9), %vm1823_vm4, %v353_v4, 0.0  ;;  %v362_v9 = vsel (%p471_p9), %vm1823_vm4, %v2171_v5, 0.0 }
 0x329   : > { %v405_v12 = vld [vmem:[%s399_s0] sm:$0xff] (%p471_p9)  ;;  %v355_v13 = vmul.f32 (%p471_p9), %v354_v8, %v354_v8  ;;  %v363_v16 = vmul.f32 (%p471_p9), %v362_v9, %v362_v9  ;;  %v2173_v19 = vld [vmem:[%s399_s0 + $0x8] sm:$0xff] (%p471_p9) }
 0x32a   : > { %v406_v20 = vsel (%p471_p9), %vm1823_vm4, %v405_v12, 0.0  ;;  %v412_v24 = vsel (%p471_p9), %vm1823_vm4, %v2173_v19, 0.0 }
 0x32b   : > { %v369_v21 = vadd.f32 %v363_v16, %v355_v13  ;;  %v359_v25 = vsel %vm358_vm6, 0.0, %v355_v13  ;;  %v407_v27 = vmul.f32 %v406_v20, %v406_v20  ;;  %v367_v29 = vsel %vm366_vm7, 0.0, %v363_v16 }
 0x32c   : > { %v368_v31 = vadd.f32 %v367_v29, %v359_v25  ;;  %v413_v33 = vmul.f32 %v412_v24, %v412_v24 }
 0x32d   : > { %v382_v6 = vld [vmem:[%s376_s3] sm:$0xff]  ;;  %v2172_v11 = vld [vmem:[%s376_s3 + $0x8] sm:$0xff] }
 0x32e   : > { %v383_v10 = vsel %vm1823_vm4, %v382_v6, 0.0  ;;  %v389_v18 = vsel %vm1823_vm4, %v2172_v11, 0.0 }
 0x32f   : > { %v384_v17 = vmul.f32 %v383_v10, %v383_v10  ;;  %v390_v22 = vmul.f32 %v389_v18, %v389_v18  ;;  %v428_v23 = vld [vmem:[%s422_s11] sm:$0xff]  ;;  %v2174_v28 = vld [vmem:[%s422_s11 + $0x8] sm:$0xff] }
 0x330   : > { %v429_v30 = vsel %vm1823_vm4, %v428_v23, 0.0  ;;  %v439_v34 = vsel %vm1823_vm4, %v2174_v28, 0.0 }
 0x331   : > { %v386_v26 = vadd.f32 %v384_v17, %v369_v21  ;;  %v385_v35 = vadd.f32 %v384_v17, %v368_v31  ;;  %v430_v38 = vmul.f32 %v429_v30, %v429_v30  ;;  %v440_v41 = vmul.f32 %v439_v34, %v439_v34 }
 0x333   : > { %v392_v32 = vadd.f32 %v390_v22, %v386_v26  ;;  %v391_v39 = vadd.f32 %v390_v22, %v385_v35  ;;  %v434_v44 = vsel %vm433_vm8, 0.0, %v430_v38  ;;  %v444_v47 = vsel %vm443_vm9, 0.0, %v440_v41 }
 0x335   : > { %v409_v37 = vadd.f32 %v407_v27, %v392_v32  ;;  %v408_v42 = vadd.f32 %v407_v27, %v391_v39 }
 0x337   : > { %v415_v40 = vadd.f32 %v413_v33, %v409_v37  ;;  %v414_v45 = vadd.f32 %v413_v33, %v408_v42 }
 0x339   : > { %v436_v43 = vadd.f32 %v430_v38, %v415_v40  ;;  %v435_v48 = vadd.f32 %v434_v44, %v414_v45 }
 0x33b   : > { %v446_v46 = vadd.f32 %v440_v41, %v436_v43  ;;  %v445_v49 = vadd.f32 %v444_v47, %v435_v48 }
 0x33d   : > { %447 = vadd.xlane.f32.xlu0 %v446_v46 }
 0x341   : > { %455 = vadd.xlane.f32.xlu0 %v445_v49 }
 0x3ca   : > { %v448_v50 = vpop.xlane.xlu0 %447 }
 0x3cb   : > { %v449_v51 = vrot.slane %v448_v50, 4 }
 0x3cd   : > { %v450_v52 = vadd.f32 %v449_v51, %v448_v50 }
 0x3ce   : > { %v456_v53 = vpop.xlane.xlu0 %455 }
 0x3cf   : > { %v451_v54 = vrot.slane %v450_v52, 2  ;;  %v457_v55 = vrot.slane %v456_v53, 4 }
 0x3d1   : > { %v458_v56 = vadd.f32 %v457_v55, %v456_v53  ;;  %v452_v57 = vadd.f32 %v451_v54, %v450_v52 }
 0x3d3   : > { %v459_v58 = vrot.slane %v458_v56, 2  ;;  %v453_v60 = vrot.slane %v452_v57, 1 }
 0x3d5   : > { %v460_v59 = vadd.f32 %v459_v58, %v458_v56  ;;  %v454_v63 = vadd.f32 %v453_v60, %v452_v57 }
 0x3d7   : > { %v461_v61 = vrot.slane %v460_v59, 1 }
 0x3d9   : > { %v462_v62 = vadd.f32 %v461_v61, %v460_v59 }
 0x3db   : > { %2203 = vpush %v462_v62 }
 0x3dc   : > { %2205 = vpush %v454_v63 }
 0x40c   : > { %s2204_s23 = spop %2203 }
 0x40d   : > { %s2206_s24 = spop %2205 }
 0x40e   : > { %s465_s25 = smul.f32 1e-10, %s2206_s24 }
 0x410   : > { %p466_p11 = scmp.le.f32.partialorder %s2204_s23, %s465_s25 }
 0x412   : > { %p468_p12 = por %p467_p10, %p466_p11 }
 0x414   :  { %1240 = sbr.rel (!%p468_p12) target bundleno = 331 (0x14b), region = 515 }
 0x41b PF:  { %s1241_s26 = smov [#allocation12]  ;;  %v1245_v14 = vmov %v3079_v14  ;;  %v1248_v15 = vmov %v3081_v15  ;;  %s1267_s27 = smov [#allocation15] }
 0x41c   :  { %v1271_v14 = vmov %v3079_v14  ;;  %v1274_v15 = vmov %v3081_v15  ;;  %v1249_v0 = vld [vmem:[%s1241_s26] sm:$0xff]  ;;  %vm1252_vm10 = vcmp.eq.s32.totalorder %v1248_v15, %v1245_v14  ;;  %v2175_v1 = vld [vmem:[%s1241_s26 + $0x8] sm:$0xff]  ;;  %v1257_v2 = vadd.s32 8, %v1248_v15  ;;  %s1242_s10 = smov [#allocation4]  ;;  %s1268_s28 = smov [#allocation6] }
 0x41d   :  { %vm1278_vm11 = vcmp.eq.s32.totalorder %v1274_v15, %v1271_v14  ;;  %v1283_v3 = vadd.s32 8, %v1274_v15  ;;  %v1253_v4 = vsel %vm1252_vm10, %v1249_v0, 0.0  ;;  %v1275_v5 = vld [vmem:[%s1267_s27] sm:$0xff]  ;;  %v2176_v6 = vld [vmem:[%s1267_s27 + $0x8] sm:$0xff]  ;;  %s2958_s15 = smov %s3484_s6   ;;  %s2962_s16 = smov [#allocation8]  }
 0x41e   :  { %vm1258_vm4 = vcmp.eq.s32.totalorder %v1257_v2, %v1245_v14  ;;  %v1279_v7 = vsel %vm1278_vm11, %v1275_v5, 0.0 }
 0x41f   :  { %vm1284_vm12 = vcmp.eq.s32.totalorder %v1283_v3, %v1271_v14  ;;  %v1259_v8 = vsel %vm1258_vm4, %v2175_v1, %v1253_v4 }
 0x420   :  { %v1285_v9 = vsel %vm1284_vm12, %v2176_v6, %v1279_v7  ;;  %v1260_v10 = vrot.slane %v1259_v8, 4 }
 0x421   :  { %v1286_v11 = vrot.slane %v1285_v9, 4 }
 0x422   :  { %v1261_v12 = vadd.f32 %v1260_v10, %v1259_v8 }
 0x423   :  { %v1287_v13 = vadd.f32 %v1286_v11, %v1285_v9 }
 0x424   :  { %v1262_v16 = vrot.slane %v1261_v12, 2 }
 0x425   :  { %v1288_v17 = vrot.slane %v1287_v13, 2 }
 0x426   :  { %v1263_v18 = vadd.f32 %v1262_v16, %v1261_v12 }
 0x427   :  { %v1289_v19 = vadd.f32 %v1288_v17, %v1287_v13 }
 0x428   :  { %v1264_v20 = vrot.slane %v1263_v18, 1 }
 0x429   :  { %v1290_v21 = vrot.slane %v1289_v19, 1 }
 0x42a   :  { %v1265_v15 = vadd.f32 %v1264_v20, %v1263_v18 }
 0x42b   :  { %v1291_v22 = vadd.f32 %v1290_v21, %v1289_v19 }
 0x42c   :  { %1266 = vst [vmem:[%s1242_s10] sm:$0x1] %v1265_v15 }
 0x42d   :  { %1292 = vst [vmem:[%s1268_s28] sm:$0x1] %v1291_v22 }
 0x433   :  { %v1296_v23 = vld [vmem:[#allocation4] sm:$0x1] }
 0x434   :  { %v1302_v14 = vld [vmem:[#allocation6] sm:$0x1]  ;;  %1298 = vst [vmem:[#allocation5] sm:$0x1] %v1296_v23 }
 0x435   :  { %1304 = vst [vmem:[#allocation7] sm:$0x1] %v1302_v14 }
 0x43b   :  { %v1367_v24 = vld [vmem:[#allocation5] sm:$0x1] }
 0x43c   :  { %v1431_v25 = vld [vmem:[#allocation7] sm:$0x1]  ;;  %1368 = vst [vmem:[%s3482_s4] sm:$0x1] %v1367_v24 }
 0x43d   :  { %1432 = vst [vmem:[%s3483_s5] sm:$0x1] %v1431_v25 }
 0x43e LB: > { %v1480_v26 = vld [vmem:[%s2964_s16] sm:$0xff]  ;;  %s1482_s16 = scalar_lea.vmem %s2964_s16, 8   ;;  %s2964_s16 = sphi %s2962_s16, %s1482_s16   ;;  %s2960_s15 = sphi %s2958_s15, %s1483_s15  }
 0x43f   : > { %1481 = vst [vmem:[%s2960_s15] sm:$0xff] %v1480_v26  ;;  %s1483_s15 = scalar_lea.vmem %s2960_s15, 8   ;;  %p1477_p13 = scmp.gt.s32.totalorder %s1482_s16, [#allocation8 + $0x8] }
 0x440   :  { %s2966_s5 = smov (%p1477_p13), %s3485_s7   ;;  %s2970_s2 = smov (%p1477_p13), [#allocation9]  }
 0x441   :  { %1479 = sbr.rel (!%p1477_p13) target bundleno = 1086 (0x43e), region = 581 }
 0x448 LB: > { %v1542_v27 = vld [vmem:[%s2972_s2] sm:$0xff]  ;;  %s1544_s2 = scalar_lea.vmem %s2972_s2, 8   ;;  %s2972_s2 = sphi %s2970_s2, %s1544_s2   ;;  %s2968_s5 = sphi %s2966_s5, %s1545_s5  }
 0x449   : > { %1543 = vst [vmem:[%s2968_s5] sm:$0xff] %v1542_v27  ;;  %s1545_s5 = scalar_lea.vmem %s2968_s5, 8   ;;  %p1539_p0 = scmp.gt.s32.totalorder %s1544_s2, [#allocation9 + $0x8] }
 0x44a   :  { %s2974_s19 = smov (%p1539_p0), %s3486_s8   ;;  %s2978_s20 = smov (%p1539_p0), [#allocation10]  }
 0x44b   :  { %1541 = sbr.rel (!%p1539_p0) target bundleno = 1096 (0x448), region = 603 }
 0x452 LB: > { %v1604_v28 = vld [vmem:[%s2980_s20] sm:$0xff]  ;;  %s1606_s20 = scalar_lea.vmem %s2980_s20, 8   ;;  %s2980_s20 = sphi %s2978_s20, %s1606_s20   ;;  %s2976_s19 = sphi %s2974_s19, %s1607_s19  }
 0x453   : > { %1605 = vst [vmem:[%s2976_s19] sm:$0xff] %v1604_v28  ;;  %s1607_s19 = scalar_lea.vmem %s2976_s19, 8   ;;  %p1601_p1 = scmp.gt.s32.totalorder %s1606_s20, [#allocation10 + $0x8] }
 0x454   :  { %s2982_s22 = smov (%p1601_p1), %s3487_s9   ;;  %s2986_s3 = smov (%p1601_p1), [#allocation11]  }
 0x455   :  { %1603 = sbr.rel (!%p1601_p1) target bundleno = 1106 (0x452), region = 625 }
 0x45c LB: > { %v1666_v29 = vld [vmem:[%s2988_s3] sm:$0xff]  ;;  %s1668_s3 = scalar_lea.vmem %s2988_s3, 8   ;;  %s2988_s3 = sphi %s2986_s3, %s1668_s3   ;;  %s2984_s22 = sphi %s2982_s22, %s1669_s22  }
 0x45d   : > { %1667 = vst [vmem:[%s2984_s22] sm:$0xff] %v1666_v29  ;;  %s1669_s22 = scalar_lea.vmem %s2984_s22, 8   ;;  %p1663_p2 = scmp.gt.s32.totalorder %s1668_s3, [#allocation11 + $0x8] }
 0x45f   :  { %1665 = sbr.rel (!%p1663_p2) target bundleno = 1116 (0x45c), region = 647 }

// kernel: ckn_sequential_forward.2
= control target key start
LH: loop header
LB: loop body
LE: loop exit
PB: predicated region body
PF: predicated region fallthrough
CT: control target
= control target key end

     0   :  { %s2131_s12 = smov 0   ;;  %s2685_s0 = inlined_call_operand.vmem [shape: f32[2,16,16,128], index: 0, kind: input, shape index: {}]   ;;  %s2686_s1 = inlined_call_operand.vmem [shape: f32[1,128,128], index: 1, kind: input, shape index: {}]   ;;  %s2687_s2 = inlined_call_operand.vmem [shape: f32[128,128], index: 2, kind: input, shape index: {}]   ;;  %s2688_s3 = inlined_call_operand.vmem [shape: f32[2,8,8,128], index: 3, kind: output, shape index: {}]  }
   0x1 LB: > { %s1600_s13 = sadd.s32 4294967295, %s2108_s12   ;;  %p1604_p0 = scmp.ge.s32.totalorder %s2108_s12, 1  ;;  %s2108_s12 = sphi %s2131_s12, %s13_s12  }
   0x2   : > { %p137_p1 = scmp.lt.s32.totalorder %s2108_s12, 3 }
   0x4   : > { %p138_p2 = pnand %p1604_p0, %p137_p1 }
   0x5   : > { %v203_v0 = vld [vmem:[%s2686_s1] sm:$0xff] (!%p138_p2)  ;;  %v204_v1 = vld [vmem:[%s2686_s1 + $0x8] sm:$0xff] (!%p138_p2)  ;;  %v205_v2 = vld [vmem:[%s2686_s1 + $0x10] sm:$0xff] (!%p138_p2)  ;;  %p161_p3 = scmp.lt.s32.totalorder (!%p138_p2), %s1600_s13, 1 }
   0x6   : > { %141 = sbr.rel (%p138_p2) target bundleno = 584 (0x248), region = 32  ;;  %v1901_v3 = vpack.c.bf16 (!%p138_p2), %v204_v1, %v203_v0  ;;  %v206_v4 = vld [vmem:[%s2686_s1 + $0x18] sm:$0xff] (!%p138_p2)  ;;  %v207_v6 = vld [vmem:[%s2686_s1 + $0x20] sm:$0xff] (!%p138_p2)  ;;  %v208_v7 = vld [vmem:[%s2686_s1 + $0x28] sm:$0xff] (!%p138_p2) }
   0x7   : > { %v1905_v5 = vpack.c.bf16 (!%p138_p2), %v206_v4, %v205_v2  ;;  %v1909_v8 = vpack.c.bf16 (!%p138_p2), %v208_v7, %v207_v6  ;;  %v209_v9 = vld [vmem:[%s2686_s1 + $0x30] sm:$0xff] (!%p138_p2)  ;;  %v210_v10 = vld [vmem:[%s2686_s1 + $0x38] sm:$0xff] (!%p138_p2)  ;;  %v211_v19 = vld [vmem:[%s2686_s1 + $0x40] sm:$0xff] (!%p138_p2) }
   0x8   : > { %1902 = vmatprep.subr.bf16.mxu0 (!%p138_p2), %v1901_v3  ;;  %v1913_v16 = vpack.c.bf16 (!%p138_p2), %v210_v10, %v209_v9  ;;  %v212_v20 = vld [vmem:[%s2686_s1 + $0x48] sm:$0xff] (!%p138_p2)  ;;  %v213_v26 = vld [vmem:[%s2686_s1 + $0x50] sm:$0xff] (!%p138_p2)  ;;  %v214_v27 = vld [vmem:[%s2686_s1 + $0x58] sm:$0xff] (!%p138_p2) }
   0x9   : > { %1904 = vmatpush3.bf16.msra.mxu0 (!%p138_p2), %v1901_v3  ;;  %v1917_v23 = vpack.c.bf16 (!%p138_p2), %v212_v20, %v211_v19  ;;  %v1921_v30 = vpack.c.bf16 (!%p138_p2), %v214_v27, %v213_v26  ;;  %v215_v33 = vld [vmem:[%s2686_s1 + $0x60] sm:$0xff] (!%p138_p2)  ;;  %v216_v34 = vld [vmem:[%s2686_s1 + $0x68] sm:$0xff] (!%p138_p2)  ;;  %v217_v40 = vld [vmem:[%s2686_s1 + $0x70] sm:$0xff] (!%p138_p2) }
   0xa   : > { %1906 = vmatprep.subr.bf16.mxu0 (!%p138_p2), %v1905_v5  ;;  %v1925_v37 = vpack.c.bf16 (!%p138_p2), %v216_v34, %v215_v33  ;;  %v218_v41 = vld [vmem:[%s2686_s1 + $0x78] sm:$0xff] (!%p138_p2)  ;;  %v828_v7 = vld [vmem:[%s2687_s2] sm:$0xff] (!%p138_p2)  ;;  %v834_v33 = vld [vmem:[%s2687_s2 + $0x30] sm:$0xff] (!%p138_p2) }
   0xb   : > { %v1929_v44 = vpack.c.bf16 (!%p138_p2), %v218_v41, %v217_v40  ;;  %v835_v34 = vld [vmem:[%s2687_s2 + $0x38] sm:$0xff] (!%p138_p2) }
   0xc   : > { %v839_v40 = vld [vmem:[%s2687_s2 + $0x58] sm:$0xff] (!%p138_p2) }
   0xd   : > { %s2690_s13 = smov (!%p161_p3, %s1600_s13), 1  ;;  %1908 = vmatpush3.bf16.msra.mxu0 %v1905_v5 }
   0xe   : > { %s1643_s26 = sshll.u32 %s2690_s13, 8  ;;  %1910 = vmatprep.subr.bf16.mxu0 %v1909_v8  ;;  %s1644_s6 = sshll.u32 %s2690_s13, 6 }
   0xf   : > { %s2166_s4 = scalar_lea.vmem %s2685_s0, %s1643_s26  ;;  %s2658_s8 = scalar_lea.vmem %s2688_s3, %s1644_s6 }
  0x10   : > { %v171_v11 = vld [vmem:[%s2166_s4] sm:$0xff]  ;;  %v2173_v12 = vld [vmem:[%s2166_s4 + $0x10] sm:$0xff]  ;;  %v2178_v15 = vld [vmem:[%s2166_s4 + $0x8] sm:$0xff] }
  0x11   : > { %1773 = vmatprep.mubr.f32.mxu0 %v171_v11  ;;  %v444_v13 = vmul.f32 %v171_v11, %v171_v11  ;;  %v446_v14 = vmul.f32 %v2173_v12, %v2173_v12  ;;  %v2181_v17 = vld [vmem:[%s2166_s4 + $0x18] sm:$0xff]  ;;  %v445_v18 = vmul.f32 %v2178_v15, %v2178_v15  ;;  %1912 = vmatpush3.bf16.msra.mxu0 %v1909_v8  ;;  %v2194_v22 = vld [vmem:[%s2166_s4 + $0x20] sm:$0xff]  ;;  %v2197_v24 = vld [vmem:[%s2166_s4 + $0x28] sm:$0xff] }
  0x12   : > { %v447_v21 = vmul.f32 %v2181_v17, %v2181_v17  ;;  %1914 = vmatprep.subr.bf16.mxu0 %v1913_v16  ;;  %v448_v25 = vmul.f32 %v2194_v22, %v2194_v22  ;;  %v449_v28 = vmul.f32 %v2197_v24, %v2197_v24  ;;  %v177_v29 = vld [vmem:[%s2166_s4 + $0x30] sm:$0xff]  ;;  %v2211_v31 = vld [vmem:[%s2166_s4 + $0x38] sm:$0xff]  ;;  %v179_v36 = vld [vmem:[%s2166_s4 + $0x40] sm:$0xff] }
  0x13   : > { %476 = vadd.xlane.f32.xlu0 %v444_v13  ;;  %480 = vadd.xlane.f32.xlu1 %v446_v14  ;;  %v450_v32 = vmul.f32 %v177_v29, %v177_v29  ;;  %v451_v35 = vmul.f32 %v2211_v31, %v2211_v31  ;;  %v2223_v38 = vld [vmem:[%s2166_s4 + $0x48] sm:$0xff]  ;;  %v452_v39 = vmul.f32 %v179_v36, %v179_v36  ;;  %v181_v43 = vld [vmem:[%s2166_s4 + $0x50] sm:$0xff]  ;;  %v2235_v45 = vld [vmem:[%s2166_s4 + $0x58] sm:$0xff] }
  0x14   : > { %v453_v42 = vmul.f32 %v2223_v38, %v2223_v38  ;;  %v454_v46 = vmul.f32 %v181_v43, %v181_v43  ;;  %v455_v47 = vmul.f32 %v2235_v45, %v2235_v45  ;;  %v183_v48 = vld [vmem:[%s2166_s4 + $0x60] sm:$0xff]  ;;  %v2241_v49 = vld [vmem:[%s2166_s4 + $0x68] sm:$0xff]  ;;  %v2246_v52 = vld [vmem:[%s2166_s4 + $0x70] sm:$0xff] }
  0x15   : > { %1916 = vmatpush3.bf16.msra.mxu0 %v1913_v16  ;;  %v456_v50 = vmul.f32 %v183_v48, %v183_v48  ;;  %v457_v51 = vmul.f32 %v2241_v49, %v2241_v49  ;;  %v2249_v53 = vld [vmem:[%s2166_s4 + $0x78] sm:$0xff]  ;;  %v458_v54 = vmul.f32 %v2246_v52, %v2246_v52  ;;  %v2258_v56 = vld [vmem:[%s2166_s4 + $0x80] sm:$0xff]  ;;  %v2261_v57 = vld [vmem:[%s2166_s4 + $0x88] sm:$0xff] }
  0x16   : > { %1918 = vmatprep.subr.bf16.mxu0 %v1917_v23  ;;  %v459_v55 = vmul.f32 %v2249_v53, %v2249_v53  ;;  %v460_v58 = vmul.f32 %v2258_v56, %v2258_v56  ;;  %v461_v59 = vmul.f32 %v2261_v57, %v2261_v57  ;;  %v2270_v60 = vld [vmem:[%s2166_s4 + $0x90] sm:$0xff]  ;;  %v2273_v61 = vld [vmem:[%s2166_s4 + $0x98] sm:$0xff]  ;;  %v191_v0 = vld [vmem:[%s2166_s4 + $0xa0] sm:$0xff] }
  0x17   : > { %478 = vadd.xlane.f32.xlu0 %v445_v18  ;;  %482 = vadd.xlane.f32.xlu1 %v447_v21  ;;  %v462_v62 = vmul.f32 %v2270_v60, %v2270_v60  ;;  %v463_v63 = vmul.f32 %v2273_v61, %v2273_v61  ;;  %v192_v1 = vld [vmem:[%s2166_s4 + $0xa8] sm:$0xff]  ;;  %v464_v2 = vmul.f32 %v191_v0, %v191_v0  ;;  %v193_v4 = vld [vmem:[%s2166_s4 + $0xb0] sm:$0xff]  ;;  %v194_v5 = vld [vmem:[%s2166_s4 + $0xb8] sm:$0xff] }
  0x18   : > { %v465_v3 = vmul.f32 %v192_v1, %v192_v1  ;;  %v466_v6 = vmul.f32 %v193_v4, %v193_v4  ;;  %v829_v8 = vld [vmem:[%s2687_s2 + $0x8] sm:$0xff]  ;;  %v467_v9 = vmul.f32 %v194_v5, %v194_v5  ;;  %v195_v11 = vld [vmem:[%s2166_s4 + $0xc0] sm:$0xff]  ;;  %v830_v14 = vld [vmem:[%s2687_s2 + $0x10] sm:$0xff] }
  0x19   : > { %1920 = vmatpush3.bf16.msra.mxu0 %v1917_v23  ;;  %v1933_v10 = vpack.c.bf16 %v829_v8, %v828_v7  ;;  %v468_v13 = vmul.f32 %v195_v11, %v195_v11  ;;  %v197_v18 = vld [vmem:[%s2166_s4 + $0xd0] sm:$0xff]  ;;  %v198_v19 = vld [vmem:[%s2166_s4 + $0xd8] sm:$0xff]  ;;  %v200_v23 = vld [vmem:[%s2166_s4 + $0xe8] sm:$0xff] }
  0x1a   : > { %1922 = vmatprep.subr.bf16.mxu0 %v1921_v30  ;;  %v470_v20 = vmul.f32 %v197_v18, %v197_v18  ;;  %v471_v21 = vmul.f32 %v198_v19, %v198_v19  ;;  %v201_v26 = vld [vmem:[%s2166_s4 + $0xf0] sm:$0xff]  ;;  %v202_v27 = vld [vmem:[%s2166_s4 + $0xf8] sm:$0xff] }
  0x1b   : > { %484 = vadd.xlane.f32.xlu0 %v448_v25  ;;  %486 = vadd.xlane.f32.xlu1 %v449_v28  ;;  %v473_v25 = vmul.f32 %v200_v23, %v200_v23  ;;  %v474_v28 = vmul.f32 %v201_v26, %v201_v26 }
  0x1c   : > { %1934 = vmatprep.subr.bf16.mxu1 %v1933_v10 }
  0x1d   : > { %1924 = vmatpush3.bf16.msra.mxu0 %v1921_v30  ;;  %1936 = vmatpush3.bf16.msra.mxu1 %v1933_v10  ;;  %v832_v30 = vld [vmem:[%s2687_s2 + $0x20] sm:$0xff] }
  0x1e   : > { %1926 = vmatprep.subr.bf16.mxu0 %v1925_v37 }
  0x1f   : > { %488 = vadd.xlane.f32.xlu0 %v450_v32  ;;  %490 = vadd.xlane.f32.xlu1 %v451_v35  ;;  %v1945_v35 = vpack.c.bf16 %v835_v34, %v834_v33 }
  0x21   : > { %1928 = vmatpush3.bf16.msra.mxu0 %v1925_v37  ;;  %v837_v37 = vld [vmem:[%s2687_s2 + $0x48] sm:$0xff] }
  0x22   : > { %1930 = vmatprep.subr.bf16.mxu0 %v1929_v44 }
  0x23   : > { %492 = vadd.xlane.f32.xlu0 %v452_v39  ;;  %494 = vadd.xlane.f32.xlu1 %v453_v42  ;;  %v838_v39 = vld [vmem:[%s2687_s2 + $0x50] sm:$0xff]  ;;  %v840_v42 = vld [vmem:[%s2687_s2 + $0x60] sm:$0xff] }
  0x24   : > { %v1953_v41 = vpack.c.bf16 %v839_v40, %v838_v39 }
  0x25   : > { %1932 = vmatpush3.bf16.msra.mxu0 %v1929_v44 }
  0x27   : > { %496 = vadd.xlane.f32.xlu0 %v454_v46  ;;  %498 = vadd.xlane.f32.xlu1 %v455_v47  ;;  %v843_v46 = vld [vmem:[%s2687_s2 + $0x78] sm:$0xff] }
  0x28   : > { %1774 = vmatmul.mubr.f32.vlgmr.msra.gmra.mrb[0].mxu0 %v2178_v15  ;;  %v831_v15 = vld [vmem:[%s2687_s2 + $0x18] sm:$0xff] }
  0x29   : > { %1776 = vmatprep.mubr.f32.mxu0 %v2173_v12  ;;  %v196_v12 = vld [vmem:[%s2166_s4 + $0xc8] sm:$0xff] }
  0x2a   : > { %v469_v16 = vmul.f32 %v196_v12, %v196_v12 }
  0x2b   : > { %500 = vadd.xlane.f32.xlu0 %v456_v50  ;;  %502 = vadd.xlane.f32.xlu1 %v457_v51 }
  0x2c   : > { %1777 = vmatmul.mubr.f32.gmra.mrb[2].mxu0 %v2181_v17  ;;  %v1937_v17 = vpack.c.bf16 %v831_v15, %v830_v14 }
  0x2d   : > { %1779 = vmatprep.mubr.f32.mxu0 %v2194_v22  ;;  %v199_v22 = vld [vmem:[%s2166_s4 + $0xe0] sm:$0xff] }
  0x2e   : > { %1938 = vmatprep.subr.bf16.mxu1 %v1937_v17 }
  0x2f   : > { %504 = vadd.xlane.f32.xlu0 %v458_v54  ;;  %506 = vadd.xlane.f32.xlu1 %v459_v55 }
  0x30   : > { %1780 = vmatmul.mubr.f32.gmra.mrb[4].mxu0 %v2197_v24  ;;  %1940 = vmatpush3.bf16.msra.mxu1 %v1937_v17  ;;  %v472_v24 = vmul.f32 %v199_v22, %v199_v22 }
  0x31   : > { %1782 = vmatprep.mubr.f32.mxu0 %v177_v29  ;;  %v475_v29 = vmul.f32 %v202_v27, %v202_v27 }
  0x33   : > { %508 = vadd.xlane.f32.xlu0 %v460_v58  ;;  %510 = vadd.xlane.f32.xlu1 %v461_v59 }
  0x34   : > { %1783 = vmatmul.mubr.f32.gmra.mrb[6].mxu0 %v2211_v31  ;;  %v833_v31 = vld [vmem:[%s2687_s2 + $0x28] sm:$0xff] }
  0x35   : > { %1785 = vmatprep.mubr.f32.mxu0 %v179_v36  ;;  %v1941_v32 = vpack.c.bf16 %v833_v31, %v832_v30  ;;  %v836_v36 = vld [vmem:[%s2687_s2 + $0x40] sm:$0xff] }
  0x37   : > { %512 = vadd.xlane.f32.xlu0 %v462_v62  ;;  %514 = vadd.xlane.f32.xlu1 %v463_v63 }
  0x38   : > { %1786 = vmatmul.mubr.f32.gmra.mrb[8].mxu0 %v2223_v38  ;;  %1942 = vmatprep.subr.bf16.mxu1 %v1941_v32  ;;  %v1949_v38 = vpack.c.bf16 %v837_v37, %v836_v36 }
  0x39   : > { %1788 = vmatprep.mubr.f32.mxu0 %v181_v43  ;;  %1944 = vmatpush3.bf16.msra.mxu1 %v1941_v32  ;;  %v841_v43 = vld [vmem:[%s2687_s2 + $0x68] sm:$0xff] }
  0x3a   : > { %1946 = vmatprep.subr.bf16.mxu1 %v1945_v35  ;;  %v1957_v44 = vpack.c.bf16 %v841_v43, %v840_v42 }
  0x3b   : > { %516 = vadd.xlane.f32.xlu0 %v464_v2  ;;  %518 = vadd.xlane.f32.xlu1 %v465_v3 }
  0x3c   : > { %1789 = vmatmul.mubr.f32.gmra.mrb[10].mxu0 %v2235_v45  ;;  %v842_v45 = vld [vmem:[%s2687_s2 + $0x70] sm:$0xff] }
  0x3d   : > { %1791 = vmatprep.mubr.f32.mxu0 %v183_v48  ;;  %1948 = vmatpush3.bf16.msra.mxu1 %v1945_v35  ;;  %v1961_v47 = vpack.c.bf16 %v843_v46, %v842_v45 }
  0x3e   : > { %1950 = vmatprep.subr.bf16.mxu1 %v1949_v38 }
  0x3f   : > { %520 = vadd.xlane.f32.xlu0 %v466_v6  ;;  %522 = vadd.xlane.f32.xlu1 %v467_v9 }
  0x40   : > { %1792 = vmatmul.mubr.f32.gmra.mrb[12].mxu0 %v2241_v49 }
  0x41   : > { %1794 = vmatprep.mubr.f32.mxu0 %v2246_v52  ;;  %1952 = vmatpush3.bf16.msra.mxu1 %v1949_v38 }
  0x42   : > { %1954 = vmatprep.subr.bf16.mxu1 %v1953_v41 }
  0x43   : > { %524 = vadd.xlane.f32.xlu0 %v468_v13  ;;  %526 = vadd.xlane.f32.xlu1 %v469_v16 }
  0x44   : > { %1795 = vmatmul.mubr.f32.gmra.mrb[14].mxu0 %v2249_v53 }
  0x45   : > { %1797 = vmatprep.mubr.f32.mxu0 %v2258_v56  ;;  %1956 = vmatpush3.bf16.msra.mxu1 %v1953_v41 }
  0x46   : > { %1958 = vmatprep.subr.bf16.mxu1 %v1957_v44 }
  0x47   : > { %528 = vadd.xlane.f32.xlu0 %v470_v20  ;;  %530 = vadd.xlane.f32.xlu1 %v471_v21 }
  0x48   : > { %1798 = vmatmul.mubr.f32.gmra.mrb[16].mxu0 %v2261_v57 }
  0x49   : > { %1800 = vmatprep.mubr.f32.mxu0 %v2270_v60  ;;  %1960 = vmatpush3.bf16.msra.mxu1 %v1957_v44 }
  0x4a   : > { %1962 = vmatprep.subr.bf16.mxu1 %v1961_v47 }
  0x4b   : > { %532 = vadd.xlane.f32.xlu0 %v472_v24  ;;  %534 = vadd.xlane.f32.xlu1 %v473_v25 }
  0x4c   : > { %1801 = vmatmul.mubr.f32.gmra.mrb[18].mxu0 %v2273_v61 }
  0x4d   : > { %1803 = vmatprep.mubr.f32.mxu0 %v191_v0  ;;  %1964 = vmatpush3.bf16.msra.mxu1 %v1961_v47 }
  0x4f   : > { %536 = vadd.xlane.f32.xlu0 %v474_v28  ;;  %538 = vadd.xlane.f32.xlu1 %v475_v29 }
  0x50   : > { %1804 = vmatmul.mubr.f32.gmra.mrb[20].mxu0 %v192_v1 }
  0x51   : > { %1806 = vmatprep.mubr.f32.mxu0 %v193_v4 }
  0x54   : > { %1807 = vmatmul.mubr.f32.gmra.mrb[22].mxu0 %v194_v5 }
  0x55   : > { %1809 = vmatprep.mubr.f32.mxu0 %v195_v11 }
  0x58   : > { %1810 = vmatmul.mubr.f32.gmra.mrb[24].mxu0 %v196_v12 }
  0x59   : > { %1812 = vmatprep.mubr.f32.mxu0 %v197_v18 }
  0x5c   : > { %1813 = vmatmul.mubr.f32.gmra.mrb[26].mxu0 %v198_v19 }
  0x5d   : > { %1815 = vmatprep.mubr.f32.mxu0 %v199_v22 }
  0x60   : > { %1816 = vmatmul.mubr.f32.gmra.mrb[28].mxu0 %v200_v23 }
  0x61   : > { %1818 = vmatprep.mubr.f32.mxu0 %v201_v26 }
  0x64   : > { %1819 = vmatmul.mubr.f32.gmra.mrb[30].mxu0 %v202_v27 }
  0xa0   : > { %v481_v48 = vpop.xlane.xlu1 %480  ;;  %v477_v49 = vpop.xlane.xlu0 %476 }
  0xa1   : > { %v540_v61 = vmax.f32 %v477_v49, 1e-08  ;;  %v542_v63 = vmax.f32 %v481_v48, 1e-08 }
  0xa4   : > { %v2350_v50 = vpop.xlane.xlu1 %482  ;;  %v479_v51 = vpop.xlane.xlu0 %478 }
  0xa5   : > { %v541_v60 = vmax.f32 %v479_v51, 1e-08  ;;  %v543_v0 = vmax.f32 %v2350_v50, 1e-08 }
  0xa7   : > { %1974 = vrsqrt.f32 %v541_v60 }
  0xa8   : > { %v2352_v52 = vpop.xlane.xlu1 %486  ;;  %v2354_v53 = vpop.xlane.xlu0 %484  ;;  %1976 = vrsqrt.f32 %v540_v61 }
  0xa9   : > { %v544_v2 = vmax.f32 %v2354_v53, 1e-08  ;;  %1978 = vrsqrt.f32 %v542_v63  ;;  %v545_v3 = vmax.f32 %v2352_v52, 1e-08 }
  0xaa   : > { %1980 = vrsqrt.f32 %v543_v0 }
  0xab   : > { %1982 = vrsqrt.f32 %v544_v2 }
  0xac   : > { %v2356_v54 = vpop.xlane.xlu1 %490  ;;  %v2358_v55 = vpop.xlane.xlu0 %488  ;;  %1984 = vrsqrt.f32 %v545_v3 }
  0xad   : > { %v546_v5 = vmax.f32 %v2358_v55, 1e-08  ;;  %v547_v6 = vmax.f32 %v2356_v54, 1e-08 }
  0xaf   : > { %1986 = vrsqrt.f32 %v546_v5 }
  0xb0   : > { %v2360_v56 = vpop.xlane.xlu1 %494  ;;  %v2362_v57 = vpop.xlane.xlu0 %492  ;;  %1988 = vrsqrt.f32 %v547_v6 }
  0xb1   : > { %v548_v8 = vmax.f32 %v2362_v57, 1e-08  ;;  %v549_v9 = vmax.f32 %v2360_v56, 1e-08  ;;  %v1975_v11 = vpop.eup %1974 }
  0xb2   : > { %v1977_v14 = vpop.eup %1976  ;;  %v2409_v34 = vmul.f32 %v1975_v11, %v541_v60 }
  0xb3   : > { %1990 = vrsqrt.f32 %v548_v8  ;;  %v1979_v20 = vpop.eup %1978  ;;  %v2405_v31 = vmul.f32 %v1977_v14, %v540_v61 }
  0xb4   : > { %v2364_v58 = vpop.xlane.xlu1 %498  ;;  %v2366_v59 = vpop.xlane.xlu0 %496  ;;  %1992 = vrsqrt.f32 %v549_v9  ;;  %v2407_v33 = vmul.f32 %v1979_v20, %v542_v63 }
  0xb5   : > { %v550_v12 = vmax.f32 %v2366_v59, 1e-08  ;;  %v551_v15 = vmax.f32 %v2364_v58, 1e-08  ;;  %v1981_v23 = vpop.eup %1980 }
  0xb6   : > { %v1983_v32 = vpop.eup %1982  ;;  %v2411_v38 = vmul.f32 %v1981_v23, %v543_v0 }
  0xb7   : > { %1994 = vrsqrt.f32 %v550_v12  ;;  %v1985_v37 = vpop.eup %1984  ;;  %v2420_v47 = vmul.f32 %v1983_v32, %v544_v2 }
  0xb8   : > { %v2368_v62 = vpop.xlane.xlu1 %502  ;;  %v2371_v1 = vpop.xlane.xlu0 %500  ;;  %1996 = vrsqrt.f32 %v551_v15  ;;  %v2422_v52 = vmul.f32 %v1985_v37, %v545_v3 }
  0xb9   : > { %v552_v22 = vmax.f32 %v2371_v1, 1e-08  ;;  %v553_v25 = vmax.f32 %v2368_v62, 1e-08  ;;  %v1987_v41 = vpop.eup %1986 }
  0xba   : > { %v1989_v51 = vpop.eup %1988  ;;  %v2426_v63 = vmul.f32 %v1987_v41, %v546_v5 }
  0xbb   : > { %1998 = vrsqrt.f32 %v552_v22  ;;  %v2436_v55 = vmul.f32 %v1989_v51, %v547_v6 }
  0xbc   : > { %v2375_v4 = vpop.xlane.xlu1 %506  ;;  %v2379_v7 = vpop.xlane.xlu0 %504  ;;  %2000 = vrsqrt.f32 %v553_v25 }
  0xbd   : > { %v554_v43 = vmax.f32 %v2379_v7, 1e-08  ;;  %v1991_v61 = vpop.eup %1990 }
  0xc0   : > { %v2385_v10 = vpop.xlane.xlu1 %510  ;;  %v2393_v19 = vpop.xlane.xlu0 %508 }
  0xc1   : > { %v556_v3 = vmax.f32 %v2393_v19, 1e-08  ;;  %v557_v6 = vmax.f32 %v2385_v10, 1e-08 }
  0xc4   : > { %v2403_v30 = vpop.xlane.xlu1 %514  ;;  %v2418_v46 = vpop.xlane.xlu0 %512 }
  0xc5   : > { %v559_v58 = vmax.f32 %v2403_v30, 1e-08 }
  0xfb   : > { %v1775_v13 = vpop.f32.mrb[0].mxu0 }
  0xfc   : > { %v637_v16 = vmul.f32 %v1975_v11, %v1775_v13  ;;  %v285_v17 = vpop.f32.mrb[1].mxu0  ;;  %v555_v11 = vmax.f32 %v2375_v4, 1e-08  ;;  %v2429_v13 = vpop.xlane.xlu1 %518 }
  0xfd   : > { %v636_v18 = vmul.f32 %v1977_v14, %v285_v17 }
  0xfe   : > { %v1610_v21 = vadd.f32 -1.0, %v637_v16 }
  0xff   : > { %v1609_v24 = vadd.f32 -1.0, %v636_v18  ;;  %v1778_v26 = vpop.f32.mrb[2].mxu0  ;;  %v1993_v18 = vpop.eup %1992 }
 0x100   : > { %v701_v27 = vmul.f32 4.0, %v1610_v21  ;;  %v639_v28 = vmul.f32 %v1981_v23, %v1778_v26  ;;  %v295_v29 = vpop.f32.mrb[3].mxu0  ;;  %v1995_v23 = vpop.eup %1994 }
 0x101   : > { %v700_v35 = vmul.f32 4.0, %v1609_v24  ;;  %v638_v36 = vmul.f32 %v1979_v20, %v295_v29  ;;  %v2440_v24 = vmul.f32 %v1991_v61, %v548_v8  ;;  %v1997_v29 = vpop.eup %1996 }
 0x102   : > { %v734_v39 = vmul.f32 1.442695, %v701_v27  ;;  %v1612_v40 = vadd.f32 -1.0, %v639_v28  ;;  %v2442_v28 = vpop.xlane.xlu0 %516 }
 0x103   : > { %v732_v42 = vmul.f32 1.442695, %v700_v35  ;;  %v1611_v44 = vadd.f32 -1.0, %v638_v36  ;;  %v1781_v45 = vpop.f32.mrb[4].mxu0  ;;  %v2449_v35 = vmul.f32 %v1993_v18, %v549_v9  ;;  %v2461_v9 = vmul.f32 %v1997_v29, %v551_v15 }
 0x104   : > { %2002 = vpow2.f32 %v734_v39  ;;  %v703_v48 = vmul.f32 4.0, %v1612_v40  ;;  %v641_v49 = vmul.f32 %v1985_v37, %v1781_v45  ;;  %v305_v50 = vpop.f32.mrb[5].mxu0  ;;  %v1999_v37 = vpop.eup %1998  ;;  %v2455_v39 = vmul.f32 %v1995_v23, %v550_v12 }
 0x105   : > { %2004 = vpow2.f32 %v732_v42  ;;  %v702_v53 = vmul.f32 4.0, %v1611_v44  ;;  %v640_v60 = vmul.f32 %v1983_v32, %v305_v50  ;;  %v2457_v44 = vpop.xlane.xlu1 %522  ;;  %v2001_v56 = vpop.eup %2000  ;;  %v558_v12 = vmax.f32 %v2418_v46, 1e-08 }
 0x106   : > { %v738_v0 = vmul.f32 1.442695, %v703_v48  ;;  %v1614_v2 = vadd.f32 -1.0, %v641_v49  ;;  %2006 = vrsqrt.f32 %v554_v43 }
 0x107   : > { %v736_v14 = vmul.f32 1.442695, %v702_v53  ;;  %v1613_v16 = vadd.f32 -1.0, %v640_v60  ;;  %v1784_v17 = vpop.f32.mrb[6].mxu0  ;;  %v2468_v53 = vmul.f32 %v1999_v37, %v552_v22 }
 0x108   : > { %2008 = vpow2.f32 %v738_v0  ;;  %v705_v5 = vmul.f32 4.0, %v1614_v2  ;;  %v643_v20 = vmul.f32 %v1989_v51, %v1784_v17  ;;  %v315_v21 = vpop.f32.mrb[7].mxu0  ;;  %v2471_v2 = vpop.xlane.xlu0 %520 }
 0x109   : > { %2010 = vpow2.f32 %v736_v14  ;;  %v704_v26 = vmul.f32 4.0, %v1613_v16  ;;  %v642_v27 = vmul.f32 %v1987_v41, %v315_v21  ;;  %v2477_v21 = vmul.f32 %v2001_v56, %v553_v25 }
 0x10a   : > { %2012 = vrsqrt.f32 %v555_v11  ;;  %v742_v54 = vmul.f32 1.442695, %v705_v5  ;;  %v1616_v32 = vadd.f32 -1.0, %v643_v20 }
 0x10b   : > { %2014 = vrsqrt.f32 %v556_v3  ;;  %v740_v57 = vmul.f32 1.442695, %v704_v26  ;;  %v1615_v8 = vadd.f32 -1.0, %v642_v27  ;;  %v1787_v36 = vpop.f32.mrb[8].mxu0 }
 0x10c   : > { %2016 = vpow2.f32 %v742_v54  ;;  %v707_v40 = vmul.f32 4.0, %v1616_v32  ;;  %v645_v41 = vmul.f32 %v1993_v18, %v1787_v36  ;;  %v325_v42 = vpop.f32.mrb[9].mxu0 }
 0x10d   : > { %2018 = vpow2.f32 %v740_v57  ;;  %v706_v45 = vmul.f32 4.0, %v1615_v8  ;;  %v644_v48 = vmul.f32 %v1991_v61, %v325_v42  ;;  %v2491_v42 = vpop.xlane.xlu0 %524 }
 0x10e   : > { %v2003_v49 = vpop.eup %2002  ;;  %2020 = vrsqrt.f32 %v557_v6  ;;  %v746_v59 = vmul.f32 1.442695, %v707_v40  ;;  %v1618_v50 = vadd.f32 -1.0, %v645_v41 }
 0x10f   : > { %v2005_v51 = vpop.eup %2004  ;;  %v744_v60 = vmul.f32 1.442695, %v706_v45  ;;  %v1617_v15 = vadd.f32 -1.0, %v644_v48  ;;  %v1790_v0 = vpop.f32.mrb[10].mxu0  ;;  %v797_v1 = vmul.f32 %v2003_v49, %v2409_v34  ;;  %v561_v34 = vmax.f32 %v2429_v13, 1e-08 }
 0x110   : > { %2022 = vpow2.f32 %v746_v59  ;;  %v709_v61 = vmul.f32 4.0, %v1618_v50  ;;  %v647_v14 = vmul.f32 %v1997_v29, %v1790_v0  ;;  %v335_v16 = vpop.f32.mrb[11].mxu0  ;;  %v796_v17 = vmul.f32 %v2005_v51, %v2405_v31  ;;  %v2007_v18 = vpop.eup %2006 }
 0x111   : > { %2024 = vpow2.f32 %v744_v60  ;;  %v708_v5 = vmul.f32 4.0, %v1617_v15  ;;  %v646_v20 = vmul.f32 %v1995_v23, %v335_v16  ;;  %v2481_v29 = vpop.xlane.xlu1 %526  ;;  %v2496_v59 = vmul.f32 %v2007_v18, %v554_v43 }
 0x112   : > { %v2009_v22 = vpop.eup %2008  ;;  %2026 = vrsqrt.f32 %v558_v12  ;;  %v750_v26 = vmul.f32 1.442695, %v709_v61  ;;  %v1620_v27 = vadd.f32 -1.0, %v647_v14  ;;  %1853 = vmatprep.mubr.f32.mxu1 %v796_v17  ;;  %v560_v50 = vmax.f32 %v2442_v28, 1e-08 }
 0x113   : > { %v2011_v31 = vpop.eup %2010  ;;  %2028 = vrsqrt.f32 %v559_v58  ;;  %v748_v23 = vmul.f32 1.442695, %v708_v5  ;;  %v1619_v54 = vadd.f32 -1.0, %v646_v20  ;;  %v1793_v32 = vpop.f32.mrb[12].mxu0  ;;  %1854 = vmatmul.mubr.f32.vlgmr.msra.gmra.mrb[0].mxu1 %v797_v1  ;;  %v799_v48 = vmul.f32 %v2009_v22, %v2411_v38 }
 0x114   : > { %v2486_v62 = vpop.eup %2012  ;;  %2030 = vpow2.f32 %v750_v26  ;;  %v711_v25 = vmul.f32 4.0, %v1620_v27  ;;  %v649_v57 = vmul.f32 %v2001_v56, %v1793_v32  ;;  %v345_v8 = vpop.f32.mrb[13].mxu0  ;;  %v798_v36 = vmul.f32 %v2011_v31, %v2407_v33 }
 0x115   : > { %v2489_v40 = vpop.eup %2014  ;;  %2032 = vpow2.f32 %v748_v23  ;;  %v710_v41 = vmul.f32 4.0, %v1619_v54  ;;  %v648_v45 = vmul.f32 %v1999_v37, %v345_v8  ;;  %v563_v15 = vmax.f32 %v2457_v44, 1e-08  ;;  %v2505_v14 = vpop.xlane.xlu1 %530 }
 0x116   : > { %v2017_v49 = vpop.eup %2016  ;;  %v754_v56 = vmul.f32 1.442695, %v711_v25  ;;  %v1622_v51 = vadd.f32 -1.0, %v649_v57  ;;  %1856 = vmatprep.mubr.f32.mxu1 %v798_v36  ;;  %2034 = vrsqrt.f32 %v561_v34  ;;  %v562_v22 = vmax.f32 %v2471_v2, 1e-08  ;;  %v2515_v54 = vpop.xlane.xlu0 %528 }
 0x117   : > { %v2019_v33 = vpop.eup %2018  ;;  %v752_v60 = vmul.f32 1.442695, %v710_v41  ;;  %v1621_v37 = vadd.f32 -1.0, %v648_v45  ;;  %v1796_v0 = vpop.f32.mrb[14].mxu0  ;;  %1857 = vmatmul.mubr.f32.gmra.mrb[2].mxu1 %v799_v48  ;;  %v801_v20 = vmul.f32 %v2017_v49, %v2422_v52 }
 0x118   : > { %v2502_v38 = vpop.eup %2020  ;;  %2036 = vpow2.f32 %v754_v56  ;;  %v713_v7 = vmul.f32 4.0, %v1622_v51  ;;  %v651_v43 = vmul.f32 %v2486_v62, %v1796_v0  ;;  %v355_v61 = vpop.f32.mrb[15].mxu0  ;;  %v800_v16 = vmul.f32 %v2019_v33, %v2420_v47 }
 0x119   : > { %2038 = vpow2.f32 %v752_v60  ;;  %v712_v17 = vmul.f32 4.0, %v1621_v37  ;;  %v650_v5 = vmul.f32 %v2007_v18, %v355_v61  ;;  %v565_v47 = vmax.f32 %v2481_v29, 1e-08  ;;  %v2528_v37 = vpop.xlane.xlu1 %534 }
 0x11a   : > { %v2023_v1 = vpop.eup %2022  ;;  %2040 = vrsqrt.f32 %v560_v50  ;;  %v758_v26 = vmul.f32 1.442695, %v713_v7  ;;  %v1624_v27 = vadd.f32 -1.0, %v651_v43  ;;  %1859 = vmatprep.mubr.f32.mxu1 %v800_v16  ;;  %v564_v51 = vmax.f32 %v2491_v42, 1e-08 }
 0x11b   : > { %v2025_v31 = vpop.eup %2024  ;;  %2042 = vrsqrt.f32 %v563_v15  ;;  %v756_v23 = vmul.f32 1.442695, %v712_v17  ;;  %v1623_v18 = vadd.f32 -1.0, %v650_v5  ;;  %v1799_v52 = vpop.f32.mrb[16].mxu0  ;;  %1860 = vmatmul.mubr.f32.gmra.mrb[4].mxu1 %v801_v20  ;;  %v803_v49 = vmul.f32 %v2023_v1, %v2436_v55 }
 0x11c   : > { %v2517_v32 = vpop.eup %2026  ;;  %2044 = vpow2.f32 %v758_v26  ;;  %v715_v25 = vmul.f32 4.0, %v1624_v27  ;;  %v653_v57 = vmul.f32 %v2502_v38, %v1799_v52  ;;  %v365_v8 = vpop.f32.mrb[17].mxu0  ;;  %v802_v36 = vmul.f32 %v2025_v31, %v2426_v63 }
 0x11d   : > { %v2521_v41 = vpop.eup %2028  ;;  %2046 = vpow2.f32 %v756_v23  ;;  %v714_v45 = vmul.f32 4.0, %v1623_v18  ;;  %v652_v48 = vmul.f32 %v2489_v40, %v365_v8  ;;  %v567_v7 = vmax.f32 %v2505_v14, 1e-08  ;;  %v2537_v1 = vpop.xlane.xlu0 %532 }
 0x11e   : > { %v2031_v56 = vpop.eup %2030  ;;  %2048 = vrsqrt.f32 %v562_v22  ;;  %v762_v33 = vmul.f32 1.442695, %v715_v25  ;;  %v1626_v60 = vadd.f32 -1.0, %v653_v57  ;;  %1862 = vmatprep.mubr.f32.mxu1 %v802_v36  ;;  %v566_v18 = vmax.f32 %v2515_v54, 1e-08 }
 0x11f   : > { %v2033_v63 = vpop.eup %2032  ;;  %2050 = vrsqrt.f32 %v565_v47  ;;  %v760_v0 = vmul.f32 1.442695, %v714_v45  ;;  %v1625_v43 = vadd.f32 -1.0, %v652_v48  ;;  %v1802_v55 = vpop.f32.mrb[18].mxu0  ;;  %1863 = vmatmul.mubr.f32.gmra.mrb[6].mxu1 %v803_v49  ;;  %v805_v31 = vmul.f32 %v2031_v56, %v2449_v35 }
 0x120   : > { %2052 = vpow2.f32 %v762_v33  ;;  %v717_v61 = vmul.f32 4.0, %v1626_v60  ;;  %v655_v16 = vmul.f32 %v2521_v41, %v1802_v55  ;;  %v375_v17 = vpop.f32.mrb[19].mxu0  ;;  %v804_v5 = vmul.f32 %v2033_v63, %v2440_v24  ;;  %v2535_v20 = vpop.eup %2034 }
 0x121   : > { %2054 = vpow2.f32 %v760_v0  ;;  %v716_v26 = vmul.f32 4.0, %v1625_v43  ;;  %v654_v27 = vmul.f32 %v2517_v32, %v375_v17  ;;  %v569_v8 = vmax.f32 %v2528_v37, 1e-08  ;;  %v2549_v49 = vpop.xlane.xlu1 %538 }
 0x122   : > { %v2037_v23 = vpop.eup %2036  ;;  %2056 = vrsqrt.f32 %v564_v51  ;;  %v766_v52 = vmul.f32 1.442695, %v717_v61  ;;  %v1628_v25 = vadd.f32 -1.0, %v655_v16  ;;  %1865 = vmatprep.mubr.f32.mxu1 %v804_v5  ;;  %v568_v16 = vmax.f32 %v2537_v1, 1e-08 }
 0x123   : > { %v2039_v24 = vpop.eup %2038  ;;  %2058 = vrsqrt.f32 %v567_v7  ;;  %v764_v57 = vmul.f32 1.442695, %v716_v26  ;;  %v1627_v36 = vadd.f32 -1.0, %v654_v27  ;;  %v1805_v45 = vpop.f32.mrb[20].mxu0  ;;  %1866 = vmatmul.mubr.f32.gmra.mrb[8].mxu1 %v805_v31  ;;  %v807_v55 = vmul.f32 %v2037_v23, %v2461_v9 }
 0x124   : > { %v2547_v35 = vpop.eup %2040  ;;  %2060 = vpow2.f32 %v766_v52  ;;  %v719_v48 = vmul.f32 4.0, %v1628_v25  ;;  %v657_v56 = vmul.f32 %v2535_v20, %v1805_v45  ;;  %v385_v33 = vpop.f32.mrb[21].mxu0  ;;  %v806_v60 = vmul.f32 %v2039_v24, %v2455_v39 }
 0x125   : > { %v2553_v63 = vpop.eup %2042  ;;  %2062 = vpow2.f32 %v764_v57  ;;  %v718_v0 = vmul.f32 4.0, %v1627_v36  ;;  %v656_v43 = vmul.f32 %v2547_v35, %v385_v33  ;;  %v2562_v39 = vpop.xlane.xlu0 %536  ;;  %v571_v31 = vmax.f32 %v2549_v49, 1e-08 }
 0x126   : > { %v2045_v61 = vpop.eup %2044  ;;  %2064 = vrsqrt.f32 %v566_v18  ;;  %v770_v17 = vmul.f32 1.442695, %v719_v48  ;;  %v1630_v5 = vadd.f32 -1.0, %v657_v56  ;;  %1868 = vmatprep.mubr.f32.mxu1 %v806_v60  ;;  %v2110_v37 = vmov 0.0  }
 0x127   : > { %v2047_v26 = vpop.eup %2046  ;;  %2066 = vrsqrt.f32 %v569_v8  ;;  %v768_v27 = vmul.f32 1.442695, %v718_v0  ;;  %v1629_v52 = vadd.f32 -1.0, %v656_v43  ;;  %v1808_v9 = vpop.f32.mrb[22].mxu0  ;;  %1869 = vmatmul.mubr.f32.gmra.mrb[10].mxu1 %v807_v55  ;;  %v809_v33 = vmul.f32 %v2045_v61, %v2477_v21  ;;  %1069 = vst [vmem:[#allocation3 + $0x6] sm:$0x3] %v2110_v37 }
 0x128   : > { %v2565_v23 = vpop.eup %2048  ;;  %2068 = vpow2.f32 %v770_v17  ;;  %v721_v25 = vmul.f32 4.0, %v1630_v5  ;;  %v659_v24 = vmul.f32 %v2553_v63, %v1808_v9  ;;  %v395_v57 = vpop.f32.mrb[23].mxu0  ;;  %v808_v36 = vmul.f32 %v2047_v26, %v2468_v53  ;;  %1085 = vst [vmem:[#allocation3 + $0x18] sm:$0x3] %v2110_v37  ;;  %1070 = vst [vmem:[#allocation3 + $0x26] sm:$0x3] %v2110_v37 }
 0x129   : > { %v2569_v45 = vpop.eup %2050  ;;  %2070 = vpow2.f32 %v768_v27  ;;  %v720_v48 = vmul.f32 4.0, %v1629_v52  ;;  %v658_v56 = vmul.f32 %v2565_v23, %v395_v57  ;;  %v570_v0 = vmax.f32 %v2562_v39, 1e-08  ;;  %1071 = vst [vmem:[#allocation3 + $0x46] sm:$0x3] %v2110_v37 }
 0x12a   : > { %v2053_v60 = vpop.eup %2052  ;;  %2072 = vrsqrt.f32 %v568_v16  ;;  %v774_v43 = vmul.f32 1.442695, %v721_v25  ;;  %v1632_v55 = vadd.f32 -1.0, %v659_v24  ;;  %1871 = vmatprep.mubr.f32.mxu1 %v808_v36  ;;  %v619_v53 = vmul.f32 %v2486_v62, %v555_v11  ;;  %1072 = vst [vmem:[#allocation3 + $0x66] sm:$0x3] %v2110_v37 }
 0x12b   : > { %v2055_v17 = vpop.eup %2054  ;;  %2074 = vrsqrt.f32 %v571_v31  ;;  %v772_v5 = vmul.f32 1.442695, %v720_v48  ;;  %v1631_v26 = vadd.f32 -1.0, %v658_v56  ;;  %v1811_v21 = vpop.f32.mrb[24].mxu0  ;;  %1872 = vmatmul.mubr.f32.gmra.mrb[12].mxu1 %v809_v33  ;;  %v620_v36 = vmul.f32 %v2489_v40, %v556_v3  ;;  %1073 = vst [vmem:[#allocation3 + $0x86] sm:$0x3] %v2110_v37 }
 0x12c   : > { %v2581_v61 = vpop.eup %2056  ;;  %2076 = vpow2.f32 %v774_v43  ;;  %v723_v27 = vmul.f32 4.0, %v1632_v55  ;;  %v661_v52 = vmul.f32 %v2569_v45, %v1811_v21  ;;  %v405_v9 = vpop.f32.mrb[25].mxu0  ;;  %v810_v25 = vmul.f32 %v2055_v17, %v2496_v59  ;;  %1074 = vst [vmem:[#allocation3 + $0xa6] sm:$0x3] %v2110_v37  ;;  %1075 = vst [vmem:[#allocation3 + $0xc6] sm:$0x3] %v2110_v37 }
 0x12d   : > { %v2585_v24 = vpop.eup %2058  ;;  %2078 = vpow2.f32 %v772_v5  ;;  %v722_v4 = vmul.f32 4.0, %v1631_v26  ;;  %v660_v11 = vmul.f32 %v2581_v61, %v405_v9  ;;  %v811_v62 = vmul.f32 %v2053_v60, %v619_v53  ;;  %1076 = vst [vmem:[#allocation3 + $0xe6] sm:$0x3] %v2110_v37  ;;  %1077 = vst [vmem:[#allocation3 + $0x106] sm:$0x3] %v2110_v37 }
 0x12e   : > { %v2061_v57 = vpop.eup %2060  ;;  %2080 = vrsqrt.f32 %v570_v0  ;;  %v778_v48 = vmul.f32 1.442695, %v723_v27  ;;  %v1634_v56 = vadd.f32 -1.0, %v661_v52  ;;  %1874 = vmatprep.mubr.f32.mxu1 %v810_v25  ;;  %v621_v59 = vmul.f32 %v2502_v38, %v557_v6  ;;  %1078 = vst [vmem:[#allocation3 + $0x126] sm:$0x3] %v2110_v37 }
 0x12f   : > { %v2063_v33 = vpop.eup %2062  ;;  %v776_v43 = vmul.f32 1.442695, %v722_v4  ;;  %v1633_v55 = vadd.f32 -1.0, %v660_v11  ;;  %v1814_v17 = vpop.f32.mrb[26].mxu0  ;;  %1875 = vmatmul.mubr.f32.gmra.mrb[14].mxu1 %v811_v62  ;;  %v622_v38 = vmul.f32 %v2517_v32, %v558_v12  ;;  %v623_v25 = vmul.f32 %v2521_v41, %v559_v58  ;;  %1079 = vst [vmem:[#allocation3 + $0x146] sm:$0x3] %v2110_v37 }
 0x130   : > { %v2596_v60 = vpop.eup %2064  ;;  %2082 = vpow2.f32 %v778_v48  ;;  %v725_v19 = vmul.f32 4.0, %v1634_v56  ;;  %v663_v3 = vmul.f32 %v2585_v24, %v1814_v17  ;;  %v415_v40 = vpop.f32.mrb[27].mxu0  ;;  %v812_v53 = vmul.f32 %v2063_v33, %v620_v36  ;;  %1080 = vst [vmem:[#allocation3 + $0x166] sm:$0x3] %v2110_v37  ;;  %1081 = vst [vmem:[#allocation3 + $0x186] sm:$0x3] %v2110_v37 }
 0x131   : > { %v2599_v5 = vpop.eup %2066  ;;  %2084 = vpow2.f32 %v776_v43  ;;  %v724_v26 = vmul.f32 4.0, %v1633_v55  ;;  %v662_v10 = vmul.f32 %v2596_v60, %v415_v40  ;;  %v813_v21 = vmul.f32 %v2061_v57, %v621_v59  ;;  %1082 = vst [vmem:[#allocation3 + $0x1a6] sm:$0x3] %v2110_v37  ;;  %1083 = vst [vmem:[#allocation3 + $0x1c6] sm:$0x3] %v2110_v37 }
 0x132   : > { %v2069_v6 = vpop.eup %2068  ;;  %v782_v27 = vmul.f32 1.442695, %v725_v19  ;;  %v1636_v52 = vadd.f32 -1.0, %v663_v3  ;;  %1877 = vmatprep.mubr.f32.mxu1 %v812_v53  ;;  %v624_v41 = vmul.f32 %v2547_v35, %v560_v50  ;;  %v625_v17 = vmul.f32 %v2535_v20, %v561_v34  ;;  %1084 = vst [vmem:[#allocation3 + $0x1e6] sm:$0x3] %v2110_v37 }
 0x133   : > { %v2071_v9 = vpop.eup %2070  ;;  %v780_v4 = vmul.f32 1.442695, %v724_v26  ;;  %v1635_v11 = vadd.f32 -1.0, %v662_v10  ;;  %v1817_v62 = vpop.f32.mrb[28].mxu0  ;;  %1878 = vmatmul.mubr.f32.gmra.mrb[16].mxu1 %v813_v21  ;;  %v815_v33 = vmul.f32 %v2069_v6, %v623_v25  ;;  %v626_v13 = vmul.f32 %v2565_v23, %v562_v22  ;;  %1086 = vst [vmem:[#allocation3 + $0x38] sm:$0x3] %v2110_v37 }
 0x134   : > { %v2608_v36 = vpop.eup %2072  ;;  %2086 = vpow2.f32 %v782_v27  ;;  %v727_v57 = vmul.f32 4.0, %v1636_v52  ;;  %v665_v46 = vmul.f32 %v2599_v5, %v1817_v62  ;;  %v425_v48 = vpop.f32.mrb[29].mxu0  ;;  %v814_v12 = vmul.f32 %v2071_v9, %v622_v38  ;;  %1087 = vst [vmem:[#allocation3 + $0x58] sm:$0x3] %v2110_v37  ;;  %1088 = vst [vmem:[#allocation3 + $0x78] sm:$0x3] %v2110_v37 }
 0x135   : > { %v2611_v32 = vpop.eup %2074  ;;  %2088 = vpow2.f32 %v780_v4  ;;  %v726_v56 = vmul.f32 4.0, %v1635_v11  ;;  %v664_v30 = vmul.f32 %v2608_v36, %v425_v48  ;;  %v627_v52 = vmul.f32 %v2553_v63, %v563_v15  ;;  %1089 = vst [vmem:[#allocation3 + $0x98] sm:$0x3] %v2110_v37  ;;  %1090 = vst [vmem:[#allocation3 + $0xb8] sm:$0x3] %v2110_v37 }
 0x136   : > { %v2077_v58 = vpop.eup %2076  ;;  %v786_v59 = vmul.f32 1.442695, %v727_v57  ;;  %v1638_v43 = vadd.f32 -1.0, %v665_v46  ;;  %1880 = vmatprep.mubr.f32.mxu1 %v814_v12  ;;  %v628_v22 = vmul.f32 %v2581_v61, %v564_v51  ;;  %v629_v44 = vmul.f32 %v2569_v45, %v565_v47  ;;  %1091 = vst [vmem:[#allocation3 + $0xd8] sm:$0x3] %v2110_v37 }
 0x137   : > { %v2079_v55 = vpop.eup %2078  ;;  %v784_v19 = vmul.f32 1.442695, %v726_v56  ;;  %v1637_v3 = vadd.f32 -1.0, %v664_v30  ;;  %v1820_v40 = vpop.f32.mrb[30].mxu0  ;;  %1881 = vmatmul.mubr.f32.gmra.mrb[18].mxu1 %v815_v33  ;;  %v817_v6 = vmul.f32 %v2077_v58, %v625_v17  ;;  %v630_v42 = vmul.f32 %v2596_v60, %v566_v18  ;;  %1092 = vst [vmem:[#allocation3 + $0xf8] sm:$0x3] %v2110_v37 }
 0x138   : > { %v2081_v53 = vpop.eup %2080  ;;  %2090 = vpow2.f32 %v786_v59  ;;  %v729_v26 = vmul.f32 4.0, %v1638_v43  ;;  %v667_v10 = vmul.f32 %v2611_v32, %v1820_v40  ;;  %v435_v28 = vpop.f32.mrb[31].mxu0  ;;  %v816_v21 = vmul.f32 %v2079_v55, %v624_v41  ;;  %1093 = vst [vmem:[#allocation3 + $0x118] sm:$0x3] %v2110_v37  ;;  %1094 = vst [vmem:[#allocation3 + $0x138] sm:$0x3] %v2110_v37 }
 0x139   : > { %2092 = vpow2.f32 %v784_v19  ;;  %v728_v50 = vmul.f32 4.0, %v1637_v3  ;;  %v666_v35 = vmul.f32 %v2081_v53, %v435_v28  ;;  %v631_v61 = vmul.f32 %v2585_v24, %v567_v7  ;;  %1095 = vst [vmem:[#allocation3 + $0x158] sm:$0x3] %v2110_v37  ;;  %1096 = vst [vmem:[#allocation3 + $0x178] sm:$0x3] %v2110_v37 }
 0x13a   : > { %v2083_v38 = vpop.eup %2082  ;;  %v790_v34 = vmul.f32 1.442695, %v729_v26  ;;  %v1640_v20 = vadd.f32 -1.0, %v667_v10  ;;  %1883 = vmatprep.mubr.f32.mxu1 %v816_v21  ;;  %v632_v56 = vmul.f32 %v2608_v36, %v568_v16  ;;  %v633_v54 = vmul.f32 %v2599_v5, %v569_v8  ;;  %1097 = vst [vmem:[#allocation3 + $0x198] sm:$0x3] %v2110_v37 }
 0x13b   : > { %v2085_v27 = vpop.eup %2084  ;;  %v788_v9 = vmul.f32 1.442695, %v728_v50  ;;  %v1639_v25 = vadd.f32 -1.0, %v666_v35  ;;  %1884 = vmatmul.mubr.f32.gmra.mrb[20].mxu1 %v817_v6  ;;  %v819_v57 = vmul.f32 %v2083_v38, %v627_v52  ;;  %v634_v7 = vmul.f32 %v2081_v53, %v570_v0  ;;  %1098 = vst [vmem:[#allocation3 + $0x1b8] sm:$0x3] %v2110_v37 }
 0x13c   : > { %2094 = vpow2.f32 %v790_v34  ;;  %v731_v4 = vmul.f32 4.0, %v1640_v20  ;;  %v818_v11 = vmul.f32 %v2085_v27, %v626_v13  ;;  %v635_v1 = vmul.f32 %v2611_v32, %v571_v31  ;;  %1099 = vst [vmem:[#allocation3 + $0x1d8] sm:$0x3] %v2110_v37  ;;  %1100 = vst [vmem:[#allocation3 + $0x1f8] sm:$0x3] %v2110_v37 }
 0x13d   : > { %2096 = vpow2.f32 %v788_v9  ;;  %v730_v62 = vmul.f32 4.0, %v1639_v25 }
 0x13e   : > { %v2087_v2 = vpop.eup %2086  ;;  %v794_v23 = vmul.f32 1.442695, %v731_v4  ;;  %1886 = vmatprep.mubr.f32.mxu1 %v818_v11 }
 0x13f   : > { %v2089_v46 = vpop.eup %2088  ;;  %v792_v15 = vmul.f32 1.442695, %v730_v62  ;;  %1887 = vmatmul.mubr.f32.gmra.mrb[22].mxu1 %v819_v57  ;;  %v821_v48 = vmul.f32 %v2087_v2, %v629_v44 }
 0x140   : > { %2098 = vpow2.f32 %v794_v23  ;;  %v820_v63 = vmul.f32 %v2089_v46, %v628_v22 }
 0x141   : > { %2100 = vpow2.f32 %v792_v15 }
 0x142   : > { %v2091_v12 = vpop.eup %2090  ;;  %1889 = vmatprep.mubr.f32.mxu1 %v820_v63 }
 0x143   : > { %v2093_v51 = vpop.eup %2092  ;;  %1890 = vmatmul.mubr.f32.gmra.mrb[24].mxu1 %v821_v48  ;;  %v823_v47 = vmul.f32 %v2091_v12, %v631_v61 }
 0x144   : > { %v822_v29 = vmul.f32 %v2093_v51, %v630_v42 }
 0x146   : > { %v2095_v45 = vpop.eup %2094  ;;  %1892 = vmatprep.mubr.f32.mxu1 %v822_v29 }
 0x147   : > { %v2097_v30 = vpop.eup %2096  ;;  %1893 = vmatmul.mubr.f32.gmra.mrb[26].mxu1 %v823_v47  ;;  %v825_v60 = vmul.f32 %v2095_v45, %v633_v54 }
 0x148   : > { %v824_v18 = vmul.f32 %v2097_v30, %v632_v56 }
 0x14a   : > { %v2099_v14 = vpop.eup %2098  ;;  %1895 = vmatprep.mubr.f32.mxu1 %v824_v18 }
 0x14b   : > { %v2101_v24 = vpop.eup %2100  ;;  %1896 = vmatmul.mubr.f32.gmra.mrb[28].mxu1 %v825_v60  ;;  %v827_v36 = vmul.f32 %v2099_v14, %v635_v1 }
 0x14c   : > { %v826_v16 = vmul.f32 %v2101_v24, %v634_v7 }
 0x14e   : > { %1898 = vmatprep.mubr.f32.mxu1 %v826_v16 }
 0x14f   : > { %1899 = vmatmul.mubr.f32.gmra.mrb[30].mxu1 %v827_v36 }
 0x1e6   : > { %v1855_v8 = vpop.f32.mrb[0].mxu1 }
 0x1e7   : > { %1102 = vst [vmem:[#allocation3 + $0x10] sm:$0xff] %v1855_v8  ;;  %v910_v49 = vpop.f32.mrb[1].mxu1 }
 0x1e8   : > { %1101 = vst [vmem:[#allocation3 + $0x8] sm:$0xff] %v910_v49 }
 0x1ea   : > { %v1858_v39 = vpop.f32.mrb[2].mxu1 }
 0x1eb   : > { %1104 = vst [vmem:[#allocation3 + $0x30] sm:$0xff] %v1858_v39  ;;  %v920_v31 = vpop.f32.mrb[3].mxu1 }
 0x1ec   : > { %1103 = vst [vmem:[#allocation3 + $0x28] sm:$0xff] %v920_v31 }
 0x1ee   : > { %v1861_v0 = vpop.f32.mrb[4].mxu1 }
 0x1ef   : > { %v1134_v5 = vld [vmem:[#allocation3 + $0x6] ss:$2 sm:$0xff]  ;;  %v1182_v32 = vld [vmem:[#allocation3 + $0x7] ss:$2 sm:$0xff]  ;;  %1106 = vst [vmem:[#allocation3 + $0x50] sm:$0xff] %v1861_v0  ;;  %v930_v41 = vpop.f32.mrb[5].mxu1 }
 0x1f0   : > { %v1165_v33 = vmul.f32 0.111703366, %v1134_v5  ;;  %v1213_v58 = vmul.f32 0.23647602, %v1182_v32  ;;  %v1246_v59 = vld [vmem:[#allocation3 + $0x8] ss:$2 sm:$0xff] }
 0x1f1   : > { %1105 = vst [vmem:[#allocation3 + $0x48] sm:$0xff] %v930_v41  ;;  %v1277_v26 = vmul.f32 0.30364123, %v1246_v59  ;;  %v1310_v21 = vld [vmem:[#allocation3 + $0x9] ss:$2 sm:$0xff] }
 0x1f2   : > { %v1864_v43 = vpop.f32.mrb[6].mxu1  ;;  %v1229_v55 = vadd.f32 %v1213_v58, %v1165_v33  ;;  %v1374_v34 = vld [vmem:[#allocation3 + $0xa] ss:$2 sm:$0xff]  ;;  %v1341_v9 = vmul.f32 0.23647602, %v1310_v21 }
 0x1f3   : > { %v1136_v17 = vld [vmem:[#allocation3 + $0x26] ss:$2 sm:$0xff]  ;;  %v1184_v19 = vld [vmem:[#allocation3 + $0x27] ss:$2 sm:$0xff]  ;;  %1108 = vst [vmem:[#allocation3 + $0x70] sm:$0xff] %v1864_v43  ;;  %v940_v28 = vpop.f32.mrb[7].mxu1 }
 0x1f4   : > { %v1248_v3 = vld [vmem:[#allocation3 + $0x28] ss:$2 sm:$0xff]  ;;  %v1166_v40 = vmul.f32 0.111703366, %v1136_v17  ;;  %v1214_v53 = vmul.f32 0.23647602, %v1184_v19  ;;  %v1293_v38 = vadd.f32 %v1277_v26, %v1229_v55 }
 0x1f5   : > { %v1312_v10 = vld [vmem:[#allocation3 + $0x29] ss:$2 sm:$0xff]  ;;  %v1278_v35 = vmul.f32 0.30364123, %v1248_v3  ;;  %1107 = vst [vmem:[#allocation3 + $0x68] sm:$0xff] %v940_v28 }
 0x1f6   : > { %v1230_v50 = vadd.f32 %v1214_v53, %v1166_v40  ;;  %v1867_v6 = vpop.f32.mrb[8].mxu1  ;;  %v1342_v27 = vmul.f32 0.23647602, %v1312_v10  ;;  %v1376_v52 = vld [vmem:[#allocation3 + $0x2a] ss:$2 sm:$0xff]  ;;  %v1357_v2 = vadd.f32 %v1341_v9, %v1293_v38 }
 0x1f7   : > { %1110 = vst [vmem:[#allocation3 + $0x90] sm:$0xff] %v1867_v6  ;;  %v950_v13 = vpop.f32.mrb[9].mxu1  ;;  %v1406_v22 = vmul.f32 0.111703366, %v1376_v52  ;;  %v1405_v44 = vmul.f32 0.111703366, %v1374_v34 }
 0x1f8   : > { %v1294_v20 = vadd.f32 %v1278_v35, %v1230_v50  ;;  %1109 = vst [vmem:[#allocation3 + $0x88] sm:$0xff] %v950_v13  ;;  %v1138_v25 = vld [vmem:[#allocation3 + $0x46] ss:$2 sm:$0xff]  ;;  %v1186_v4 = vld [vmem:[#allocation3 + $0x47] ss:$2 sm:$0xff] }
 0x1f9   : > { %v1167_v62 = vmul.f32 0.111703366, %v1138_v25  ;;  %v1250_v57 = vld [vmem:[#allocation3 + $0x48] ss:$2 sm:$0xff]  ;;  %v1215_v23 = vmul.f32 0.23647602, %v1186_v4  ;;  %v1421_v56 = vadd.f32 %v1405_v44, %v1357_v2 }
 0x1fa   : > { %v1358_v11 = vadd.f32 %v1342_v27, %v1294_v20  ;;  %v1314_v46 = vld [vmem:[#allocation3 + $0x49] ss:$2 sm:$0xff]  ;;  %v1378_v15 = vld [vmem:[#allocation3 + $0x4a] ss:$2 sm:$0xff]  ;;  %v1870_v63 = vpop.f32.mrb[10].mxu1 }
 0x1fb   : > { %v1231_v12 = vadd.f32 %v1215_v23, %v1167_v62  ;;  %v1279_v42 = vmul.f32 0.30364123, %v1250_v57  ;;  %1112 = vst [vmem:[#allocation3 + $0xb0] sm:$0xff] %v1870_v63  ;;  %v1343_v29 = vmul.f32 0.23647602, %v1314_v46  ;;  %v960_v17 = vpop.f32.mrb[11].mxu1 }
 0x1fc   : > { %v1422_v48 = vadd.f32 %v1406_v22, %v1358_v11  ;;  %v1140_v51 = vld [vmem:[#allocation3 + $0x66] ss:$2 sm:$0xff]  ;;  %v1188_v61 = vld [vmem:[#allocation3 + $0x67] ss:$2 sm:$0xff]  ;;  %v1407_v54 = vmul.f32 0.111703366, %v1378_v15 }
 0x1fd   : > { %v1168_v47 = vmul.f32 0.111703366, %v1140_v51  ;;  %v1216_v45 = vmul.f32 0.23647602, %v1188_v61  ;;  %v1295_v30 = vadd.f32 %v1279_v42, %v1231_v12  ;;  %v1252_v18 = vld [vmem:[#allocation3 + $0x68] ss:$2 sm:$0xff] }
 0x1fe   : > { %v1316_v60 = vld [vmem:[#allocation3 + $0x69] ss:$2 sm:$0xff]  ;;  %v1280_v7 = vmul.f32 0.30364123, %v1252_v18  ;;  %v1487_v16 = vmul.f32 0.23647602, %v1422_v48 }
 0x1ff   : > { %v1232_v14 = vadd.f32 %v1216_v45, %v1168_v47  ;;  %v1142_v24 = vld [vmem:[#allocation3 + $0x86] ss:$2 sm:$0xff]  ;;  %v1190_v1 = vld [vmem:[#allocation3 + $0x87] ss:$2 sm:$0xff]  ;;  %v1359_v36 = vadd.f32 %v1343_v29, %v1295_v30  ;;  %v1344_v39 = vmul.f32 0.23647602, %v1316_v60 }
 0x200   : > { %v1380_v37 = vld [vmem:[#allocation3 + $0x6a] ss:$2 sm:$0xff]  ;;  %v1169_v8 = vmul.f32 0.111703366, %v1142_v24  ;;  %v1217_v31 = vmul.f32 0.23647602, %v1190_v1 }
 0x201   : > { %v1296_v49 = vadd.f32 %v1280_v7, %v1232_v14  ;;  %v1254_v0 = vld [vmem:[#allocation3 + $0x88] ss:$2 sm:$0xff]  ;;  %v1479_v5 = vmul.f32 0.111703366, %v1421_v56  ;;  %v1502_v32 = vmul.f32 0.30364123, %v1421_v56  ;;  %v1423_v33 = vadd.f32 %v1407_v54, %v1359_v36 }
 0x202   : > { %v1318_v58 = vld [vmem:[#allocation3 + $0x89] ss:$2 sm:$0xff]  ;;  %v1408_v59 = vmul.f32 0.111703366, %v1380_v37  ;;  %v1233_v43 = vadd.f32 %v1217_v31, %v1169_v8  ;;  %v1281_v55 = vmul.f32 0.30364123, %v1254_v0 }
 0x203   : > { %v1360_v41 = vadd.f32 %v1344_v39, %v1296_v49  ;;  %v1519_v19 = vadd.f32 %v1502_v32, %v1487_v16  ;;  %v2651_v3 = vmul.f32 0.111703366, %v1423_v33  ;;  %v1382_v40 = vld [vmem:[#allocation3 + $0x8a] ss:$2 sm:$0xff]  ;;  %1111 = vst [vmem:[#allocation3 + $0xa8] sm:$0xff] %v960_v17  ;;  %v1873_v53 = vpop.f32.mrb[12].mxu1  ;;  %v1495_v38 = vadd.f32 %v1487_v16, %v1479_v5 }
 0x204   : > { %v1503_v26 = vmul.f32 0.30364123, %v1423_v33  ;;  %v1297_v28 = vadd.f32 %v1281_v55, %v1233_v43  ;;  %v1345_v21 = vmul.f32 0.23647602, %v1318_v58  ;;  %1114 = vst [vmem:[#allocation3 + $0xd0] sm:$0xff] %v1873_v53  ;;  %v970_v50 = vpop.f32.mrb[13].mxu1 }
 0x205   : > { %v1424_v10 = vadd.f32 %v1408_v59, %v1360_v41  ;;  %v1529_v35 = vadd.f32 %v1519_v19, %v2651_v3  ;;  %1113 = vst [vmem:[#allocation3 + $0xc8] sm:$0xff] %v970_v50  ;;  %v1876_v6 = vpop.f32.mrb[14].mxu1  ;;  %v1409_v20 = vmul.f32 0.111703366, %v1382_v40 }
 0x206   : > { %v1361_v34 = vadd.f32 %v1345_v21, %v1297_v28  ;;  %1116 = vst [vmem:[#allocation3 + $0xf0] sm:$0xff] %v1876_v6  ;;  %v980_v27 = vpop.f32.mrb[15].mxu1  ;;  %v1511_v9 = vadd.f32 %v1503_v26, %v1495_v38 }
 0x207   : > { %v1488_v13 = vmul.f32 0.23647602, %v1424_v10  ;;  %1537 = vst [vmem:[%s2658_s8] sm:$0xff] %v1529_v35  ;;  %1115 = vst [vmem:[#allocation3 + $0xe8] sm:$0xff] %v980_v27  ;;  %v1879_v52 = vpop.f32.mrb[16].mxu1 }
 0x208   : > { %v1425_v25 = vadd.f32 %v1409_v20, %v1361_v34  ;;  %1118 = vst [vmem:[#allocation3 + $0x110] sm:$0xff] %v1879_v52  ;;  %v990_v4 = vpop.f32.mrb[17].mxu1 }
 0x209   : > { %1117 = vst [vmem:[#allocation3 + $0x108] sm:$0xff] %v990_v4  ;;  %v1520_v62 = vadd.f32 %v1511_v9, %v1488_v13  ;;  %v1496_v43 = vadd.f32 %v1488_v13, %v2651_v3 }
 0x20a   : > { %v1882_v11 = vpop.f32.mrb[18].mxu1  ;;  %v2662_v57 = vmul.f32 0.111703366, %v1425_v25  ;;  %v1144_v2 = vld [vmem:[#allocation3 + $0xa6] ss:$2 sm:$0xff] }
 0x20b   : > { %1120 = vst [vmem:[#allocation3 + $0x130] sm:$0xff] %v1882_v11  ;;  %v1170_v22 = vmul.f32 0.111703366, %v1144_v2  ;;  %v1192_v23 = vld [vmem:[#allocation3 + $0xa7] ss:$2 sm:$0xff]  ;;  %v1000_v6 = vpop.f32.mrb[19].mxu1 }
 0x20c   : > { %v1256_v46 = vld [vmem:[#allocation3 + $0xa8] ss:$2 sm:$0xff]  ;;  %v1530_v44 = vadd.f32 %v1520_v62, %v2662_v57  ;;  %v1218_v15 = vmul.f32 0.23647602, %v1192_v23  ;;  %v1320_v63 = vld [vmem:[#allocation3 + $0xa9] ss:$2 sm:$0xff] }
 0x20d   : > { %v1504_v48 = vmul.f32 0.30364123, %v1425_v25  ;;  %v1384_v12 = vld [vmem:[#allocation3 + $0xaa] ss:$2 sm:$0xff]  ;;  %v1282_v61 = vmul.f32 0.30364123, %v1256_v46 }
 0x20e   : > { %v1146_v42 = vld [vmem:[#allocation3 + $0xc6] ss:$2 sm:$0xff]  ;;  %1538 = vst [vmem:[%s2658_s8 + $0x8] sm:$0xff] %v1530_v44  ;;  %v1234_v51 = vadd.f32 %v1218_v15, %v1170_v22  ;;  %v1194_v47 = vld [vmem:[#allocation3 + $0xc7] ss:$2 sm:$0xff]  ;;  %1119 = vst [vmem:[#allocation3 + $0x128] sm:$0xff] %v1000_v6 }
 0x20f   : > { %v1171_v29 = vmul.f32 0.111703366, %v1146_v42  ;;  %v1346_v45 = vmul.f32 0.23647602, %v1320_v63  ;;  %v1219_v56 = vmul.f32 0.23647602, %v1194_v47  ;;  %v1512_v21 = vadd.f32 %v1504_v48, %v1496_v43 }
 0x210   : > { %v1258_v30 = vld [vmem:[#allocation3 + $0xc8] ss:$2 sm:$0xff]  ;;  %v1298_v54 = vadd.f32 %v1282_v61, %v1234_v51  ;;  %v1410_v18 = vmul.f32 0.111703366, %v1384_v12  ;;  %v1322_v60 = vld [vmem:[#allocation3 + $0xc9] ss:$2 sm:$0xff] }
 0x211   : > { %v1386_v14 = vld [vmem:[#allocation3 + $0xca] ss:$2 sm:$0xff]  ;;  %v1235_v7 = vadd.f32 %v1219_v56, %v1171_v29  ;;  %v1283_v24 = vmul.f32 0.30364123, %v1258_v30  ;;  %v1196_v16 = vld [vmem:[#allocation3 + $0xe7] ss:$2 sm:$0xff] }
 0x212   : > { %v1148_v1 = vld [vmem:[#allocation3 + $0xe6] ss:$2 sm:$0xff]  ;;  %v1362_v36 = vadd.f32 %v1346_v45, %v1298_v54  ;;  %v1220_v8 = vmul.f32 0.23647602, %v1196_v16  ;;  %v1347_v31 = vmul.f32 0.23647602, %v1322_v60 }
 0x213   : > { %v1172_v37 = vmul.f32 0.111703366, %v1148_v1  ;;  %v1260_v49 = vld [vmem:[#allocation3 + $0xe8] ss:$2 sm:$0xff]  ;;  %v1299_v39 = vadd.f32 %v1283_v24, %v1235_v7  ;;  %v1411_v0 = vmul.f32 0.111703366, %v1386_v14 }
 0x214   : > { %v1324_v5 = vld [vmem:[#allocation3 + $0xe9] ss:$2 sm:$0xff]  ;;  %v1426_v32 = vadd.f32 %v1410_v18, %v1362_v36  ;;  %v1284_v58 = vmul.f32 0.30364123, %v1260_v49  ;;  %v1388_v41 = vld [vmem:[#allocation3 + $0xea] ss:$2 sm:$0xff] }
 0x215   : > { %v1236_v33 = vadd.f32 %v1220_v8, %v1172_v37  ;;  %v1150_v59 = vld [vmem:[#allocation3 + $0x106] ss:$2 sm:$0xff]  ;;  %v1363_v55 = vadd.f32 %v1347_v31, %v1299_v39  ;;  %v1198_v19 = vld [vmem:[#allocation3 + $0x107] ss:$2 sm:$0xff]  ;;  %v1348_v10 = vmul.f32 0.23647602, %v1324_v5 }
 0x216   : > { %v1173_v17 = vmul.f32 0.111703366, %v1150_v59  ;;  %v1262_v40 = vld [vmem:[#allocation3 + $0x108] ss:$2 sm:$0xff]  ;;  %v1489_v53 = vmul.f32 0.23647602, %v1426_v32 }
 0x217   : > { %v1300_v26 = vadd.f32 %v1284_v58, %v1236_v33  ;;  %v1221_v28 = vmul.f32 0.23647602, %v1198_v19  ;;  %v1427_v50 = vadd.f32 %v1411_v0, %v1363_v55  ;;  %v1326_v35 = vld [vmem:[#allocation3 + $0x109] ss:$2 sm:$0xff]  ;;  %v1412_v34 = vmul.f32 0.111703366, %v1388_v41 }
 0x218   : > { %v1285_v27 = vmul.f32 0.30364123, %v1262_v40  ;;  %v1885_v52 = vpop.f32.mrb[20].mxu1  ;;  %v1521_v9 = vadd.f32 %v1512_v21, %v1489_v53  ;;  %v1390_v13 = vld [vmem:[#allocation3 + $0x10a] ss:$2 sm:$0xff]  ;;  %v1497_v46 = vadd.f32 %v1489_v53, %v2662_v57 }
 0x219   : > { %v1364_v38 = vadd.f32 %v1348_v10, %v1300_v26  ;;  %v1237_v20 = vadd.f32 %v1221_v28, %v1173_v17  ;;  %v2667_v3 = vmul.f32 0.111703366, %v1427_v50  ;;  %1122 = vst [vmem:[#allocation3 + $0x150] sm:$0xff] %v1885_v52  ;;  %v1505_v25 = vmul.f32 0.30364123, %v1427_v50  ;;  %v1010_v2 = vpop.f32.mrb[21].mxu1 }
 0x21a   : > { %v1349_v62 = vmul.f32 0.23647602, %v1326_v35  ;;  %1121 = vst [vmem:[#allocation3 + $0x148] sm:$0xff] %v1010_v2  ;;  %v1888_v23 = vpop.f32.mrb[22].mxu1  ;;  %v1413_v63 = vmul.f32 0.111703366, %v1390_v13 }
 0x21b   : > { %v1428_v4 = vadd.f32 %v1412_v34, %v1364_v38  ;;  %v1301_v11 = vadd.f32 %v1285_v27, %v1237_v20  ;;  %v1531_v22 = vadd.f32 %v1521_v9, %v2667_v3  ;;  %1124 = vst [vmem:[#allocation3 + $0x170] sm:$0xff] %v1888_v23  ;;  %v1020_v48 = vpop.f32.mrb[23].mxu1  ;;  %v1513_v42 = vadd.f32 %v1505_v25, %v1497_v46  ;;  %v1152_v29 = vld [vmem:[#allocation3 + $0x126] ss:$2 sm:$0xff]  ;;  %v1200_v47 = vld [vmem:[#allocation3 + $0x127] ss:$2 sm:$0xff] }
 0x21c   : > { %1123 = vst [vmem:[#allocation3 + $0x168] sm:$0xff] %v1020_v48  ;;  %v1891_v12 = vpop.f32.mrb[24].mxu1  ;;  %v1174_v57 = vmul.f32 0.111703366, %v1152_v29  ;;  %v1264_v30 = vld [vmem:[#allocation3 + $0x128] ss:$2 sm:$0xff] }
 0x21d   : > { %v1490_v44 = vmul.f32 0.23647602, %v1428_v4  ;;  %v1365_v15 = vadd.f32 %v1349_v62, %v1301_v11  ;;  %1539 = vst [vmem:[%s2658_s8 + $0x10] sm:$0xff] %v1531_v22  ;;  %1126 = vst [vmem:[#allocation3 + $0x190] sm:$0xff] %v1891_v12  ;;  %v1030_v61 = vpop.f32.mrb[25].mxu1 }
 0x21e   : > { %1125 = vst [vmem:[#allocation3 + $0x188] sm:$0xff] %v1030_v61  ;;  %v1222_v54 = vmul.f32 0.23647602, %v1200_v47  ;;  %v1328_v18 = vld [vmem:[#allocation3 + $0x129] ss:$2 sm:$0xff]  ;;  %v1894_v22 = vpop.f32.mrb[26].mxu1 }
 0x21f   : > { %v1429_v51 = vadd.f32 %v1413_v63, %v1365_v15  ;;  %v1522_v45 = vadd.f32 %v1513_v42, %v1490_v44  ;;  %v1392_v7 = vld [vmem:[#allocation3 + $0x12a] ss:$2 sm:$0xff]  ;;  %v1286_v16 = vmul.f32 0.30364123, %v1264_v30  ;;  %v1350_v8 = vmul.f32 0.23647602, %v1328_v18 }
 0x220   : > { %v1238_v1 = vadd.f32 %v1222_v54, %v1174_v57  ;;  %v1414_v0 = vmul.f32 0.111703366, %v1392_v7  ;;  %v1498_v38 = vadd.f32 %v1490_v44, %v2667_v3  ;;  %1128 = vst [vmem:[#allocation3 + $0x1b0] sm:$0xff] %v1894_v22  ;;  %v1040_v48 = vpop.f32.mrb[27].mxu1 }
 0x221   : > { %v2672_v56 = vmul.f32 0.111703366, %v1429_v51  ;;  %v1506_v60 = vmul.f32 0.30364123, %v1429_v51  ;;  %v1154_v24 = vld [vmem:[#allocation3 + $0x146] ss:$2 sm:$0xff] }
 0x222   : > { %v1175_v36 = vmul.f32 0.111703366, %v1154_v24  ;;  %v1202_v37 = vld [vmem:[#allocation3 + $0x147] ss:$2 sm:$0xff]  ;;  %v1266_v39 = vld [vmem:[#allocation3 + $0x148] ss:$2 sm:$0xff]  ;;  %v1302_v31 = vadd.f32 %v1286_v16, %v1238_v1 }
 0x223   : > { %v1532_v14 = vadd.f32 %v1522_v45, %v2672_v56  ;;  %v1223_v49 = vmul.f32 0.23647602, %v1202_v37  ;;  %v1330_v5 = vld [vmem:[#allocation3 + $0x149] ss:$2 sm:$0xff]  ;;  %v1394_v32 = vld [vmem:[#allocation3 + $0x14a] ss:$2 sm:$0xff]  ;;  %v1514_v11 = vadd.f32 %v1506_v60, %v1498_v38 }
 0x224   : > { %v1287_v58 = vmul.f32 0.30364123, %v1266_v39  ;;  %v1156_v41 = vld [vmem:[#allocation3 + $0x166] ss:$2 sm:$0xff]  ;;  %v1204_v59 = vld [vmem:[#allocation3 + $0x167] ss:$2 sm:$0xff]  ;;  %v1366_v43 = vadd.f32 %v1350_v8, %v1302_v31 }
 0x225   : > { %1540 = vst [vmem:[%s2658_s8 + $0x18] sm:$0xff] %v1532_v14  ;;  %v1239_v33 = vadd.f32 %v1223_v49, %v1175_v36  ;;  %v1176_v55 = vmul.f32 0.111703366, %v1156_v41  ;;  %v1224_v17 = vmul.f32 0.23647602, %v1204_v59  ;;  %1127 = vst [vmem:[#allocation3 + $0x1a8] sm:$0xff] %v1040_v48 }
 0x226   : > { %v1268_v19 = vld [vmem:[#allocation3 + $0x168] ss:$2 sm:$0xff]  ;;  %v1351_v53 = vmul.f32 0.23647602, %v1330_v5  ;;  %v1415_v26 = vmul.f32 0.111703366, %v1394_v32  ;;  %v1430_v28 = vadd.f32 %v1414_v0, %v1366_v43 }
 0x227   : > { %v1303_v40 = vadd.f32 %v1287_v58, %v1239_v33  ;;  %v1332_v10 = vld [vmem:[#allocation3 + $0x169] ss:$2 sm:$0xff]  ;;  %v1240_v21 = vadd.f32 %v1224_v17, %v1176_v55  ;;  %v1288_v50 = vmul.f32 0.30364123, %v1268_v19  ;;  %v1396_v35 = vld [vmem:[#allocation3 + $0x16a] ss:$2 sm:$0xff] }
 0x228   : > { %v1158_v6 = vld [vmem:[#allocation3 + $0x186] ss:$2 sm:$0xff]  ;;  %v1206_v27 = vld [vmem:[#allocation3 + $0x187] ss:$2 sm:$0xff]  ;;  %v1491_v9 = vmul.f32 0.23647602, %v1430_v28 }
 0x229   : > { %v1367_v34 = vadd.f32 %v1351_v53, %v1303_v40  ;;  %v1177_v20 = vmul.f32 0.111703366, %v1158_v6  ;;  %v1270_v52 = vld [vmem:[#allocation3 + $0x188] ss:$2 sm:$0xff]  ;;  %v1304_v13 = vadd.f32 %v1288_v50, %v1240_v21  ;;  %v1352_v25 = vmul.f32 0.23647602, %v1332_v10 }
 0x22a   : > { %v1225_v4 = vmul.f32 0.23647602, %v1206_v27  ;;  %v1334_v2 = vld [vmem:[#allocation3 + $0x189] ss:$2 sm:$0xff]  ;;  %v1416_v46 = vmul.f32 0.111703366, %v1396_v35  ;;  %v1523_v12 = vadd.f32 %v1514_v11, %v1491_v9  ;;  %v1499_v30 = vadd.f32 %v1491_v9, %v2672_v56 }
 0x22b   : > { %v1431_v62 = vadd.f32 %v1415_v26, %v1367_v34  ;;  %v1368_v23 = vadd.f32 %v1352_v25, %v1304_v13  ;;  %v1289_v63 = vmul.f32 0.30364123, %v1270_v52  ;;  %v1398_v44 = vld [vmem:[#allocation3 + $0x18a] ss:$2 sm:$0xff]  ;;  %v1353_v29 = vmul.f32 0.23647602, %v1334_v2 }
 0x22c   : > { %v1241_v15 = vadd.f32 %v1225_v4, %v1177_v20  ;;  %v1897_v47 = vpop.f32.mrb[28].mxu1  ;;  %v1417_v60 = vmul.f32 0.111703366, %v1398_v44  ;;  %v1160_v37 = vld [vmem:[#allocation3 + $0x1a6] ss:$2 sm:$0xff] }
 0x22d   : > { %v1484_v3 = vmul.f32 0.111703366, %v1431_v62  ;;  %v1507_v42 = vmul.f32 0.30364123, %v1431_v62  ;;  %v1432_v51 = vadd.f32 %v1416_v46, %v1368_v23  ;;  %1130 = vst [vmem:[#allocation3 + $0x1d0] sm:$0xff] %v1897_v47  ;;  %v1050_v57 = vpop.f32.mrb[29].mxu1 }
 0x22e   : > { %v1305_v61 = vadd.f32 %v1289_v63, %v1241_v15  ;;  %1129 = vst [vmem:[#allocation3 + $0x1c8] sm:$0xff] %v1050_v57  ;;  %v1900_v14 = vpop.f32.mrb[30].mxu1  ;;  %v1178_v8 = vmul.f32 0.111703366, %v1160_v37  ;;  %v1208_v49 = vld [vmem:[#allocation3 + $0x1a7] ss:$2 sm:$0xff] }
 0x22f   : > { %v1533_v45 = vadd.f32 %v1523_v12, %v1484_v3  ;;  %v1492_v54 = vmul.f32 0.23647602, %v1432_v51  ;;  %1132 = vst [vmem:[#allocation3 + $0x1f0] sm:$0xff] %v1900_v14  ;;  %v1060_v7 = vpop.f32.mrb[31].mxu1  ;;  %v1515_v24 = vadd.f32 %v1507_v42, %v1499_v30  ;;  %v1272_v39 = vld [vmem:[#allocation3 + $0x1a8] ss:$2 sm:$0xff] }
 0x230   : > { %v1369_v18 = vadd.f32 %v1353_v29, %v1305_v61  ;;  %1131 = vst [vmem:[#allocation3 + $0x1e8] sm:$0xff] %v1060_v7  ;;  %v1226_v56 = vmul.f32 0.23647602, %v1208_v49  ;;  %v1336_v0 = vld [vmem:[#allocation3 + $0x1a9] ss:$2 sm:$0xff] }
 0x231   : > { %1541 = vst [vmem:[%s2658_s8 + $0x20] sm:$0xff] %v1533_v45  ;;  %v1524_v16 = vadd.f32 %v1515_v24, %v1492_v54  ;;  %v1400_v5 = vld [vmem:[#allocation3 + $0x1aa] ss:$2 sm:$0xff]  ;;  %v1290_v58 = vmul.f32 0.30364123, %v1272_v39  ;;  %v1500_v11 = vadd.f32 %v1492_v54, %v1484_v3 }
 0x232   : > { %v1433_v1 = vadd.f32 %v1417_v60, %v1369_v18  ;;  %v1242_v33 = vadd.f32 %v1226_v56, %v1178_v8  ;;  %v1354_v43 = vmul.f32 0.23647602, %v1336_v0  ;;  %v1418_v40 = vmul.f32 0.111703366, %v1400_v5 }
 0x234   : > { %v1485_v36 = vmul.f32 0.111703366, %v1433_v1  ;;  %v1306_v19 = vadd.f32 %v1290_v58, %v1242_v33  ;;  %v1508_v20 = vmul.f32 0.30364123, %v1433_v1 }
 0x235   : > { %v1162_v32 = vld [vmem:[#allocation3 + $0x1c6] ss:$2 sm:$0xff]  ;;  %v1210_v59 = vld [vmem:[#allocation3 + $0x1c7] ss:$2 sm:$0xff] }
 0x236   : > { %v1534_v31 = vadd.f32 %v1524_v16, %v1485_v36  ;;  %v1179_v41 = vmul.f32 0.111703366, %v1162_v32  ;;  %v1227_v55 = vmul.f32 0.23647602, %v1210_v59  ;;  %v1274_v17 = vld [vmem:[#allocation3 + $0x1c8] ss:$2 sm:$0xff]  ;;  %v1370_v35 = vadd.f32 %v1354_v43, %v1306_v19 }
 0x237   : > { %v1291_v53 = vmul.f32 0.30364123, %v1274_v17  ;;  %v1338_v26 = vld [vmem:[#allocation3 + $0x1c9] ss:$2 sm:$0xff]  ;;  %v1402_v28 = vld [vmem:[#allocation3 + $0x1ca] ss:$2 sm:$0xff]  ;;  %v1516_v63 = vadd.f32 %v1508_v20, %v1500_v11 }
 0x238   : > { %1542 = vst [vmem:[%s2658_s8 + $0x28] sm:$0xff] %v1534_v31  ;;  %v1243_v10 = vadd.f32 %v1227_v55, %v1179_v41  ;;  %v1164_v21 = vld [vmem:[#allocation3 + $0x1e6] ss:$2 sm:$0xff]  ;;  %v1212_v50 = vld [vmem:[#allocation3 + $0x1e7] ss:$2 sm:$0xff]  ;;  %v1434_v13 = vadd.f32 %v1418_v40, %v1370_v35 }
 0x239   : > { %v1180_v6 = vmul.f32 0.111703366, %v1164_v21  ;;  %v1228_v38 = vmul.f32 0.23647602, %v1212_v50  ;;  %v1276_v34 = vld [vmem:[#allocation3 + $0x1e8] ss:$2 sm:$0xff] }
 0x23a   : > { %v1307_v27 = vadd.f32 %v1291_v53, %v1243_v10  ;;  %v1355_v52 = vmul.f32 0.23647602, %v1338_v26  ;;  %v1340_v9 = vld [vmem:[#allocation3 + $0x1e9] ss:$2 sm:$0xff]  ;;  %v1292_v4 = vmul.f32 0.30364123, %v1276_v34 }
 0x23b   : > { %v1244_v25 = vadd.f32 %v1228_v38, %v1180_v6  ;;  %v1419_v2 = vmul.f32 0.111703366, %v1402_v28  ;;  %v1404_v22 = vld [vmem:[#allocation3 + $0x1ea] ss:$2 sm:$0xff]  ;;  %v1493_v23 = vmul.f32 0.23647602, %v1434_v13 }
 0x23c   : > { %v1371_v62 = vadd.f32 %v1355_v52, %v1307_v27  ;;  %v1356_v15 = vmul.f32 0.23647602, %v1340_v9  ;;  %v1420_v44 = vmul.f32 0.111703366, %v1404_v22 }
 0x23d   : > { %v1308_v46 = vadd.f32 %v1292_v4, %v1244_v25  ;;  %v1525_v42 = vadd.f32 %v1516_v63, %v1493_v23  ;;  %v1501_v29 = vadd.f32 %v1493_v23, %v1485_v36 }
 0x23e   : > { %v1435_v48 = vadd.f32 %v1419_v2, %v1371_v62 }
 0x23f   : > { %v1372_v12 = vadd.f32 %v1356_v15, %v1308_v46 }
 0x240   : > { %v1509_v51 = vmul.f32 0.30364123, %v1435_v48  ;;  %v1527_v61 = vmul.f32 0.111703366, %v1435_v48 }
 0x241   : > { %v1436_v47 = vadd.f32 %v1420_v44, %v1372_v12 }
 0x242   : > { %v1535_v45 = vadd.f32 %v1527_v61, %v1525_v42  ;;  %v1517_v57 = vadd.f32 %v1509_v51, %v1501_v29 }
 0x243   : > { %v1518_v3 = vmul.f32 0.23647602, %v1436_v47 }
 0x244   : > { %1543 = vst [vmem:[%s2658_s8 + $0x30] sm:$0xff] %v1535_v45 }
 0x245   : > { %v1526_v30 = vadd.f32 %v1518_v3, %v1517_v57 }
 0x247   : > { %1544 = vst [vmem:[%s2658_s8 + $0x38] sm:$0xff] %v1526_v30 }
 0x248 PF: > { %s13_s12 = sadd.s32 1, %s2108_s12  }
 0x249   : > { %p10_p4 = scmp.ge.s32.totalorder %s13_s12, 4  }
 0x24b   :  { %12 = sbr.rel (!%p10_p4) target bundleno = 1 (0x1), region = 144 }

// kernel: ckn_sequential_forward.3
= control target key start
LH: loop header
LB: loop body
LE: loop exit
PB: predicated region body
PF: predicated region fallthrough
CT: control target
= control target key end

     0   :  { %s1127_s12 = smov 0   ;;  %s1417_s0 = inlined_call_operand.vmem [shape: f32[2,8,8,256], index: 0, kind: input, shape index: {}]   ;;  %s1418_s1 = inlined_call_operand.vmem [shape: f32[1,256,128], index: 1, kind: input, shape index: {}]   ;;  %s1419_s2 = inlined_call_operand.vmem [shape: f32[128,128], index: 2, kind: input, shape index: {}]   ;;  %s1420_s3 = inlined_call_operand.vmem [shape: f32[2,4,4,128], index: 3, kind: output, shape index: {}]  }
   0x1 LB: > { %s848_s13 = sadd.s32 4294967295, %s1104_s12   ;;  %p852_p0 = scmp.ge.s32.totalorder %s1104_s12, 1  ;;  %s1104_s12 = sphi %s1127_s12, %s13_s12  }
   0x2   : > { %p137_p1 = scmp.lt.s32.totalorder %s1104_s12, 3 }
   0x4   : > { %p138_p2 = pnand %p852_p0, %p137_p1 }
   0x5   : > { %v203_v0 = vld [vmem:[%s1418_s1 + $0x80] sm:$0xff] (!%p138_p2)  ;;  %v204_v1 = vld [vmem:[%s1418_s1 + $0x88] sm:$0xff] (!%p138_p2)  ;;  %p161_p3 = scmp.lt.s32.totalorder (!%p138_p2), %s848_s13, 1  ;;  %v205_v5 = vld [vmem:[%s1418_s1 + $0x90] sm:$0xff] (!%p138_p2) }
   0x6   : > { %141 = sbr.rel (%p138_p2) target bundleno = 568 (0x238), region = 32  ;;  %v187_v2 = vld [vmem:[%s1418_s1] sm:$0xff] (!%p138_p2)  ;;  %v993_v3 = vpack.c.bf16 (!%p138_p2), %v204_v1, %v203_v0  ;;  %v188_v4 = vld [vmem:[%s1418_s1 + $0x8] sm:$0xff] (!%p138_p2)  ;;  %v206_v6 = vld [vmem:[%s1418_s1 + $0x98] sm:$0xff] (!%p138_p2) }
   0x7   : > { %v995_v7 = vpack.c.bf16 (!%p138_p2), %v188_v4, %v187_v2  ;;  %v997_v8 = vpack.c.bf16 (!%p138_p2), %v206_v6, %v205_v5  ;;  %v189_v9 = vld [vmem:[%s1418_s1 + $0x10] sm:$0xff] (!%p138_p2)  ;;  %v190_v10 = vld [vmem:[%s1418_s1 + $0x18] sm:$0xff] (!%p138_p2)  ;;  %v207_v11 = vld [vmem:[%s1418_s1 + $0xa0] sm:$0xff] (!%p138_p2) }
   0x8   : > { %994 = vmatprep.subr.bf16.mxu0 (!%p138_p2), %v993_v3  ;;  %v208_v12 = vld [vmem:[%s1418_s1 + $0xa8] sm:$0xff] (!%p138_p2)  ;;  %v999_v13 = vpack.c.bf16 (!%p138_p2), %v190_v10, %v189_v9  ;;  %v191_v15 = vld [vmem:[%s1418_s1 + $0x20] sm:$0xff] (!%p138_p2)  ;;  %v209_v17 = vld [vmem:[%s1418_s1 + $0xb0] sm:$0xff] (!%p138_p2) }
   0x9   : > { %996 = vmatpush3.bf16.msra.mxu0 (!%p138_p2), %v995_v7  ;;  %v1001_v14 = vpack.c.bf16 (!%p138_p2), %v208_v12, %v207_v11  ;;  %v192_v16 = vld [vmem:[%s1418_s1 + $0x28] sm:$0xff] (!%p138_p2)  ;;  %v210_v18 = vld [vmem:[%s1418_s1 + $0xb8] sm:$0xff] (!%p138_p2)  ;;  %v193_v21 = vld [vmem:[%s1418_s1 + $0x30] sm:$0xff] (!%p138_p2) }
   0xa   : > { %998 = vmatprep.subr.bf16.mxu0 (!%p138_p2), %v997_v8  ;;  %v1003_v19 = vpack.c.bf16 (!%p138_p2), %v192_v16, %v191_v15  ;;  %v1005_v20 = vpack.c.bf16 (!%p138_p2), %v210_v18, %v209_v17  ;;  %v194_v22 = vld [vmem:[%s1418_s1 + $0x38] sm:$0xff] (!%p138_p2)  ;;  %v211_v23 = vld [vmem:[%s1418_s1 + $0xc0] sm:$0xff] (!%p138_p2)  ;;  %v212_v24 = vld [vmem:[%s1418_s1 + $0xc8] sm:$0xff] (!%p138_p2) }
   0xb   : > { %v195_v25 = vld [vmem:[%s1418_s1 + $0x40] sm:$0xff] (!%p138_p2)  ;;  %v1007_v31 = vpack.c.bf16 (!%p138_p2), %v194_v22, %v193_v21  ;;  %v196_v32 = vld [vmem:[%s1418_s1 + $0x48] sm:$0xff] (!%p138_p2)  ;;  %v1009_v38 = vpack.c.bf16 (!%p138_p2), %v212_v24, %v211_v23  ;;  %v213_v39 = vld [vmem:[%s1418_s1 + $0xd0] sm:$0xff] (!%p138_p2) }
   0xc   : > { %v214_v42 = vld [vmem:[%s1418_s1 + $0xd8] sm:$0xff] (!%p138_p2)  ;;  %v1011_v46 = vpack.c.bf16 (!%p138_p2), %v196_v32, %v195_v25  ;;  %v197_v51 = vld [vmem:[%s1418_s1 + $0x50] sm:$0xff] (!%p138_p2)  ;;  %v215_v57 = vld [vmem:[%s1418_s1 + $0xe0] sm:$0xff] (!%p138_p2) }
   0xd   : > { %s1422_s13 = smov (!%p161_p3, %s848_s13), 1  ;;  %1000 = vmatpush3.bf16.msra.mxu0 %v999_v13  ;;  %v198_v52 = vld [vmem:[%s1418_s1 + $0x58] sm:$0xff]  ;;  %v1013_v56 = vpack.c.bf16 %v214_v42, %v213_v39  ;;  %v216_v59 = vld [vmem:[%s1418_s1 + $0xe8] sm:$0xff]  ;;  %v199_v8 = vld [vmem:[%s1418_s1 + $0x60] sm:$0xff] }
   0xe   : > { %s867_s7 = sshll.u32 %s1422_s13, 7  ;;  %1002 = vmatprep.subr.bf16.mxu0 %v1001_v14  ;;  %v1015_v62 = vpack.c.bf16 %v198_v52, %v197_v51  ;;  %v1017_v7 = vpack.c.bf16 %v216_v59, %v215_v57  ;;  %v200_v9 = vld [vmem:[%s1418_s1 + $0x68] sm:$0xff]  ;;  %v217_v10 = vld [vmem:[%s1418_s1 + $0xf0] sm:$0xff]  ;;  %v218_v11 = vld [vmem:[%s1418_s1 + $0xf8] sm:$0xff]  ;;  %s868_s14 = sshll.u32 %s1422_s13, 4 }
   0xf   : > { %s1183_s20 = scalar_lea.vmem %s1417_s0, %s867_s7  ;;  %v1019_v17 = vpack.c.bf16 %v200_v9, %v199_v8  ;;  %v202_v21 = vld [vmem:[%s1418_s1 + $0x78] sm:$0xff]  ;;  %v436_v24 = vld [vmem:[%s1419_s2] sm:$0xff]  ;;  %v437_v25 = vld [vmem:[%s1419_s2 + $0x8] sm:$0xff]  ;;  %s1408_s17 = scalar_lea.vmem %s1420_s3, %s868_s14 }
  0x10   : > { %v172_v26 = vld [vmem:[%s1183_s20 + $0x8] sm:$0xff]  ;;  %v1202_v28 = vld [vmem:[%s1183_s20] sm:$0xff]  ;;  %v1205_v29 = vld [vmem:[%s1183_s20 + $0x18] sm:$0xff] }
  0x11   : > { %283 = vmatprep.mubr.f32.mxu0 %v172_v26  ;;  %v325_v27 = vmul.f32 %v172_v26, %v172_v26  ;;  %v1208_v30 = vld [vmem:[%s1183_s20 + $0x10] sm:$0xff]  ;;  %1004 = vmatpush3.bf16.msra.mxu0 %v1003_v19  ;;  %v327_v33 = vmul.f32 %v1205_v29, %v1205_v29  ;;  %v1218_v35 = vld [vmem:[%s1183_s20 + $0x28] sm:$0xff]  ;;  %v1221_v36 = vld [vmem:[%s1183_s20 + $0x20] sm:$0xff]  ;;  %v324_v37 = vmul.f32 %v1202_v28, %v1202_v28 }
  0x12   : > { %v326_v34 = vmul.f32 %v1208_v30, %v1208_v30  ;;  %1006 = vmatprep.subr.bf16.mxu0 %v1005_v20  ;;  %v328_v40 = vmul.f32 %v1221_v36, %v1221_v36  ;;  %v329_v41 = vmul.f32 %v1218_v35, %v1218_v35  ;;  %v1236_v43 = vld [vmem:[%s1183_s20 + $0x38] sm:$0xff]  ;;  %v1239_v44 = vld [vmem:[%s1183_s20 + $0x30] sm:$0xff]  ;;  %v1246_v49 = vld [vmem:[%s1183_s20 + $0x48] sm:$0xff]  ;;  %v1021_v19 = vpack.c.bf16 %v218_v11, %v217_v10 }
  0x13   : > { %v340_v45 = vadd.f32 %v325_v27, %v324_v37  ;;  %v331_v47 = vmul.f32 %v1236_v43, %v1236_v43  ;;  %v330_v48 = vmul.f32 %v1239_v44, %v1239_v44  ;;  %v1249_v50 = vld [vmem:[%s1183_s20 + $0x40] sm:$0xff]  ;;  %v333_v53 = vmul.f32 %v1246_v49, %v1246_v49  ;;  %v182_v60 = vld [vmem:[%s1183_s20 + $0x58] sm:$0xff]  ;;  %v181_v61 = vld [vmem:[%s1183_s20 + $0x50] sm:$0xff] }
  0x14   : > { %v332_v54 = vmul.f32 %v1249_v50, %v1249_v50  ;;  %v343_v55 = vadd.f32 %v327_v33, %v326_v34  ;;  %v346_v58 = vadd.f32 %v329_v41, %v328_v40  ;;  %v335_v63 = vmul.f32 %v182_v60, %v182_v60  ;;  %v184_v1 = vld [vmem:[%s1183_s20 + $0x68] sm:$0xff]  ;;  %v183_v2 = vld [vmem:[%s1183_s20 + $0x60] sm:$0xff]  ;;  %v186_v12 = vld [vmem:[%s1183_s20 + $0x78] sm:$0xff] }
  0x15   : > { %1008 = vmatpush3.bf16.msra.mxu0 %v1007_v31  ;;  %341 = vadd.xlane.f32.xlu0 %v340_v45  ;;  %v334_v0 = vmul.f32 %v181_v61, %v181_v61  ;;  %v349_v3 = vadd.f32 %v331_v47, %v330_v48  ;;  %v337_v4 = vmul.f32 %v184_v1, %v184_v1  ;;  %v185_v13 = vld [vmem:[%s1183_s20 + $0x70] sm:$0xff]  ;;  %v441_v31 = vld [vmem:[%s1419_s2 + $0x28] sm:$0xff]  ;;  %v443_v34 = vld [vmem:[%s1419_s2 + $0x38] sm:$0xff] }
  0x16   : > { %1010 = vmatprep.subr.bf16.mxu0 %v1009_v38  ;;  %347 = vadd.xlane.f32.xlu1 %v346_v58  ;;  %v336_v5 = vmul.f32 %v183_v2, %v183_v2  ;;  %v352_v6 = vadd.f32 %v333_v53, %v332_v54  ;;  %v339_v14 = vmul.f32 %v186_v12, %v186_v12  ;;  %v201_v20 = vld [vmem:[%s1418_s1 + $0x70] sm:$0xff]  ;;  %v445_v37 = vld [vmem:[%s1419_s2 + $0x48] sm:$0xff]  ;;  %v447_v40 = vld [vmem:[%s1419_s2 + $0x58] sm:$0xff] }
  0x17   : > { %v338_v15 = vmul.f32 %v185_v13, %v185_v13  ;;  %v355_v16 = vadd.f32 %v335_v63, %v334_v0  ;;  %v1023_v23 = vpack.c.bf16 %v202_v21, %v201_v20  ;;  %v1025_v26 = vpack.c.bf16 %v437_v25, %v436_v24  ;;  %v438_v27 = vld [vmem:[%s1419_s2 + $0x10] sm:$0xff]  ;;  %v448_v42 = vld [vmem:[%s1419_s2 + $0x60] sm:$0xff] }
  0x18   : > { %v358_v18 = vadd.f32 %v337_v4, %v336_v5  ;;  %v442_v33 = vld [vmem:[%s1419_s2 + $0x30] sm:$0xff] }
  0x19   : > { %1012 = vmatpush3.bf16.msra.mxu0 %v1011_v46  ;;  %344 = vadd.xlane.f32.xlu0 %v343_v55  ;;  %v361_v22 = vadd.f32 %v339_v14, %v338_v15  ;;  %v446_v39 = vld [vmem:[%s1419_s2 + $0x50] sm:$0xff]  ;;  %v451_v46 = vld [vmem:[%s1419_s2 + $0x78] sm:$0xff] }
  0x1a   : > { %1014 = vmatprep.subr.bf16.mxu0 %v1013_v56  ;;  %350 = vadd.xlane.f32.xlu1 %v349_v3  ;;  %v1045_v41 = vpack.c.bf16 %v447_v40, %v446_v39  ;;  %v450_v45 = vld [vmem:[%s1419_s2 + $0x70] sm:$0xff] }
  0x1b   : > { %1026 = vmatprep.subr.bf16.mxu1 %v1025_v26  ;;  %v1053_v47 = vpack.c.bf16 %v451_v46, %v450_v45 }
  0x1c   : > { %1028 = vmatpush3.bf16.msra.mxu1 %v1025_v26 }
  0x1d   : > { %1016 = vmatpush3.bf16.msra.mxu0 %v1015_v62  ;;  %353 = vadd.xlane.f32.xlu0 %v352_v6 }
  0x1e   : > { %1018 = vmatprep.subr.bf16.mxu0 %v1017_v7  ;;  %356 = vadd.xlane.f32.xlu1 %v355_v16 }
  0x21   : > { %1020 = vmatpush3.bf16.msra.mxu0 %v1019_v17  ;;  %359 = vadd.xlane.f32.xlu0 %v358_v18 }
  0x22   : > { %1022 = vmatprep.subr.bf16.mxu0 %v1021_v19  ;;  %362 = vadd.xlane.f32.xlu1 %v361_v22 }
  0x25   : > { %1024 = vmatpush3.bf16.msra.mxu0 %v1023_v23 }
  0x28   : > { %284 = vmatmul.mubr.f32.vlgmr.msra.gmra.mrb[0].mxu0 %v1202_v28  ;;  %v439_v28 = vld [vmem:[%s1419_s2 + $0x18] sm:$0xff] }
  0x29   : > { %288 = vmatprep.mubr.f32.mxu0 %v1205_v29  ;;  %v1029_v29 = vpack.c.bf16 %v439_v28, %v438_v27 }
  0x2b   : > { %1030 = vmatprep.subr.bf16.mxu1 %v1029_v29 }
  0x2c   : > { %289 = vmatmul.mubr.f32.gmra.mrb[2].mxu0 %v1208_v30  ;;  %1032 = vmatpush3.bf16.msra.mxu1 %v1029_v29  ;;  %v440_v30 = vld [vmem:[%s1419_s2 + $0x20] sm:$0xff] }
  0x2d   : > { %293 = vmatprep.mubr.f32.mxu0 %v1218_v35  ;;  %v1033_v32 = vpack.c.bf16 %v441_v31, %v440_v30  ;;  %v1037_v35 = vpack.c.bf16 %v443_v34, %v442_v33 }
  0x2f   : > { %1034 = vmatprep.subr.bf16.mxu1 %v1033_v32 }
  0x30   : > { %294 = vmatmul.mubr.f32.gmra.mrb[4].mxu0 %v1221_v36  ;;  %1036 = vmatpush3.bf16.msra.mxu1 %v1033_v32  ;;  %v444_v36 = vld [vmem:[%s1419_s2 + $0x40] sm:$0xff] }
  0x31   : > { %298 = vmatprep.mubr.f32.mxu0 %v1236_v43  ;;  %1038 = vmatprep.subr.bf16.mxu1 %v1037_v35  ;;  %v1041_v38 = vpack.c.bf16 %v445_v37, %v444_v36  ;;  %v449_v43 = vld [vmem:[%s1419_s2 + $0x68] sm:$0xff] }
  0x34   : > { %299 = vmatmul.mubr.f32.gmra.mrb[6].mxu0 %v1239_v44  ;;  %1040 = vmatpush3.bf16.msra.mxu1 %v1037_v35  ;;  %v1049_v44 = vpack.c.bf16 %v449_v43, %v448_v42 }
  0x35   : > { %303 = vmatprep.mubr.f32.mxu0 %v1246_v49  ;;  %1042 = vmatprep.subr.bf16.mxu1 %v1041_v38 }
  0x38   : > { %304 = vmatmul.mubr.f32.gmra.mrb[8].mxu0 %v1249_v50  ;;  %1044 = vmatpush3.bf16.msra.mxu1 %v1041_v38 }
  0x39   : > { %308 = vmatprep.mubr.f32.mxu0 %v182_v60  ;;  %1046 = vmatprep.subr.bf16.mxu1 %v1045_v41 }
  0x3c   : > { %309 = vmatmul.mubr.f32.gmra.mrb[10].mxu0 %v181_v61  ;;  %1048 = vmatpush3.bf16.msra.mxu1 %v1045_v41 }
  0x3d   : > { %313 = vmatprep.mubr.f32.mxu0 %v184_v1  ;;  %1050 = vmatprep.subr.bf16.mxu1 %v1049_v44 }
  0x40   : > { %314 = vmatmul.mubr.f32.gmra.mrb[12].mxu0 %v183_v2  ;;  %1052 = vmatpush3.bf16.msra.mxu1 %v1049_v44 }
  0x41   : > { %318 = vmatprep.mubr.f32.mxu0 %v186_v12  ;;  %1054 = vmatprep.subr.bf16.mxu1 %v1053_v47 }
  0x44   : > { %319 = vmatmul.mubr.f32.gmra.mrb[14].mxu0 %v185_v13  ;;  %1056 = vmatpush3.bf16.msra.mxu1 %v1053_v47 }
  0xa2   : > { %v1348_v48 = vpop.xlane.xlu0 %341 }
  0xa3   : > { %v364_v49 = vmax.f32 %v1348_v48, 1e-08  ;;  %v1356_v52 = vpop.xlane.xlu1 %347 }
  0xa4   : > { %v366_v53 = vmax.f32 %v1356_v52, 1e-08 }
  0xa5   : > { %1066 = vrsqrt.f32 %v364_v49 }
  0xa6   : > { %v1351_v50 = vpop.xlane.xlu0 %344 }
  0xa7   : > { %v365_v51 = vmax.f32 %v1351_v50, 1e-08  ;;  %v1361_v54 = vpop.xlane.xlu1 %350 }
  0xa8   : > { %v367_v57 = vmax.f32 %v1361_v54, 1e-08 }
  0xa9   : > { %1068 = vrsqrt.f32 %v365_v51 }
  0xaa   : > { %1070 = vrsqrt.f32 %v366_v53  ;;  %v1366_v60 = vpop.xlane.xlu0 %353 }
  0xab   : > { %1072 = vrsqrt.f32 %v367_v57  ;;  %v368_v0 = vmax.f32 %v1366_v60, 1e-08  ;;  %v1371_v3 = vpop.xlane.xlu1 %356 }
  0xac   : > { %v369_v8 = vmax.f32 %v1371_v3, 1e-08 }
  0xad   : > { %1074 = vrsqrt.f32 %v368_v0 }
  0xae   : > { %v1376_v12 = vpop.xlane.xlu0 %359 }
  0xaf   : > { %v1067_v56 = vpop.eup %1066  ;;  %v370_v18 = vmax.f32 %v1376_v12, 1e-08  ;;  %v1381_v21 = vpop.xlane.xlu1 %362 }
  0xb0   : > { %v371_v28 = vmax.f32 %v1381_v21, 1e-08  ;;  %v380_v38 = vmul.f32 %v1067_v56, %v364_v49 }
  0xb3   : > { %v1069_v63 = vpop.eup %1068 }
  0xb4   : > { %v1071_v14 = vpop.eup %1070 }
  0xb5   : > { %v1073_v24 = vpop.eup %1072 }
  0xb7   : > { %v1075_v33 = vpop.eup %1074 }
  0xfb   : > { %v901_v55 = vpop.f32.mrb[0].mxu0 }
  0xfc   : > { %v902_v58 = vpop.f32.mrb[1].mxu0 }
  0xfd   : > { %v903_v59 = vadd.f32 %v902_v58, %v901_v55  ;;  %v381_v55 = vmul.f32 %v1069_v63, %v365_v51 }
  0xff   : > { %v388_v61 = vmul.f32 %v1067_v56, %v903_v59  ;;  %v904_v62 = vpop.f32.mrb[2].mxu0 }
 0x100   : > { %v905_v1 = vpop.f32.mrb[3].mxu0 }
 0x101   : > { %v857_v2 = vadd.f32 -1.0, %v388_v61  ;;  %v906_v4 = vadd.f32 %v905_v1, %v904_v62 }
 0x103   : > { %v404_v5 = vmul.f32 4.0, %v857_v2  ;;  %v389_v6 = vmul.f32 %v1069_v63, %v906_v4  ;;  %v907_v7 = vpop.f32.mrb[4].mxu0 }
 0x104   : > { %v908_v9 = vpop.f32.mrb[5].mxu0 }
 0x105   : > { %v412_v10 = vmul.f32 1.442695, %v404_v5  ;;  %v858_v11 = vadd.f32 -1.0, %v389_v6  ;;  %v909_v13 = vadd.f32 %v908_v9, %v907_v7  ;;  %v382_v5 = vmul.f32 %v1071_v14, %v366_v53 }
 0x107   : > { %1076 = vpow2.f32 %v412_v10  ;;  %v405_v15 = vmul.f32 4.0, %v858_v11  ;;  %v390_v16 = vmul.f32 %v1071_v14, %v909_v13  ;;  %v910_v17 = vpop.f32.mrb[6].mxu0  ;;  %v384_v14 = vmul.f32 %v1075_v33, %v368_v0 }
 0x108   : > { %1078 = vrsqrt.f32 %v369_v8  ;;  %v911_v19 = vpop.f32.mrb[7].mxu0 }
 0x109   : > { %v414_v20 = vmul.f32 1.442695, %v405_v15  ;;  %v859_v22 = vadd.f32 -1.0, %v390_v16  ;;  %v912_v23 = vadd.f32 %v911_v19, %v910_v17  ;;  %v383_v15 = vmul.f32 %v1073_v24, %v367_v57 }
 0x10b   : > { %1080 = vpow2.f32 %v414_v20  ;;  %v406_v25 = vmul.f32 4.0, %v859_v22  ;;  %v391_v26 = vmul.f32 %v1073_v24, %v912_v23  ;;  %v913_v27 = vpop.f32.mrb[8].mxu0 }
 0x10c   : > { %1082 = vrsqrt.f32 %v370_v18  ;;  %v914_v29 = vpop.f32.mrb[9].mxu0 }
 0x10d   : > { %v416_v30 = vmul.f32 1.442695, %v406_v25  ;;  %v860_v31 = vadd.f32 -1.0, %v391_v26  ;;  %v915_v32 = vadd.f32 %v914_v29, %v913_v27 }
 0x10f   : > { %1084 = vpow2.f32 %v416_v30  ;;  %v407_v34 = vmul.f32 4.0, %v860_v31  ;;  %v392_v35 = vmul.f32 %v1075_v33, %v915_v32  ;;  %v916_v36 = vpop.f32.mrb[10].mxu0  ;;  %v1106_v30 = vmov 0.0  }
 0x110   : > { %1086 = vrsqrt.f32 %v371_v28  ;;  %v917_v37 = vpop.f32.mrb[11].mxu0  ;;  %558 = vst [vmem:[#allocation3 + $0x1e] sm:$0x3] %v1106_v30  ;;  %566 = vst [vmem:[#allocation3 + $0x28] sm:$0x3] %v1106_v30 }
 0x111   : > { %v1077_v39 = vpop.eup %1076  ;;  %v418_v40 = vmul.f32 1.442695, %v407_v34  ;;  %v861_v41 = vadd.f32 -1.0, %v392_v35  ;;  %v918_v42 = vadd.f32 %v917_v37, %v916_v36  ;;  %557 = vst [vmem:[#allocation3 + $0x6] sm:$0x3] %v1106_v30 }
 0x112   : > { %v1079_v43 = vpop.eup %1078  ;;  %v428_v44 = vmul.f32 %v1077_v39, %v380_v38  ;;  %559 = vst [vmem:[#allocation3 + $0x36] sm:$0x3] %v1106_v30  ;;  %560 = vst [vmem:[#allocation3 + $0x4e] sm:$0x3] %v1106_v30 }
 0x113   : > { %1088 = vpow2.f32 %v418_v40  ;;  %v408_v45 = vmul.f32 4.0, %v861_v41  ;;  %v393_v46 = vmul.f32 %v1079_v43, %v918_v42  ;;  %v919_v47 = vpop.f32.mrb[12].mxu0  ;;  %v385_v25 = vmul.f32 %v1079_v43, %v369_v8  ;;  %561 = vst [vmem:[#allocation3 + $0x66] sm:$0x3] %v1106_v30  ;;  %562 = vst [vmem:[#allocation3 + $0x7e] sm:$0x3] %v1106_v30 }
 0x114   : > { %v920_v58 = vpop.f32.mrb[13].mxu0  ;;  %981 = vmatprep.mubr.f32.mxu1 %v428_v44  ;;  %563 = vst [vmem:[#allocation3 + $0x96] sm:$0x3] %v1106_v30  ;;  %564 = vst [vmem:[#allocation3 + $0xae] sm:$0x3] %v1106_v30 }
 0x115   : > { %v1081_v59 = vpop.eup %1080  ;;  %v420_v61 = vmul.f32 1.442695, %v408_v45  ;;  %v862_v62 = vadd.f32 -1.0, %v393_v46  ;;  %v921_v48 = vadd.f32 %v920_v58, %v919_v47  ;;  %565 = vst [vmem:[#allocation3 + $0x10] sm:$0x3] %v1106_v30 }
 0x116   : > { %v1083_v49 = vpop.eup %1082  ;;  %v429_v56 = vmul.f32 %v1081_v59, %v381_v55  ;;  %567 = vst [vmem:[#allocation3 + $0x40] sm:$0x3] %v1106_v30  ;;  %568 = vst [vmem:[#allocation3 + $0x58] sm:$0x3] %v1106_v30 }
 0x117   : > { %1090 = vpow2.f32 %v420_v61  ;;  %v409_v1 = vmul.f32 4.0, %v862_v62  ;;  %v394_v2 = vmul.f32 %v1083_v49, %v921_v48  ;;  %v922_v4 = vpop.f32.mrb[14].mxu0  ;;  %v386_v24 = vmul.f32 %v1083_v49, %v370_v18  ;;  %569 = vst [vmem:[#allocation3 + $0x70] sm:$0x3] %v1106_v30  ;;  %570 = vst [vmem:[#allocation3 + $0x88] sm:$0x3] %v1106_v30 }
 0x118   : > { %v923_v6 = vpop.f32.mrb[15].mxu0  ;;  %982 = vmatmul.mubr.f32.vlgmr.msra.gmra.mrb[0].mxu1 %v429_v56  ;;  %571 = vst [vmem:[#allocation3 + $0xa0] sm:$0x3] %v1106_v30  ;;  %572 = vst [vmem:[#allocation3 + $0xb8] sm:$0x3] %v1106_v30 }
 0x119   : > { %v1085_v7 = vpop.eup %1084  ;;  %v422_v50 = vmul.f32 1.442695, %v409_v1  ;;  %v863_v51 = vadd.f32 -1.0, %v394_v2  ;;  %v924_v63 = vadd.f32 %v923_v6, %v922_v4  ;;  %733 = vst [vmem:[#allocation4] sm:$0xf] %v1106_v30 }
 0x11a   : > { %v1087_v9 = vpop.eup %1086  ;;  %v430_v10 = vmul.f32 %v1085_v7, %v382_v5  ;;  %734 = vst [vmem:[#allocation4 + $0x4] sm:$0xf] %v1106_v30  ;;  %736 = vst [vmem:[#allocation4 + $0x28] sm:$0xf] %v1106_v30 }
 0x11b   : > { %1092 = vpow2.f32 %v422_v50  ;;  %v410_v11 = vmul.f32 4.0, %v863_v51  ;;  %v395_v13 = vmul.f32 %v1087_v9, %v924_v63  ;;  %v387_v60 = vmul.f32 %v1087_v9, %v371_v28 }
 0x11c   : > { %984 = vmatprep.mubr.f32.mxu1 %v430_v10 }
 0x11d   : > { %v1089_v16 = vpop.eup %1088  ;;  %v424_v17 = vmul.f32 1.442695, %v410_v11  ;;  %v864_v19 = vadd.f32 -1.0, %v395_v13 }
 0x11e   : > { %v431_v52 = vmul.f32 %v1089_v16, %v383_v15 }
 0x11f   : > { %1094 = vpow2.f32 %v424_v17  ;;  %v411_v53 = vmul.f32 4.0, %v864_v19 }
 0x120   : > { %985 = vmatmul.mubr.f32.gmra.mrb[2].mxu1 %v431_v52 }
 0x121   : > { %v1091_v20 = vpop.eup %1090  ;;  %v426_v22 = vmul.f32 1.442695, %v411_v53 }
 0x122   : > { %v432_v23 = vmul.f32 %v1091_v20, %v384_v14 }
 0x123   : > { %1096 = vpow2.f32 %v426_v22 }
 0x124   : > { %987 = vmatprep.mubr.f32.mxu1 %v432_v23  ;;  %v747_v23 = vld [vmem:[#allocation4] sm:$0xf] }
 0x125   : > { %v1093_v54 = vpop.eup %1092 }
 0x126   : > { %v433_v57 = vmul.f32 %v1093_v54, %v385_v25 }
 0x128   : > { %988 = vmatmul.mubr.f32.gmra.mrb[4].mxu1 %v433_v57  ;;  %v748_v57 = vld [vmem:[#allocation4 + $0x4] sm:$0xf] }
 0x129   : > { %v1095_v26 = vpop.eup %1094 }
 0x12a   : > { %v434_v27 = vmul.f32 %v1095_v26, %v386_v24 }
 0x12c   : > { %990 = vmatprep.mubr.f32.mxu1 %v434_v27 }
 0x12d   : > { %v1097_v0 = vpop.eup %1096 }
 0x12e   : > { %v435_v29 = vmul.f32 %v1097_v0, %v387_v60 }
 0x130   : > { %991 = vmatmul.mubr.f32.gmra.mrb[6].mxu1 %v435_v29  ;;  %v758_v29 = vmul.f32 0.111703366, %v747_v23 }
 0x1eb   : > { %v983_v3 = vpop.f32.mrb[0].mxu1 }
 0x1ec   : > { %574 = vst [vmem:[#allocation3 + $0x20] sm:$0xff] %v983_v3  ;;  %v518_v8 = vpop.f32.mrb[1].mxu1 }
 0x1ed   : > { %573 = vst [vmem:[#allocation3 + $0x8] sm:$0xff] %v518_v8 }
 0x1f3   : > { %v584_v12 = vld [vmem:[#allocation3 + $0x1e] ss:$2 sm:$0xf]  ;;  %v608_v18 = vld [vmem:[#allocation3 + $0x1f] ss:$2 sm:$0xf] }
 0x1f4   : > { %v598_v21 = vmul.f32 0.111703366, %v584_v12  ;;  %v622_v28 = vmul.f32 0.23647602, %v608_v18  ;;  %v986_v31 = vpop.f32.mrb[2].mxu1 }
 0x1f5   : > { %v640_v32 = vld [vmem:[#allocation3 + $0x20] ss:$2 sm:$0xf]  ;;  %v672_v33 = vld [vmem:[#allocation3 + $0x21] ss:$2 sm:$0xf] }
 0x1f6   : > { %576 = vst [vmem:[#allocation3 + $0x50] sm:$0xff] %v986_v31  ;;  %v630_v34 = vadd.f32 %v622_v28, %v598_v21  ;;  %v654_v35 = vmul.f32 0.30364123, %v640_v32  ;;  %v528_v36 = vpop.f32.mrb[3].mxu1  ;;  %v686_v40 = vmul.f32 0.23647602, %v672_v33 }
 0x1f7   : > { %v704_v37 = vld [vmem:[#allocation3 + $0x22] ss:$2 sm:$0xf]  ;;  %575 = vst [vmem:[#allocation3 + $0x38] sm:$0xff] %v528_v36  ;;  %v762_v21 = vmul.f32 0.23647602, %v748_v57 }
 0x1f8   : > { %v582_v38 = vld [vmem:[#allocation3 + $0x6] ss:$2 sm:$0xf]  ;;  %v662_v39 = vadd.f32 %v654_v35, %v630_v34  ;;  %v606_v42 = vld [vmem:[#allocation3 + $0x7] ss:$2 sm:$0xf] }
 0x1f9   : > { %v597_v41 = vmul.f32 0.111703366, %v582_v38  ;;  %v638_v43 = vld [vmem:[#allocation3 + $0x8] ss:$2 sm:$0xf] }
 0x1fa   : > { %v694_v44 = vadd.f32 %v686_v40, %v662_v39  ;;  %v718_v45 = vmul.f32 0.111703366, %v704_v37  ;;  %v621_v46 = vmul.f32 0.23647602, %v606_v42  ;;  %v653_v47 = vmul.f32 0.30364123, %v638_v43 }
 0x1fb   : > { %v670_v55 = vld [vmem:[#allocation3 + $0x9] ss:$2 sm:$0xf]  ;;  %v702_v62 = vld [vmem:[#allocation3 + $0xa] ss:$2 sm:$0xf]  ;;  %v766_v40 = vadd.f32 %v762_v21, %v758_v29 }
 0x1fc   : > { %v726_v58 = vadd.f32 %v718_v45, %v694_v44  ;;  %v629_v59 = vadd.f32 %v621_v46, %v597_v41  ;;  %v685_v61 = vmul.f32 0.23647602, %v670_v55  ;;  %v989_v48 = vpop.f32.mrb[4].mxu1  ;;  %v717_v51 = vmul.f32 0.111703366, %v702_v62 }
 0x1fd   : > { %v588_v49 = vld [vmem:[#allocation3 + $0x4e] ss:$2 sm:$0xf]  ;;  %v612_v56 = vld [vmem:[#allocation3 + $0x4f] ss:$2 sm:$0xf] }
 0x1fe   : > { %578 = vst [vmem:[#allocation3 + $0x80] sm:$0xff] %v989_v48  ;;  %740 = vst [vmem:[#allocation4 + $0xc] sm:$0xf] %v726_v58  ;;  %v661_v1 = vadd.f32 %v653_v47, %v629_v59  ;;  %v600_v2 = vmul.f32 0.111703366, %v588_v49  ;;  %v538_v5 = vpop.f32.mrb[5].mxu1 }
 0x1ff   : > { %v624_v4 = vmul.f32 0.23647602, %v612_v56  ;;  %v644_v6 = vld [vmem:[#allocation3 + $0x50] ss:$2 sm:$0xf]  ;;  %577 = vst [vmem:[#allocation3 + $0x68] sm:$0xff] %v538_v5 }
 0x200   : > { %v676_v7 = vld [vmem:[#allocation3 + $0x51] ss:$2 sm:$0xf]  ;;  %v693_v50 = vadd.f32 %v685_v61, %v661_v1  ;;  %v656_v9 = vmul.f32 0.30364123, %v644_v6 }
 0x201   : > { %v632_v63 = vadd.f32 %v624_v4, %v600_v2  ;;  %v708_v10 = vld [vmem:[#allocation3 + $0x52] ss:$2 sm:$0xf]  ;;  %v688_v16 = vmul.f32 0.23647602, %v676_v7 }
 0x202   : > { %v586_v11 = vld [vmem:[#allocation3 + $0x36] ss:$2 sm:$0xf]  ;;  %v725_v13 = vadd.f32 %v717_v51, %v693_v50  ;;  %v610_v19 = vld [vmem:[#allocation3 + $0x37] ss:$2 sm:$0xf] }
 0x203   : > { %v664_v15 = vadd.f32 %v656_v9, %v632_v63  ;;  %v599_v17 = vmul.f32 0.111703366, %v586_v11  ;;  %v642_v52 = vld [vmem:[#allocation3 + $0x38] ss:$2 sm:$0xf]  ;;  %v992_v22 = vpop.f32.mrb[6].mxu1 }
 0x204   : > { %739 = vst [vmem:[#allocation4 + $0x8] sm:$0xf] %v725_v13  ;;  %v720_v14 = vmul.f32 0.111703366, %v708_v10  ;;  %v623_v20 = vmul.f32 0.23647602, %v610_v19 }
 0x205   : > { %v696_v53 = vadd.f32 %v688_v16, %v664_v15  ;;  %v674_v25 = vld [vmem:[#allocation3 + $0x39] ss:$2 sm:$0xf]  ;;  %580 = vst [vmem:[#allocation3 + $0xb0] sm:$0xff] %v992_v22  ;;  %v548_v54 = vpop.f32.mrb[7].mxu1 }
 0x206   : > { %v631_v26 = vadd.f32 %v623_v20, %v599_v17  ;;  %v655_v27 = vmul.f32 0.30364123, %v642_v52  ;;  %579 = vst [vmem:[#allocation3 + $0x98] sm:$0xff] %v548_v54  ;;  %v706_v60 = vld [vmem:[#allocation3 + $0x3a] ss:$2 sm:$0xf] }
 0x207   : > { %v728_v24 = vadd.f32 %v720_v14, %v696_v53  ;;  %v592_v0 = vld [vmem:[#allocation3 + $0x7e] ss:$2 sm:$0xf]  ;;  %v687_v3 = vmul.f32 0.23647602, %v674_v25 }
 0x208   : > { %v663_v30 = vadd.f32 %v655_v27, %v631_v26  ;;  %v602_v8 = vmul.f32 0.111703366, %v592_v0  ;;  %v616_v12 = vld [vmem:[#allocation3 + $0x7f] ss:$2 sm:$0xf] }
 0x209   : > { %742 = vst [vmem:[#allocation4 + $0x14] sm:$0xf] %v728_v24  ;;  %v648_v18 = vld [vmem:[#allocation3 + $0x80] ss:$2 sm:$0xf] }
 0x20a   : > { %v695_v28 = vadd.f32 %v687_v3, %v663_v30  ;;  %v719_v31 = vmul.f32 0.111703366, %v706_v60  ;;  %v626_v32 = vmul.f32 0.23647602, %v616_v12  ;;  %v658_v37 = vmul.f32 0.30364123, %v648_v18 }
 0x20b   : > { %v749_v33 = vld [vmem:[#allocation4 + $0x8] sm:$0xf]  ;;  %v680_v34 = vld [vmem:[#allocation3 + $0x81] ss:$2 sm:$0xf] }
 0x20c   : > { %v727_v35 = vadd.f32 %v719_v31, %v695_v28  ;;  %v634_v36 = vadd.f32 %v626_v32, %v602_v8  ;;  %v770_v38 = vmul.f32 0.30364123, %v749_v33  ;;  %v712_v39 = vld [vmem:[#allocation3 + $0x82] ss:$2 sm:$0xf] }
 0x20d   : > { %v690_v42 = vmul.f32 0.23647602, %v680_v34  ;;  %v590_v43 = vld [vmem:[#allocation3 + $0x66] ss:$2 sm:$0xf] }
 0x20e   : > { %741 = vst [vmem:[#allocation4 + $0x10] sm:$0xf] %v727_v35  ;;  %v666_v41 = vadd.f32 %v658_v37, %v634_v36  ;;  %v750_v44 = vld [vmem:[#allocation4 + $0xc] sm:$0xf]  ;;  %v601_v45 = vmul.f32 0.111703366, %v590_v43  ;;  %v774_v61 = vadd.f32 %v770_v38, %v766_v40 }
 0x20f   : > { %v722_v47 = vmul.f32 0.111703366, %v712_v39  ;;  %v614_v55 = vld [vmem:[#allocation3 + $0x67] ss:$2 sm:$0xf] }
 0x210   : > { %v698_v46 = vadd.f32 %v690_v42, %v666_v41  ;;  %v625_v58 = vmul.f32 0.23647602, %v614_v55  ;;  %v646_v59 = vld [vmem:[#allocation3 + $0x68] ss:$2 sm:$0xf] }
 0x211   : > { %v678_v48 = vld [vmem:[#allocation3 + $0x69] ss:$2 sm:$0xf]  ;;  %v657_v56 = vmul.f32 0.30364123, %v646_v59 }
 0x212   : > { %v730_v62 = vadd.f32 %v722_v47, %v698_v46  ;;  %v633_v49 = vadd.f32 %v625_v58, %v601_v45  ;;  %v710_v1 = vld [vmem:[#allocation3 + $0x6a] ss:$2 sm:$0xf]  ;;  %v763_v2 = vmul.f32 0.23647602, %v750_v44 }
 0x213   : > { %v596_v4 = vld [vmem:[#allocation3 + $0xae] ss:$2 sm:$0xf]  ;;  %v689_v7 = vmul.f32 0.23647602, %v678_v48 }
 0x214   : > { %744 = vst [vmem:[#allocation4 + $0x1c] sm:$0xf] %v730_v62  ;;  %v665_v6 = vadd.f32 %v657_v56, %v633_v49  ;;  %v779_v51 = vadd.f32 %v774_v61, %v763_v2  ;;  %v721_v63 = vmul.f32 0.111703366, %v710_v1  ;;  %v604_v9 = vmul.f32 0.111703366, %v596_v4 }
 0x215   : > { %v751_v5 = vld [vmem:[#allocation4 + $0x10] sm:$0xf]  ;;  %v759_v15 = vmul.f32 0.111703366, %v749_v33  ;;  %v752_v54 = vld [vmem:[#allocation4 + $0x14] sm:$0xf] }
 0x216   : > { %v760_v50 = vmul.f32 0.111703366, %v751_v5  ;;  %v697_v10 = vadd.f32 %v689_v7, %v665_v6  ;;  %v620_v11 = vld [vmem:[#allocation3 + $0xaf] ss:$2 sm:$0xf] }
 0x217   : > { %v652_v13 = vld [vmem:[#allocation3 + $0xb0] ss:$2 sm:$0xf]  ;;  %v628_v17 = vmul.f32 0.23647602, %v620_v11  ;;  %v767_v27 = vadd.f32 %v763_v2, %v759_v15 }
 0x218   : > { %v785_v16 = vadd.f32 %v779_v51, %v760_v50  ;;  %v771_v19 = vmul.f32 0.30364123, %v751_v5  ;;  %v729_v52 = vadd.f32 %v721_v63, %v697_v10  ;;  %v684_v53 = vld [vmem:[#allocation3 + $0xb1] ss:$2 sm:$0xf] }
 0x219   : > { %v636_v14 = vadd.f32 %v628_v17, %v604_v9  ;;  %v660_v20 = vmul.f32 0.30364123, %v652_v13  ;;  %v594_v22 = vld [vmem:[#allocation3 + $0x96] ss:$2 sm:$0xf] }
 0x21a   : > { %789 = vst [vmem:[%s1408_s17] sm:$0xf] %v785_v16  ;;  %743 = vst [vmem:[#allocation4 + $0x18] sm:$0xf] %v729_v52  ;;  %v716_v23 = vld [vmem:[#allocation3 + $0xb2] ss:$2 sm:$0xf]  ;;  %v775_v8 = vadd.f32 %v771_v19, %v767_v27 }
 0x21b   : > { %v603_v25 = vmul.f32 0.111703366, %v594_v22  ;;  %v668_v57 = vadd.f32 %v660_v20, %v636_v14  ;;  %v692_v24 = vmul.f32 0.23647602, %v684_v53  ;;  %v724_v30 = vmul.f32 0.111703366, %v716_v23 }
 0x21c   : > { %v618_v26 = vld [vmem:[#allocation3 + $0x97] ss:$2 sm:$0xf]  ;;  %v650_v0 = vld [vmem:[#allocation3 + $0x98] ss:$2 sm:$0xf] }
 0x21d   : > { %v627_v60 = vmul.f32 0.23647602, %v618_v26  ;;  %v700_v29 = vadd.f32 %v692_v24, %v668_v57  ;;  %v682_v3 = vld [vmem:[#allocation3 + $0x99] ss:$2 sm:$0xf] }
 0x21e   : > { %v659_v18 = vmul.f32 0.30364123, %v650_v0  ;;  %v714_v28 = vld [vmem:[#allocation3 + $0x9a] ss:$2 sm:$0xf] }
 0x21f   : > { %v635_v12 = vadd.f32 %v627_v60, %v603_v25  ;;  %v732_v21 = vadd.f32 %v724_v30, %v700_v29  ;;  %v764_v31 = vmul.f32 0.23647602, %v752_v54  ;;  %v691_v33 = vmul.f32 0.23647602, %v682_v3  ;;  %v754_v42 = vld [vmem:[#allocation4 + $0x1c] sm:$0xf] }
 0x220   : > { %v723_v38 = vmul.f32 0.111703366, %v714_v28  ;;  %v765_v44 = vmul.f32 0.23647602, %v754_v42  ;;  %v757_v55 = vld [vmem:[#allocation4 + $0x28] sm:$0xf] }
 0x221   : > { %v667_v32 = vadd.f32 %v659_v18, %v635_v12  ;;  %v753_v34 = vld [vmem:[#allocation4 + $0x18] sm:$0xf]  ;;  %746 = vst [vmem:[#allocation4 + $0x24] sm:$0xf] %v732_v21  ;;  %v780_v36 = vadd.f32 %v775_v8, %v764_v31  ;;  %v768_v43 = vadd.f32 %v764_v31, %v760_v50  ;;  %v784_v56 = vmul.f32 0.111703366, %v757_v55 }
 0x222   : > { %v761_v35 = vmul.f32 0.111703366, %v753_v34  ;;  %v772_v41 = vmul.f32 0.30364123, %v753_v34 }
 0x223   : > { %v699_v37 = vadd.f32 %v691_v33, %v667_v32 }
 0x224   : > { %v786_v39 = vadd.f32 %v780_v36, %v761_v35  ;;  %v776_v45 = vadd.f32 %v772_v41, %v768_v43  ;;  %v769_v58 = vadd.f32 %v765_v44, %v761_v35 }
 0x225   : > { %v731_v40 = vadd.f32 %v723_v38, %v699_v37 }
 0x226   : > { %790 = vst [vmem:[%s1408_s17 + $0x4] sm:$0xf] %v786_v39  ;;  %v781_v61 = vadd.f32 %v776_v45, %v765_v44 }
 0x227   : > { %745 = vst [vmem:[#allocation4 + $0x20] sm:$0xf] %v731_v40 }
 0x228   : > { %v756_v46 = vld [vmem:[#allocation4 + $0x24] sm:$0xf] }
 0x229   : > { %v778_v48 = vmul.f32 0.23647602, %v756_v46 }
 0x22e   : > { %v755_v47 = vld [vmem:[#allocation4 + $0x20] sm:$0xf] }
 0x22f   : > { %v773_v59 = vmul.f32 0.30364123, %v755_v47  ;;  %v783_v62 = vmul.f32 0.111703366, %v755_v47 }
 0x231   : > { %v777_v49 = vadd.f32 %v773_v59, %v769_v58  ;;  %v787_v1 = vadd.f32 %v783_v62, %v781_v61 }
 0x233   : > { %v782_v2 = vadd.f32 %v778_v48, %v777_v49  ;;  %791 = vst [vmem:[%s1408_s17 + $0x8] sm:$0xf] %v787_v1 }
 0x235   : > { %v788_v4 = vadd.f32 %v784_v56, %v782_v2 }
 0x237   : > { %792 = vst [vmem:[%s1408_s17 + $0xc] sm:$0xf] %v788_v4 }
 0x238 PF: > { %s13_s12 = sadd.s32 1, %s1104_s12  }
 0x239   : > { %p10_p4 = scmp.ge.s32.totalorder %s13_s12, 4  }
 0x23b   :  { %12 = sbr.rel (!%p10_p4) target bundleno = 1 (0x1), region = 104 }

</bundles_post_ra>
